<compile_context>
chip_gen: v5e
topology: v5e:2x2
jax: 0.10.0
libtpu: 0.0.40
codegen_flags: <defaults>
</compile_context>

<pallas_src>
import functools

import jax
import jax.numpy as jnp
from jax.experimental import pallas as pl
from jax.experimental.pallas import tpu as pltpu


def _round_up(x, m):
  return ((x + m - 1) // m) * m


def _pick_tile(R, K, H, num_in, itemsize, requested):
  """Clamp the node tile so double-buffered input blocks plus f32 temporaries
  stay comfortably inside v7x's 64 MiB physical VMEM (the tightest gen).
  With realistic graphs (R = B*2000 rows) the resulting grid still has many
  steps, so dimension_semantics=('parallel',) keeps both v7x TensorCores busy.
  """
  budget = 40 * 1024 * 1024
  # Per-row bytes of the pipelined inputs (compute dtype) + the f32 mask.
  in_row = (H + 2 * K * H + K * num_in) * itemsize + K * 4
  # Per-row bytes of the main f32 temporaries (Q/K1/K2/V/prod/attend_h/...).
  tmp_row = (6 * K * H + 2 * H) * 4
  per_row = 2 * in_row + tmp_row + 2 * H * 4
  tn = min(int(requested), max(8, budget // max(per_row, 1)))
  tn = max(8, (tn // 8) * 8)                 # sublane-aligned
  return min(tn, _round_up(R, 8))            # never bigger than the problem


def _neighbor_attention_kernel(
    hV_ref, hKE_ref, hKV_ref, hEV_ref, mask_ref,
    wq_ref, wk1_ref, wk2_ref, wv_ref, wo_ref,
    out_ref,
    *, num_heads: int, head_dim: int, approx_recip: bool,
):
  TN, K, H = hKE_ref.shape
  nh, d = num_heads, head_dim
  f32 = jnp.float32
  neg_inf = f32(jnp.finfo(jnp.float32).min)  # matches np.finfo(np.float32).min

  hV = hV_ref[...]                                         # (TN, H)
  hKE = hKE_ref[...].reshape(TN * K, H)                    # (TN*K, H)
  hKV = hKV_ref[...].reshape(TN * K, H)                    # (TN*K, H)
  hEV = hEV_ref[...].reshape(TN * K, hEV_ref.shape[-1])    # (TN*K, 2H)
  mask = mask_ref[...]                                     # (TN, K) f32

  # Linear projections (MXU, bf16 or f32 inputs, f32 accumulation).
  Q = jnp.dot(hV, wq_ref[...], preferred_element_type=f32)       # (TN, H)
  K1 = jnp.dot(hKE, wk1_ref[...], preferred_element_type=f32)    # (TN*K, H)
  K2 = jnp.dot(hKV, wk2_ref[...], preferred_element_type=f32)    # (TN*K, H)
  V = jnp.dot(hEV, wv_ref[...], preferred_element_type=f32)      # (TN*K, H)

  # All heads at once: triple product over the full hidden dim (f32, VPU).
  prod = Q[:, None, :] * K1.reshape(TN, K, H) * K2.reshape(TN, K, H)  # (TN,K,H)

  # Head-indicator matrices built once per step (avoids integer division).
  r = jax.lax.broadcasted_iota(jnp.int32, (H, nh), 0)
  c = jax.lax.broadcasted_iota(jnp.int32, (H, nh), 1)
  head_sum = jnp.where((r >= c * d) & (r < (c + 1) * d), f32(1.0), f32(0.0))
  r2 = jax.lax.broadcasted_iota(jnp.int32, (nh, H), 0)
  c2 = jax.lax.broadcasted_iota(jnp.int32, (nh, H), 1)
  head_expand = jnp.where((c2 >= r2 * d) & (c2 < (r2 + 1) * d),
                          f32(1.0), f32(0.0))

  # Segmented per-head d-reduction on the MXU: (TN*K,H) @ (H,nh) -> (TN*K,nh).
  logits = jnp.dot(prod.reshape(TN * K, H), head_sum,
                   preferred_element_type=f32).reshape(TN, K, nh)
  logits = logits * f32(1.0 / d)

  # Vectorized masked softmax over neighbors (axis=1), all heads at once, f32.
  mask3 = jnp.broadcast_to(mask[:, :, None], (TN, K, nh))
  masked = jnp.where(mask3 > 0, logits, neg_inf)
  m = jnp.max(masked, axis=1, keepdims=True)               # (TN, 1, nh)
  e = jnp.exp(masked - m)
  s = jnp.sum(e, axis=1, keepdims=True)                    # (TN, 1, nh)
  if approx_recip:
    inv_s = pl.reciprocal(s, approx=True)                  # EUP slot, ~free
  else:
    inv_s = 1.0 / s                                        # exact (f32 path)
  attend = mask3 * (e * inv_s)                             # (TN, K, nh)

  # Expand per-head weights to H via (nh,H) indicator matmul; weighted sum
  # over neighbors gives the node update.
  attend_h = jnp.dot(attend.reshape(TN * K, nh), head_expand,
                     preferred_element_type=f32)           # (TN*K, H)
  h_update = (attend_h * V).reshape(TN, K, H).sum(axis=1)  # (TN, H) f32

  out_ref[...] = jnp.dot(h_update.astype(wo_ref.dtype), wo_ref[...],
                         preferred_element_type=f32).astype(out_ref.dtype)


def neighbor_attention(h_V, h_EV, h_KV, h_KE, mask_attend,
                       W_Q, W_K1, W_K2, W_V, W_O, num_heads,
                       *, tile_nodes=256, compute_dtype=jnp.bfloat16,
                       vmem_limit_bytes=64 * 1024 * 1024):
  """Pallas NeighborAttention forward.

  Args (PyTorch-style shapes):
    h_V:         [B, N, H]
    h_EV:        [B, N, K, 2H]
    h_KV, h_KE:  [B, N, K, H]
    mask_attend: [B, N, K]
    W_*:         PyTorch nn.Linear weights, shape [out, in].
    compute_dtype: dtype for the matmul inputs/weights (bf16 halves HBM
      traffic on this memory-bound kernel); softmax math is always f32.
  Returns: [B, N, H] float32.
  """
  B, N, H = h_V.shape
  K = h_EV.shape[2]
  num_in = h_EV.shape[3]
  assert H % num_heads == 0
  d = H // num_heads
  R = B * N
  cdt = jnp.dtype(compute_dtype)

  # Flatten batch/node axes; pre-transpose weights so kernel does x @ W.
  hV_f = h_V.reshape(R, H).astype(cdt)
  hEV_f = h_EV.reshape(R, K, num_in).astype(cdt)
  hKV_f = h_KV.reshape(R, K, H).astype(cdt)
  hKE_f = h_KE.reshape(R, K, H).astype(cdt)
  mask_f = mask_attend.reshape(R, K).astype(jnp.float32)
  wq_t = W_Q.T.astype(cdt)
  wk1_t = W_K1.T.astype(cdt)
  wk2_t = W_K2.T.astype(cdt)
  wv_t = W_V.T.astype(cdt)
  wo_t = W_O.T.astype(cdt)

  # Tile the row axis; pad the tail instead of requiring divisibility.
  TN = _pick_tile(R, K, H, num_in, cdt.itemsize, tile_nodes)
  R_pad = _round_up(R, TN)
  if R_pad != R:
    pad = R_pad - R
    pad2 = ((0, pad), (0, 0))
    pad3 = ((0, pad), (0, 0), (0, 0))
    hV_f = jnp.pad(hV_f, pad2)
    hEV_f = jnp.pad(hEV_f, pad3)
    hKV_f = jnp.pad(hKV_f, pad3)
    hKE_f = jnp.pad(hKE_f, pad3)
    mask_f = jnp.pad(mask_f, pad2)   # padded rows fully masked -> zero output

  kernel = functools.partial(
      _neighbor_attention_kernel,
      num_heads=num_heads, head_dim=d,
      approx_recip=(cdt != jnp.dtype(jnp.float32)))

  out = pl.pallas_call(
      kernel,
      out_shape=jax.ShapeDtypeStruct((R_pad, H), jnp.float32),
      grid_spec=pltpu.PrefetchScalarGridSpec(
          num_scalar_prefetch=0,
          grid=(R_pad // TN,),
          in_specs=[
              pl.BlockSpec((TN, H), lambda i: (i, 0)),             # h_V
              pl.BlockSpec((TN, K, H), lambda i: (i, 0, 0)),       # h_KE
              pl.BlockSpec((TN, K, H), lambda i: (i, 0, 0)),       # h_KV
              pl.BlockSpec((TN, K, num_in), lambda i: (i, 0, 0)),  # h_EV
              pl.BlockSpec((TN, K), lambda i: (i, 0)),             # mask
              pl.BlockSpec((H, H), lambda i: (0, 0)),              # W_Q^T
              pl.BlockSpec((H, H), lambda i: (0, 0)),              # W_K1^T
              pl.BlockSpec((H, H), lambda i: (0, 0)),              # W_K2^T
              pl.BlockSpec((num_in, H), lambda i: (0, 0)),         # W_V^T
              pl.BlockSpec((H, H), lambda i: (0, 0)),              # W_O^T
          ],
          out_specs=pl.BlockSpec((TN, H), lambda i: (i, 0)),
      ),
      compiler_params=pltpu.CompilerParams(
          dimension_semantics=("parallel",),
          vmem_limit_bytes=vmem_limit_bytes),
  )(hV_f, hKE_f, hKV_f, hEV_f, mask_f, wq_t, wk1_t, wk2_t, wv_t, wo_t)

  return out[:R].reshape(B, N, H)


def neighbor_attention_ref(h_V, h_EV, h_KV, h_KE, mask_attend,
                           W_Q, W_K1, W_K2, W_V, W_O, num_heads):
  """Plain-JAX reference mirroring the PyTorch forward exactly (f32)."""
  B, N, H = h_V.shape
  K = h_EV.shape[2]
  d = H // num_heads
  neg_inf = jnp.float32(jnp.finfo(jnp.float32).min)

  Q = (h_V @ W_Q.T).reshape(B, N, 1, num_heads, d)
  Q = jnp.broadcast_to(Q, (B, N, K, num_heads, d))
  K1 = (h_KE @ W_K1.T).reshape(B, N, K, num_heads, d)
  K2 = (h_KV @ W_K2.T).reshape(B, N, K, num_heads, d)
  V = (h_EV @ W_V.T).reshape(B, N, K, num_heads, d)

  logits = jnp.sum(Q * K1 * K2, axis=-1)            # [B,N,K,heads]
  logits = jnp.swapaxes(logits, -2, -1) / d         # [B,N,heads,K]
  mask = jnp.broadcast_to(mask_attend[:, :, None, :], logits.shape)
  logits = jnp.where(mask > 0, logits, neg_inf)
  attend = jax.nn.softmax(logits, axis=-1)
  attend = mask * attend                            # [B,N,heads,K]

  Vt = jnp.swapaxes(V, 2, 3)                        # [B,N,heads,K,d]
  upd = jnp.matmul(attend[..., None, :], Vt)        # [B,N,heads,1,d]
  upd = upd.reshape(B, N, H)
  return upd @ W_O.T


if __name__ == "__main__":
  # Small shapes; N chosen so R=B*N=36 exercises the tail-padding path.
  B, N, K, H, num_heads = 2, 18, 8, 32, 4
  num_in = 2 * H

  key = jax.random.PRNGKey(0)
  ks = jax.random.split(key, 10)
  h_V = jax.random.normal(ks[0], (B, N, H), jnp.float32)
  h_EV = jax.random.normal(ks[1], (B, N, K, num_in), jnp.float32)
  h_KV = jax.random.normal(ks[2], (B, N, K, H), jnp.float32)
  h_KE = jax.random.normal(ks[3], (B, N, K, H), jnp.float32)
  # Deterministic neighbor mask (keep neighbor 0 always valid).
  mask = (jax.random.uniform(ks[4], (B, N, K)) > 0.3).astype(jnp.float32)
  mask = mask.at[:, :, 0].set(1.0)

  scale = 0.1
  W_Q = scale * jax.random.normal(ks[5], (H, H), jnp.float32)
  W_K1 = scale * jax.random.normal(ks[6], (H, H), jnp.float32)
  W_K2 = scale * jax.random.normal(ks[7], (H, H), jnp.float32)
  W_V = scale * jax.random.normal(ks[8], (H, num_in), jnp.float32)
  W_O = scale * jax.random.normal(ks[9], (H, H), jnp.float32)

  ref = neighbor_attention_ref(h_V, h_EV, h_KV, h_KE, mask,
                               W_Q, W_K1, W_K2, W_V, W_O, num_heads)

  # 1) f32 compute path: tight numerical check against the reference.
  out_f32 = jax.block_until_ready(
      neighbor_attention(h_V, h_EV, h_KV, h_KE, mask,
                         W_Q, W_K1, W_K2, W_V, W_O, num_heads,
                         compute_dtype=jnp.float32))
  assert out_f32.shape == (B, N, H)
  assert jnp.allclose(out_f32, ref, atol=2e-3, rtol=2e-3), (
      float(jnp.max(jnp.abs(out_f32 - ref))))

  # 2) bf16 compute path (performance configuration): bf16 MXU inputs with
  #    f32 accumulation + f32 softmax; expect bf16-rounding-level error only.
  out_bf16 = jax.block_until_ready(
      neighbor_attention(h_V, h_EV, h_KV, h_KE, mask,
                         W_Q, W_K1, W_K2, W_V, W_O, num_heads,
                         compute_dtype=jnp.bfloat16))
  assert out_bf16.shape == (B, N, H)
  assert jnp.allclose(out_bf16, ref, atol=5e-2, rtol=5e-2), (
      float(jnp.max(jnp.abs(out_bf16 - ref))))

  print("KERNEL_OK")
</pallas_src>

<mosaic_0001>
module attributes {stable_mosaic.version = 11 : i64} {
  func.func @_neighbor_attention_kernel(%arg0: i32, %arg1: memref<40x32xf32, #tpu.memory_space<vmem>>, %arg2: memref<40x8x32xf32, #tpu.memory_space<vmem>>, %arg3: memref<40x8x32xf32, #tpu.memory_space<vmem>>, %arg4: memref<40x8x64xf32, #tpu.memory_space<vmem>>, %arg5: memref<40x8xf32, #tpu.memory_space<vmem>>, %arg6: memref<32x32xf32, #tpu.memory_space<vmem>>, %arg7: memref<32x32xf32, #tpu.memory_space<vmem>>, %arg8: memref<32x32xf32, #tpu.memory_space<vmem>>, %arg9: memref<64x32xf32, #tpu.memory_space<vmem>>, %arg10: memref<32x32xf32, #tpu.memory_space<vmem>>, %arg11: memref<40x32xf32, #tpu.memory_space<vmem>>) attributes {dimension_semantics = [#tpu.dimension_semantics<parallel>], iteration_bounds = array<i64: 1>, scalar_prefetch = 0 : i64, scratch_operands = 0 : i64, tpu.core_type = #tpu.core_type<tc>, window_params = [{transform_indices = @transform_0, window_bounds = array<i64: 40, 32>}, {transform_indices = @transform_1, window_bounds = array<i64: 40, 8, 32>}, {transform_indices = @transform_2, window_bounds = array<i64: 40, 8, 32>}, {transform_indices = @transform_3, window_bounds = array<i64: 40, 8, 64>}, {transform_indices = @transform_4, window_bounds = array<i64: 40, 8>}, {pipeline_mode = #tpu.pipeline_mode<synchronous>, transform_indices = @transform_5, window_bounds = array<i64: 32, 32>}, {pipeline_mode = #tpu.pipeline_mode<synchronous>, transform_indices = @transform_6, window_bounds = array<i64: 32, 32>}, {pipeline_mode = #tpu.pipeline_mode<synchronous>, transform_indices = @transform_7, window_bounds = array<i64: 32, 32>}, {pipeline_mode = #tpu.pipeline_mode<synchronous>, transform_indices = @transform_8, window_bounds = array<i64: 64, 32>}, {pipeline_mode = #tpu.pipeline_mode<synchronous>, transform_indices = @transform_9, window_bounds = array<i64: 32, 32>}, {transform_indices = @transform_10, window_bounds = array<i64: 40, 32>}]} {
    %c0 = arith.constant 0 : index
    %c0_0 = arith.constant 0 : index
    %0 = vector.load %arg1[%c0, %c0_0] : memref<40x32xf32, #tpu.memory_space<vmem>>, vector<40x32xf32>
    %c0_1 = arith.constant 0 : index
    %c0_2 = arith.constant 0 : index
    %c0_3 = arith.constant 0 : index
    %1 = vector.load %arg2[%c0_1, %c0_2, %c0_3] : memref<40x8x32xf32, #tpu.memory_space<vmem>>, vector<40x8x32xf32>
    %2 = vector.shape_cast %1 : vector<40x8x32xf32> to vector<320x32xf32>
    %c0_4 = arith.constant 0 : index
    %c0_5 = arith.constant 0 : index
    %c0_6 = arith.constant 0 : index
    %3 = vector.load %arg3[%c0_4, %c0_5, %c0_6] : memref<40x8x32xf32, #tpu.memory_space<vmem>>, vector<40x8x32xf32>
    %4 = vector.shape_cast %3 : vector<40x8x32xf32> to vector<320x32xf32>
    %c0_7 = arith.constant 0 : index
    %c0_8 = arith.constant 0 : index
    %c0_9 = arith.constant 0 : index
    %5 = vector.load %arg4[%c0_7, %c0_8, %c0_9] : memref<40x8x64xf32, #tpu.memory_space<vmem>>, vector<40x8x64xf32>
    %6 = vector.shape_cast %5 : vector<40x8x64xf32> to vector<320x64xf32>
    %c0_10 = arith.constant 0 : index
    %c0_11 = arith.constant 0 : index
    %7 = vector.load %arg5[%c0_10, %c0_11] : memref<40x8xf32, #tpu.memory_space<vmem>>, vector<40x8xf32>
    %c0_12 = arith.constant 0 : index
    %c0_13 = arith.constant 0 : index
    %8 = vector.load %arg6[%c0_12, %c0_13] : memref<32x32xf32, #tpu.memory_space<vmem>>, vector<32x32xf32>
    %cst = arith.constant dense<0.000000e+00> : vector<40x32xf32>
    %9 = tpu.matmul %0, %8, %cst {dimension_numbers = #tpu.dot_dimension_numbers<[1], [0], [0], [1], [0, 0, 1, 1], [], []>} : vector<40x32xf32>, vector<32x32xf32>, vector<40x32xf32> -> vector<40x32xf32>
    %c0_14 = arith.constant 0 : index
    %c0_15 = arith.constant 0 : index
    %10 = vector.load %arg7[%c0_14, %c0_15] : memref<32x32xf32, #tpu.memory_space<vmem>>, vector<32x32xf32>
    %cst_16 = arith.constant dense<0.000000e+00> : vector<320x32xf32>
    %11 = tpu.matmul %2, %10, %cst_16 {dimension_numbers = #tpu.dot_dimension_numbers<[1], [0], [0], [1], [0, 0, 1, 1], [], []>} : vector<320x32xf32>, vector<32x32xf32>, vector<320x32xf32> -> vector<320x32xf32>
    %c0_17 = arith.constant 0 : index
    %c0_18 = arith.constant 0 : index
    %12 = vector.load %arg8[%c0_17, %c0_18] : memref<32x32xf32, #tpu.memory_space<vmem>>, vector<32x32xf32>
    %cst_19 = arith.constant dense<0.000000e+00> : vector<320x32xf32>
    %13 = tpu.matmul %4, %12, %cst_19 {dimension_numbers = #tpu.dot_dimension_numbers<[1], [0], [0], [1], [0, 0, 1, 1], [], []>} : vector<320x32xf32>, vector<32x32xf32>, vector<320x32xf32> -> vector<320x32xf32>
    %c0_20 = arith.constant 0 : index
    %c0_21 = arith.constant 0 : index
    %14 = vector.load %arg9[%c0_20, %c0_21] : memref<64x32xf32, #tpu.memory_space<vmem>>, vector<64x32xf32>
    %cst_22 = arith.constant dense<0.000000e+00> : vector<320x32xf32>
    %15 = tpu.matmul %6, %14, %cst_22 {dimension_numbers = #tpu.dot_dimension_numbers<[1], [0], [0], [1], [0, 0, 1, 1], [], []>} : vector<320x64xf32>, vector<64x32xf32>, vector<320x32xf32> -> vector<320x32xf32>
    %16 = vector.shape_cast %9 : vector<40x32xf32> to vector<40x1x32xf32>
    %17 = vector.shape_cast %11 : vector<320x32xf32> to vector<40x8x32xf32>
    %18 = vector.broadcast %16 : vector<40x1x32xf32> to vector<40x8x32xf32>
    %19 = arith.mulf %18, %17 : vector<40x8x32xf32>
    %20 = vector.shape_cast %13 : vector<320x32xf32> to vector<40x8x32xf32>
    %21 = arith.mulf %19, %20 : vector<40x8x32xf32>
    %22 = tpu.iota {dimensions = array<i32: 0>} : vector<32x4xi32>
    %23 = tpu.iota {dimensions = array<i32: 1>} : vector<32x4xi32>
    %c8_i32 = arith.constant 8 : i32
    %24 = vector.broadcast %c8_i32 : i32 to vector<32x4xi32>
    %25 = arith.muli %23, %24 : vector<32x4xi32>
    %26 = arith.cmpi sge, %22, %25 : vector<32x4xi32>
    %c1_i32 = arith.constant 1 : i32
    %27 = vector.broadcast %c1_i32 : i32 to vector<32x4xi32>
    %28 = arith.addi %23, %27 : vector<32x4xi32>
    %c8_i32_23 = arith.constant 8 : i32
    %29 = vector.broadcast %c8_i32_23 : i32 to vector<32x4xi32>
    %30 = arith.muli %28, %29 : vector<32x4xi32>
    %31 = arith.cmpi slt, %22, %30 : vector<32x4xi32>
    %32 = arith.andi %26, %31 : vector<32x4xi1>
    %cst_24 = arith.constant 1.000000e+00 : f32
    %cst_25 = arith.constant 0.000000e+00 : f32
    %33 = vector.broadcast %cst_24 : f32 to vector<32x4xf32>
    %34 = vector.broadcast %cst_25 : f32 to vector<32x4xf32>
    %35 = arith.select %32, %33, %34 : vector<32x4xi1>, vector<32x4xf32>
    %36 = tpu.iota {dimensions = array<i32: 0>} : vector<4x32xi32>
    %37 = tpu.iota {dimensions = array<i32: 1>} : vector<4x32xi32>
    %c8_i32_26 = arith.constant 8 : i32
    %38 = vector.broadcast %c8_i32_26 : i32 to vector<4x32xi32>
    %39 = arith.muli %36, %38 : vector<4x32xi32>
    %40 = arith.cmpi sge, %37, %39 : vector<4x32xi32>
    %c1_i32_27 = arith.constant 1 : i32
    %41 = vector.broadcast %c1_i32_27 : i32 to vector<4x32xi32>
    %42 = arith.addi %36, %41 : vector<4x32xi32>
    %c8_i32_28 = arith.constant 8 : i32
    %43 = vector.broadcast %c8_i32_28 : i32 to vector<4x32xi32>
    %44 = arith.muli %42, %43 : vector<4x32xi32>
    %45 = arith.cmpi slt, %37, %44 : vector<4x32xi32>
    %46 = arith.andi %40, %45 : vector<4x32xi1>
    %cst_29 = arith.constant 1.000000e+00 : f32
    %cst_30 = arith.constant 0.000000e+00 : f32
    %47 = vector.broadcast %cst_29 : f32 to vector<4x32xf32>
    %48 = vector.broadcast %cst_30 : f32 to vector<4x32xf32>
    %49 = arith.select %46, %47, %48 : vector<4x32xi1>, vector<4x32xf32>
    %50 = vector.shape_cast %21 : vector<40x8x32xf32> to vector<320x32xf32>
    %cst_31 = arith.constant dense<0.000000e+00> : vector<320x4xf32>
    %51 = tpu.matmul %50, %35, %cst_31 {dimension_numbers = #tpu.dot_dimension_numbers<[1], [0], [0], [1], [0, 0, 1, 1], [], []>} : vector<320x32xf32>, vector<32x4xf32>, vector<320x4xf32> -> vector<320x4xf32>
    %52 = vector.shape_cast %51 : vector<320x4xf32> to vector<40x8x4xf32>
    %cst_32 = arith.constant 1.250000e-01 : f32
    %53 = vector.broadcast %cst_32 : f32 to vector<40x8x4xf32>
    %54 = arith.mulf %52, %53 : vector<40x8x4xf32>
    %55 = vector.shape_cast %7 : vector<40x8xf32> to vector<40x8x1xf32>
    %56 = vector.shape_cast %55 : vector<40x8x1xf32> to vector<40x8x1xf32>
    %57 = vector.broadcast %56 : vector<40x8x1xf32> to vector<40x8x4xf32>
    %cst_33 = arith.constant 0.000000e+00 : f32
    %58 = vector.broadcast %cst_33 : f32 to vector<40x8x4xf32>
    %59 = arith.cmpf ogt, %57, %58 : vector<40x8x4xf32>
    %cst_34 = arith.constant -3.40282347E+38 : f32
    %60 = vector.broadcast %cst_34 : f32 to vector<40x8x4xf32>
    %61 = arith.select %59, %54, %60 : vector<40x8x4xi1>, vector<40x8x4xf32>
    %cst_35 = arith.constant dense<0xFF800000> : vector<40x4xf32>
    %62 = vector.multi_reduction <maximumf>, %61, %cst_35 [1] : vector<40x8x4xf32> to vector<40x4xf32>
    %63 = vector.shape_cast %62 : vector<40x4xf32> to vector<40x1x4xf32>
    %64 = vector.broadcast %63 : vector<40x1x4xf32> to vector<40x8x4xf32>
    %65 = arith.subf %61, %64 : vector<40x8x4xf32>
    %66 = math.exp %65 : vector<40x8x4xf32>
    %cst_36 = arith.constant dense<0.000000e+00> : vector<40x4xf32>
    %67 = vector.multi_reduction <add>, %66, %cst_36 [1] : vector<40x8x4xf32> to vector<40x4xf32>
    %68 = vector.shape_cast %67 : vector<40x4xf32> to vector<40x1x4xf32>
    %cst_37 = arith.constant 1.000000e+00 : f32
    %69 = vector.broadcast %cst_37 : f32 to vector<40x1x4xf32>
    %70 = arith.divf %69, %68 : vector<40x1x4xf32>
    %71 = vector.broadcast %70 : vector<40x1x4xf32> to vector<40x8x4xf32>
    %72 = arith.mulf %66, %71 : vector<40x8x4xf32>
    %73 = arith.mulf %57, %72 : vector<40x8x4xf32>
    %74 = vector.shape_cast %73 : vector<40x8x4xf32> to vector<320x4xf32>
    %cst_38 = arith.constant dense<0.000000e+00> : vector<320x32xf32>
    %75 = tpu.matmul %74, %49, %cst_38 {dimension_numbers = #tpu.dot_dimension_numbers<[1], [0], [0], [1], [0, 0, 1, 1], [], []>} : vector<320x4xf32>, vector<4x32xf32>, vector<320x32xf32> -> vector<320x32xf32>
    %76 = arith.mulf %75, %15 : vector<320x32xf32>
    %77 = vector.shape_cast %76 : vector<320x32xf32> to vector<40x8x32xf32>
    %cst_39 = arith.constant dense<0.000000e+00> : vector<40x32xf32>
    %78 = vector.multi_reduction <add>, %77, %cst_39 [1] : vector<40x8x32xf32> to vector<40x32xf32>
    %c0_40 = arith.constant 0 : index
    %c0_41 = arith.constant 0 : index
    %79 = vector.load %arg10[%c0_40, %c0_41] : memref<32x32xf32, #tpu.memory_space<vmem>>, vector<32x32xf32>
    %cst_42 = arith.constant dense<0.000000e+00> : vector<40x32xf32>
    %80 = tpu.matmul %78, %79, %cst_42 {dimension_numbers = #tpu.dot_dimension_numbers<[1], [0], [0], [1], [0, 0, 1, 1], [], []>} : vector<40x32xf32>, vector<32x32xf32>, vector<40x32xf32> -> vector<40x32xf32>
    %c0_43 = arith.constant 0 : index
    %c0_44 = arith.constant 0 : index
    %81 = vector.load %arg11[%c0_43, %c0_44] : memref<40x32xf32, #tpu.memory_space<vmem>>, vector<40x32xf32>
    tpu.vector_store %arg11[%c0_43, %c0_44], %80 {strides = array<i32>} : memref<40x32xf32, #tpu.memory_space<vmem>>, vector<40x32xf32>,
    return
  }
  func.func @transform_0(%arg0: i32) -> (i32, i32) {
    %c0_i32 = arith.constant 0 : i32
    %c0_i32_0 = arith.constant 0 : i32
    return %arg0, %c0_i32 : i32, i32
  }
  func.func @transform_1(%arg0: i32) -> (i32, i32, i32) {
    %c0_i32 = arith.constant 0 : i32
    %c0_i32_0 = arith.constant 0 : i32
    %c0_i32_1 = arith.constant 0 : i32
    return %arg0, %c0_i32, %c0_i32_0 : i32, i32, i32
  }
  func.func @transform_2(%arg0: i32) -> (i32, i32, i32) {
    %c0_i32 = arith.constant 0 : i32
    %c0_i32_0 = arith.constant 0 : i32
    %c0_i32_1 = arith.constant 0 : i32
    return %arg0, %c0_i32, %c0_i32_0 : i32, i32, i32
  }
  func.func @transform_3(%arg0: i32) -> (i32, i32, i32) {
    %c0_i32 = arith.constant 0 : i32
    %c0_i32_0 = arith.constant 0 : i32
    %c0_i32_1 = arith.constant 0 : i32
    return %arg0, %c0_i32, %c0_i32_0 : i32, i32, i32
  }
  func.func @transform_4(%arg0: i32) -> (i32, i32) {
    %c0_i32 = arith.constant 0 : i32
    %c0_i32_0 = arith.constant 0 : i32
    return %arg0, %c0_i32 : i32, i32
  }
  func.func @transform_5(%arg0: i32) -> (i32, i32) {
    %c0_i32 = arith.constant 0 : i32
    %c0_i32_0 = arith.constant 0 : i32
    %c0_i32_1 = arith.constant 0 : i32
    return %c0_i32, %c0_i32_0 : i32, i32
  }
  func.func @transform_6(%arg0: i32) -> (i32, i32) {
    %c0_i32 = arith.constant 0 : i32
    %c0_i32_0 = arith.constant 0 : i32
    %c0_i32_1 = arith.constant 0 : i32
    return %c0_i32, %c0_i32_0 : i32, i32
  }
  func.func @transform_7(%arg0: i32) -> (i32, i32) {
    %c0_i32 = arith.constant 0 : i32
    %c0_i32_0 = arith.constant 0 : i32
    %c0_i32_1 = arith.constant 0 : i32
    return %c0_i32, %c0_i32_0 : i32, i32
  }
  func.func @transform_8(%arg0: i32) -> (i32, i32) {
    %c0_i32 = arith.constant 0 : i32
    %c0_i32_0 = arith.constant 0 : i32
    %c0_i32_1 = arith.constant 0 : i32
    return %c0_i32, %c0_i32_0 : i32, i32
  }
  func.func @transform_9(%arg0: i32) -> (i32, i32) {
    %c0_i32 = arith.constant 0 : i32
    %c0_i32_0 = arith.constant 0 : i32
    %c0_i32_1 = arith.constant 0 : i32
    return %c0_i32, %c0_i32_0 : i32, i32
  }
  func.func @transform_10(%arg0: i32) -> (i32, i32) {
    %c0_i32 = arith.constant 0 : i32
    %c0_i32_0 = arith.constant 0 : i32
    return %arg0, %c0_i32 : i32, i32
  }
}

</mosaic_0001>

<bundles_post_ra>
// kernel: tpu_custom_call.1
= control target key start
LH: loop header
LB: loop body
LE: loop exit
PB: predicated region body
PF: predicated region fallthrough
CT: control target
= control target key end

     0   :  { %vm169_vm0 = vcmask 261120   ;;  %v1205_v40 = vlaneseq  ;;  %vm3376_vm15 = vcmask 1043456   ;;  %s6912_s5 = inlined_call_operand.vmem [shape: f32[32,32], index: 5, kind: input, shape index: {}]   ;;  %s6913_s6 = inlined_call_operand.vmem [shape: f32[32,32], index: 6, kind: input, shape index: {}]   ;;  %s6914_s0 = inlined_call_operand.vmem [shape: f32[40,32], index: 0, kind: input, shape index: {}]   ;;  %s6915_s1 = inlined_call_operand.vmem [shape: f32[40,8,32], index: 1, kind: input, shape index: {}]   ;;  %s6916_s7 = inlined_call_operand.vmem [shape: f32[32,32], index: 7, kind: input, shape index: {}]   ;;  %s6917_s2 = inlined_call_operand.vmem [shape: f32[40,8,32], index: 2, kind: input, shape index: {}]   ;;  %s6918_s4 = inlined_call_operand.vmem [shape: f32[40,8], index: 4, kind: input, shape index: {}]   ;;  %s6919_s8 = inlined_call_operand.vmem [shape: f32[64,32], index: 8, kind: input, shape index: {}]   ;;  %s6920_s3 = inlined_call_operand.vmem [shape: f32[40,8,64], index: 3, kind: input, shape index: {}]   ;;  %s6921_s9 = inlined_call_operand.vmem [shape: f32[32,32], index: 9, kind: input, shape index: {}]   ;;  %s6922_s10 = inlined_call_operand.vmem [shape: f32[40,32], index: 10, kind: output, shape index: {}]  }
   0x1   :  { %v168_v0 = vld [vmem:[%s6912_s5 + $0x18] sm:$0xff]  ;;  %v167_v2 = vld [vmem:[%s6912_s5 + $0x10] sm:$0xff]  ;;  %v166_v4 = vld [vmem:[%s6912_s5 + $0x8] sm:$0xff] }
   0x2   :  { %v220_v1 = vld [vmem:[%s6913_s6 + $0x18] sm:$0xff]  ;;  %197 = vmatpush.msra.mxu0 %v168_v0  ;;  %v219_v3 = vld [vmem:[%s6913_s6 + $0x10] sm:$0xff]  ;;  %v218_v5 = vld [vmem:[%s6913_s6 + $0x8] sm:$0xff]  ;;  %v4571_v41 = vshrl.u32 %v1205_v40, 7 }
   0x3   :  { %4189 = vmatpush.msra.mxu1 %v220_v1  ;;  %4190 = vmatpush.msra.mxu2 %v220_v1  ;;  %v165_v6 = vld [vmem:[%s6912_s5] sm:$0xff]  ;;  %v61_v10 = vld [vmem:[%s6915_s1 + $0xa8] sm:$0xff]  ;;  %v67_v11 = vld [vmem:[%s6915_s1 + $0xd8] sm:$0xff] }
   0x4   :  { %4191 = vmatpush.msra.mxu3 %v220_v1  ;;  %198 = vmatpush.msra.mxu0 %v167_v2  ;;  %v217_v7 = vld [vmem:[%s6913_s6] sm:$0xff]  ;;  %v481_v12 = vld [vmem:[%s6916_s7 + $0x18] sm:$0xff]  ;;  %v480_v13 = vld [vmem:[%s6916_s7 + $0x10] sm:$0xff]  ;;  %v4656_v2 = vand.u32 127, %v1205_v40 }
   0x5   :  { %4192 = vmatpush.msra.mxu1 %v219_v3  ;;  %4193 = vmatpush.msra.mxu2 %v219_v3  ;;  %v35_v8 = vld [vmem:[%s6914_s0] sm:$0xff]  ;;  %v479_v14 = vld [vmem:[%s6916_s7 + $0x8] sm:$0xff]  ;;  %v62_v17 = vld [vmem:[%s6915_s1 + $0xb0] sm:$0xff] }
   0x6   :  { %4194 = vmatpush.msra.mxu3 %v219_v3  ;;  %199 = vmatpush.msra.mxu0 %v166_v4  ;;  %v48_v9 = vld [vmem:[%s6915_s1 + $0x40] sm:$0xff]  ;;  %v36_v15 = vld [vmem:[%s6914_s0 + $0x8] sm:$0xff]  ;;  %v37_v20 = vld [vmem:[%s6914_s0 + $0x10] sm:$0xff]  ;;  %v1217_v4 = vadd.s32 1, %v4656_v2 }
   0x7   :  { %4195 = vmatpush.msra.mxu1 %v218_v5  ;;  %4196 = vmatpush.msra.mxu2 %v218_v5  ;;  %v49_v16 = vld [vmem:[%s6915_s1 + $0x48] sm:$0xff]  ;;  %v68_v18 = vld [vmem:[%s6915_s1 + $0xe0] sm:$0xff]  ;;  %v50_v21 = vld [vmem:[%s6915_s1 + $0x50] sm:$0xff] }
   0x8   :  { %4197 = vmatpush.msra.mxu3 %v218_v5  ;;  %200 = vmatpush.msra.mxu0 %v165_v6  ;;  %v478_v19 = vld [vmem:[%s6916_s7] sm:$0xff]  ;;  %v63_v22 = vld [vmem:[%s6915_s1 + $0xb8] sm:$0xff]  ;;  %v69_v23 = vld [vmem:[%s6915_s1 + $0xe8] sm:$0xff] }
   0x9   :  { %4198 = vmatpush.msra.mxu1 %v217_v7  ;;  %4199 = vmatpush.msra.mxu2 %v217_v7  ;;  %v38_v24 = vld [vmem:[%s6914_s0 + $0x18] sm:$0xff]  ;;  %v64_v26 = vld [vmem:[%s6915_s1 + $0xc0] sm:$0xff]  ;;  %v70_v27 = vld [vmem:[%s6915_s1 + $0xf0] sm:$0xff] }
   0xa   :  { %4200 = vmatpush.msra.mxu3 %v217_v7  ;;  %3974 = vmatmul.msk.f32.vlgmr.msra.gmra.mxu0 %vm169_vm0, %v35_v8  ;;  %v51_v25 = vld [vmem:[%s6915_s1 + $0x58] sm:$0xff]  ;;  %v39_v28 = vld [vmem:[%s6914_s0 + $0x20] sm:$0xff]  ;;  %v65_v30 = vld [vmem:[%s6915_s1 + $0xc8] sm:$0xff] }
   0xb   :  { %3987 = vmatmul.msk.f32.vlgmr.msra.gmra.mxu1 %vm169_vm0, %v48_v9  ;;  %4000 = vmatmul.msk.f32.vlgmr.msra.gmra.mxu2 %vm169_vm0, %v61_v10  ;;  %v52_v29 = vld [vmem:[%s6915_s1 + $0x60] sm:$0xff]  ;;  %v71_v31 = vld [vmem:[%s6915_s1 + $0xf8] sm:$0xff]  ;;  %v53_v33 = vld [vmem:[%s6915_s1 + $0x68] sm:$0xff] }
   0xc   :  { %4006 = vmatmul.msk.f32.vlgmr.msra.gmra.mxu3 %vm169_vm0, %v67_v11  ;;  %614 = vmatpush.msrb.mxu2 %v481_v12  ;;  %v40_v32 = vld [vmem:[%s6915_s1] sm:$0xff]  ;;  %v66_v34 = vld [vmem:[%s6915_s1 + $0xd0] sm:$0xff]  ;;  %v41_v36 = vld [vmem:[%s6915_s1 + $0x8] sm:$0xff]  ;;  %v4366_v12 = vmov 1.0  }
   0xd   :  { %353 = vmatpush.msrb.mxu0 %v220_v1  ;;  %v72_v35 = vld [vmem:[%s6915_s1 + $0x100] sm:$0xff]  ;;  %v54_v37 = vld [vmem:[%s6915_s1 + $0x70] sm:$0xff]  ;;  %v73_v38 = vld [vmem:[%s6915_s1 + $0x108] sm:$0xff]  ;;  %4203 = vset.pattern.permute.xlu0 %v4571_v41  ;;  %v1209_v1 = vadd.s32 24, %v4571_v41 }
   0xe   :  { %615 = vmatpush.msrb.mxu2 %v480_v13  ;;  %v80_v39 = vld [vmem:[%s6917_s2] sm:$0xff]  ;;  %4204 = vset.pattern.permute.xlu1 %v4571_v41  ;;  %v42_v42 = vld [vmem:[%s6915_s1 + $0x10] sm:$0xff]  ;;  %v55_v43 = vld [vmem:[%s6915_s1 + $0x78] sm:$0xff] }
   0xf   :  { %354 = vmatpush.msrb.mxu0 %v219_v3  ;;  %4205 = vset.pattern.permute.xlu2 %v4571_v41  ;;  %v74_v44 = vld [vmem:[%s6915_s1 + $0x110] sm:$0xff]  ;;  %v81_v45 = vld [vmem:[%s6917_s2 + $0x8] sm:$0xff]  ;;  %v4595_v46 = vld [vmem:[%s6918_s4] sm:$0xff]  ;;  %v4659_v3 = vmul.u32 8, %v4656_v2 }
  0x10   :  { %616 = vmatpush.msrb.mxu2 %v479_v14  ;;  %v1535_v47 = vperm.slane %v4595_v46, 0  ;;  %v43_v48 = vld [vmem:[%s6915_s1 + $0x18] sm:$0xff]  ;;  %v56_v49 = vld [vmem:[%s6915_s1 + $0x80] sm:$0xff]  ;;  %v82_v51 = vld [vmem:[%s6917_s2 + $0x10] sm:$0xff]  ;;  %v1542_v52 = vperm.slane %v4595_v46, 1  ;;  %v1577_v57 = vperm.slane %v4595_v46, 6 }
  0x11   :  { %355 = vmatpush.msrb.mxu0 %v218_v5  ;;  %v75_v50 = vld [vmem:[%s6915_s1 + $0x118] sm:$0xff]  ;;  %v44_v53 = vld [vmem:[%s6915_s1 + $0x20] sm:$0xff]  ;;  %v57_v54 = vld [vmem:[%s6915_s1 + $0x88] sm:$0xff]  ;;  %v1549_v63 = vperm.slane %v4595_v46, 2  ;;  %vm1216_vm1 = vcmp.ge.s32.totalorder %v1209_v1, %v4659_v3  ;;  %v1556_v10 = vperm.slane %v4595_v46, 3  ;;  %vm1213_vm10 = vcmp.ge.s32.totalorder %v4571_v41, %v4659_v3 }
  0x12   :  { %3975 = vmatmul.msk.f32.gmra.mxu0 %vm169_vm0, %v36_v15  ;;  %617 = vmatpush.msrb.mxu2 %v478_v19  ;;  %v76_v55 = vld [vmem:[%s6915_s1 + $0x120] sm:$0xff]  ;;  %v83_v56 = vld [vmem:[%s6917_s2 + $0x18] sm:$0xff]  ;;  %v45_v58 = vld [vmem:[%s6915_s1 + $0x28] sm:$0xff] }
  0x13   :  { %3988 = vmatmul.msk.f32.gmra.mxu1 %vm169_vm0, %v49_v16  ;;  %4001 = vmatmul.msk.f32.gmra.mxu2 %vm169_vm0, %v62_v17  ;;  %v58_v59 = vld [vmem:[%s6915_s1 + $0x90] sm:$0xff]  ;;  %v77_v60 = vld [vmem:[%s6915_s1 + $0x128] sm:$0xff]  ;;  %v84_v61 = vld [vmem:[%s6917_s2 + $0x20] sm:$0xff]  ;;  %v1584_v17 = vperm.slane %v4595_v46, 7 }
  0x14   :  { %4007 = vmatmul.msk.f32.gmra.mxu3 %vm169_vm0, %v68_v18  ;;  %356 = vmatpush.msrb.mxu0 %v217_v7  ;;  %v4649_v62 = vld [vmem:[%s6918_s4 + $0x8] sm:$0xff]  ;;  %v46_v5 = vld [vmem:[%s6915_s1 + $0x30] sm:$0xff]  ;;  %v59_v6 = vld [vmem:[%s6915_s1 + $0x98] sm:$0xff]  ;;  %v4669_v7 = vmul.u32 8, %v1217_v4 }
  0x15   :  { %1540 = vperm.xlu0 %4203, %v1535_v47   ;;  %v1598_v0 = vperm.slane %v4649_v62, 1  ;;  %v78_v8 = vld [vmem:[%s6915_s1 + $0x130] sm:$0xff]  ;;  %v85_v9 = vld [vmem:[%s6917_s2 + $0x28] sm:$0xff]  ;;  %v1619_v11 = vperm.slane %v4649_v62, 4  ;;  %v47_v13 = vld [vmem:[%s6915_s1 + $0x38] sm:$0xff]  ;;  %v1640_v18 = vperm.slane %v4649_v62, 7 }
  0x16   :  { %1554 = vperm.xlu1 %4204, %v1549_v63   ;;  %vm1222_vm2 = vcmp.lt.s32.totalorder %v1209_v1, %v4669_v7  ;;  %v60_v14 = vld [vmem:[%s6915_s1 + $0xa0] sm:$0xff]  ;;  %v79_v15 = vld [vmem:[%s6915_s1 + $0x138] sm:$0xff]  ;;  %v86_v16 = vld [vmem:[%s6917_s2 + $0x30] sm:$0xff]  ;;  %vm1219_vm11 = vcmp.lt.s32.totalorder %v4571_v41, %v4669_v7 }
  0x17   :  { %vm1226_vm3 = vmand %vm1216_vm1, %vm1222_vm2  ;;  %v87_v19 = vld [vmem:[%s6917_s2 + $0x38] sm:$0xff]  ;;  %v92_v47 = vld [vmem:[%s6917_s2 + $0x60] sm:$0xff] }
  0x18   :  { %4099 = vmatpush.msk.msra.mxu0 %vm1226_vm3, %v4366_v12  ;;  %v91_v40 = vld [vmem:[%s6917_s2 + $0x58] sm:$0xff]  ;;  %vm1223_vm12 = vmand %vm1213_vm10, %vm1219_vm11  ;;  %vm1895_vm3 = vcmask 31744  }
  0x1a   :  { %3976 = vmatmul.msk.f32.gmra.mxu0 %vm169_vm0, %v37_v20  ;;  %v4709_v20 = vld [vmem:[%s6918_s4 + $0x10] sm:$0xff] }
  0x1b   :  { %3989 = vmatmul.msk.f32.gmra.mxu1 %vm169_vm0, %v50_v21  ;;  %4002 = vmatmul.msk.f32.gmra.mxu2 %vm169_vm0, %v63_v22  ;;  %v1605_v21 = vperm.slane %v4649_v62, 2  ;;  %v1661_v22 = vperm.slane %v4709_v20, 2  ;;  %v1675_v4 = vperm.slane %v4709_v20, 4 }
  0x1c   :  { %4008 = vmatmul.msk.f32.gmra.mxu3 %vm169_vm0, %v69_v23  ;;  %v1208_v23 = vadd.s32 16, %v4571_v41 }
  0x1d   :  { %1547 = vperm.xlu0 %4203, %v1542_v52  }
  0x1e   :  { %1561 = vperm.xlu1 %4204, %v1556_v10   ;;  %vm1215_vm4 = vcmp.ge.s32.totalorder %v1208_v23, %v4659_v3  ;;  %vm1221_vm5 = vcmp.lt.s32.totalorder %v1208_v23, %v4669_v7  ;;  %v1696_v10 = vperm.slane %v4709_v20, 7 }
  0x1f   :  { %vm1225_vm6 = vmand %vm1215_vm4, %vm1221_vm5 }
  0x20   :  { %4100 = vmatpush.msk.msra.mxu0 %vm1225_vm6, %v4366_v12 }
  0x22   :  { %3977 = vmatmul.msk.f32.gmra.mxu0 %vm169_vm0, %v38_v24  ;;  %v88_v24 = vld [vmem:[%s6917_s2 + $0x40] sm:$0xff] }
  0x23   :  { %3990 = vmatmul.msk.f32.gmra.mxu1 %vm169_vm0, %v51_v25  ;;  %4003 = vmatmul.msk.f32.gmra.mxu2 %vm169_vm0, %v64_v26  ;;  %v1626_v25 = vperm.slane %v4649_v62, 5  ;;  %v1682_v26 = vperm.slane %v4709_v20, 5 }
  0x24   :  { %4009 = vmatmul.msk.f32.gmra.mxu3 %vm169_vm0, %v70_v27  ;;  %v89_v27 = vld [vmem:[%s6917_s2 + $0x48] sm:$0xff] }
  0x25   :  { %1582 = vperm.xlu0 %4203, %v1577_v57  }
  0x26   :  { %1589 = vperm.xlu1 %4204, %v1584_v17   ;;  %v97_v17 = vld [vmem:[%s6917_s2 + $0x88] sm:$0xff] }
  0x2a   :  { %3978 = vmatmul.msk.f32.gmra.mxu0 %vm169_vm0, %v39_v28  ;;  %v1207_v28 = vadd.s32 8, %v4571_v41 }
  0x2b   :  { %3991 = vmatmul.msk.f32.gmra.mxu1 %vm169_vm0, %v52_v29  ;;  %4004 = vmatmul.msk.f32.gmra.mxu2 %vm169_vm0, %v65_v30  ;;  %v4733_v29 = vld [vmem:[%s6918_s4 + $0x18] sm:$0xff]  ;;  %v1563_v30 = vperm.slane %v4595_v46, 4 }
  0x2c   :  { %4010 = vmatmul.msk.f32.gmra.mxu3 %vm169_vm0, %v71_v31  ;;  %vm1214_vm7 = vcmp.ge.s32.totalorder %v1207_v28, %v4659_v3  ;;  %vm1220_vm8 = vcmp.lt.s32.totalorder %v1207_v28, %v4669_v7  ;;  %v1647_v31 = vperm.slane %v4709_v20, 0  ;;  %v95_v3 = vld [vmem:[%s6917_s2 + $0x78] sm:$0xff] }
  0x2d   :  { %1603 = vperm.xlu0 %4203, %v1598_v0   ;;  %vm1224_vm9 = vmand %vm1214_vm7, %vm1220_vm8  ;;  %1568 = vperm.xlu2 %4205, %v1563_v30   ;;  %vm747_vm7 = vcmask 523264  }
  0x2e   :  { %1610 = vperm.xlu1 %4204, %v1605_v21   ;;  %4101 = vmatpush.msk.msra.mxu0 %vm1224_vm9, %v4366_v12 }
  0x30   :  { %4102 = vmatpush.msk.msra.mxu0 %vm1223_vm12, %v4366_v12 }
  0x32   :  { %3979 = vmatmul.msk.f32.vlgmr.msrb.gmra.mxu0 %vm169_vm0, %v40_v32  ;;  %v1703_v32 = vperm.slane %v4733_v29, 0 }
  0x33   :  { %3992 = vmatmul.msk.f32.gmra.mxu1 %vm169_vm0, %v53_v33  ;;  %4005 = vmatmul.msk.f32.gmra.mxu2 %vm169_vm0, %v66_v34  ;;  %v90_v34 = vld [vmem:[%s6917_s2 + $0x50] sm:$0xff] }
  0x34   :  { %4011 = vmatmul.msk.f32.gmra.mxu3 %vm169_vm0, %v72_v35  ;;  %v1570_v35 = vperm.slane %v4595_v46, 5 }
  0x35   :  { %1624 = vperm.xlu0 %4203, %v1619_v11  }
  0x36   :  { %1631 = vperm.xlu1 %4204, %v1626_v25   ;;  %1575 = vperm.xlu2 %4205, %v1570_v35  }
  0x3a   :  { %3980 = vmatmul.msk.f32.gmra.mxu0 %vm169_vm0, %v41_v36  ;;  %v1668_v36 = vperm.slane %v4709_v20, 3 }
  0x3b   :  { %3993 = vmatmul.msk.f32.gmra.mxu1 %vm169_vm0, %v54_v37  ;;  %4019 = vmatmul.msk.f32.vlgmr.msrb.gmra.mxu2 %vm169_vm0, %v80_v39  ;;  %v1724_v37 = vperm.slane %v4733_v29, 3 }
  0x3c   :  { %4012 = vmatmul.msk.f32.gmra.mxu3 %vm169_vm0, %v73_v38 }
  0x3d   :  { %1645 = vperm.xlu0 %4203, %v1640_v18  }
  0x3e   :  { %1652 = vperm.xlu1 %4204, %v1647_v31  }
  0x42   :  { %3981 = vmatmul.msk.f32.gmra.mxu0 %vm169_vm0, %v42_v42  ;;  %v1591_v42 = vperm.slane %v4649_v62, 0 }
  0x43   :  { %3994 = vmatmul.msk.f32.gmra.mxu1 %vm169_vm0, %v55_v43  ;;  %4020 = vmatmul.msk.f32.gmra.mxu2 %vm169_vm0, %v81_v45  ;;  %v1689_v43 = vperm.slane %v4709_v20, 6 }
  0x44   :  { %4013 = vmatmul.msk.f32.gmra.mxu3 %vm169_vm0, %v74_v44  ;;  %v1745_v44 = vperm.slane %v4733_v29, 6  ;;  %1596 = vperm.xlu2 %4205, %v1591_v42  }
  0x45   :  { %1666 = vperm.xlu0 %4203, %v1661_v22  }
  0x46   :  { %1673 = vperm.xlu1 %4204, %v1668_v36  }
  0x4a   :  { %3982 = vmatmul.msk.f32.gmra.mxu0 %vm169_vm0, %v43_v48  ;;  %v4775_v48 = vld [vmem:[%s6918_s4 + $0x20] sm:$0xff] }
  0x4b   :  { %3995 = vmatmul.msk.f32.gmra.mxu1 %vm169_vm0, %v56_v49  ;;  %4021 = vmatmul.msk.f32.gmra.mxu2 %vm169_vm0, %v82_v51  ;;  %v1612_v49 = vperm.slane %v4649_v62, 3  ;;  %v1766_v51 = vperm.slane %v4775_v48, 1  ;;  %v1787_v57 = vperm.slane %v4775_v48, 4  ;;  %v1808_v63 = vperm.slane %v4775_v48, 7 }
  0x4c   :  { %4014 = vmatmul.msk.f32.gmra.mxu3 %vm169_vm0, %v75_v50  ;;  %v1710_v50 = vperm.slane %v4733_v29, 1  ;;  %v1794_v11 = vperm.slane %v4775_v48, 5  ;;  %v1759_v36 = vperm.slane %v4775_v48, 0 }
  0x4d   :  { %1687 = vperm.xlu0 %4203, %v1682_v26   ;;  %1617 = vperm.xlu2 %4205, %v1612_v49   ;;  %v1780_v49 = vperm.slane %v4775_v48, 3 }
  0x4e   :  { %1694 = vperm.xlu1 %4204, %v1689_v43  }
  0x52   :  { %3983 = vmatmul.msk.f32.gmra.mxu0 %vm169_vm0, %v44_v53 }
  0x53   :  { %3996 = vmatmul.msk.f32.gmra.mxu1 %vm169_vm0, %v57_v54  ;;  %4022 = vmatmul.msk.f32.gmra.mxu2 %vm169_vm0, %v83_v56  ;;  %v93_v54 = vld [vmem:[%s6917_s2 + $0x68] sm:$0xff]  ;;  %v1731_v56 = vperm.slane %v4733_v29, 4 }
  0x54   :  { %4015 = vmatmul.msk.f32.gmra.mxu3 %vm169_vm0, %v76_v55  ;;  %v1633_v55 = vperm.slane %v4649_v62, 6  ;;  %v1752_v62 = vperm.slane %v4733_v29, 7 }
  0x55   :  { %1708 = vperm.xlu0 %4203, %v1703_v32  }
  0x56   :  { %1715 = vperm.xlu1 %4204, %v1710_v50   ;;  %1638 = vperm.xlu2 %4205, %v1633_v55  }
  0x5a   :  { %3984 = vmatmul.msk.f32.gmra.mxu0 %vm169_vm0, %v45_v58 }
  0x5b   :  { %3997 = vmatmul.msk.f32.gmra.mxu1 %vm169_vm0, %v58_v59  ;;  %4023 = vmatmul.msk.f32.gmra.mxu2 %vm169_vm0, %v84_v61  ;;  %v1654_v61 = vperm.slane %v4709_v20, 1 }
  0x5c   :  { %4016 = vmatmul.msk.f32.gmra.mxu3 %vm169_vm0, %v77_v60  ;;  %v94_v60 = vld [vmem:[%s6917_s2 + $0x70] sm:$0xff] }
  0x5d   :  { %1729 = vperm.xlu0 %4203, %v1724_v37  }
  0x5e   :  { %1736 = vperm.xlu1 %4204, %v1731_v56   ;;  %1659 = vperm.xlu2 %4205, %v1654_v61  }
  0x62   :  { %3985 = vmatmul.msk.f32.gmra.mxu0 %vm169_vm0, %v46_v5  ;;  %v1773_v5 = vperm.slane %v4775_v48, 2 }
  0x63   :  { %3998 = vmatmul.msk.f32.gmra.mxu1 %vm169_vm0, %v59_v6  ;;  %4024 = vmatmul.msk.f32.gmra.mxu2 %vm169_vm0, %v85_v9 }
  0x64   :  { %4017 = vmatmul.msk.f32.gmra.mxu3 %vm169_vm0, %v78_v8  ;;  %v96_v8 = vld [vmem:[%s6917_s2 + $0x80] sm:$0xff] }
  0x65   :  { %1750 = vperm.xlu0 %4203, %v1745_v44   ;;  %v100_v44 = vld [vmem:[%s6917_s2 + $0xa0] sm:$0xff] }
  0x66   :  { %1757 = vperm.xlu1 %4204, %v1752_v62   ;;  %1680 = vperm.xlu2 %4205, %v1675_v4   ;;  %v1801_v62 = vperm.slane %v4775_v48, 6 }
  0x6a   :  { %3986 = vmatmul.msk.f32.gmra.mxu0 %vm169_vm0, %v47_v13 }
  0x6b   :  { %3999 = vmatmul.msk.f32.gmra.mxu1 %vm169_vm0, %v60_v14  ;;  %4025 = vmatmul.msk.f32.gmra.mxu2 %vm169_vm0, %v86_v16 }
  0x6c   :  { %4018 = vmatmul.msk.f32.gmra.mxu3 %vm169_vm0, %v79_v15 }
  0x6d   :  { %1771 = vperm.xlu0 %4203, %v1766_v51  }
  0x6e   :  { %1778 = vperm.xlu1 %4204, %v1773_v5   ;;  %1701 = vperm.xlu2 %4205, %v1696_v10  }
  0x73   :  { %4026 = vmatmul.msk.f32.gmra.mxu2 %vm169_vm0, %v87_v19  ;;  %v1717_v19 = vperm.slane %v4733_v29, 2 }
  0x75   :  { %1792 = vperm.xlu0 %4203, %v1787_v57   ;;  %v101_v57 = vld [vmem:[%s6917_s2 + $0xa8] sm:$0xff] }
  0x76   :  { %1799 = vperm.xlu1 %4204, %v1794_v11   ;;  %1722 = vperm.xlu2 %4205, %v1717_v19  }
  0x7b   :  { %4027 = vmatmul.msk.f32.gmra.mxu2 %vm169_vm0, %v88_v24  ;;  %v98_v24 = vld [vmem:[%s6917_s2 + $0x90] sm:$0xff] }
  0x7d   :  { %1813 = vperm.xlu0 %4203, %v1808_v63  }
  0x83   :  { %4028 = vmatmul.msk.f32.gmra.mxu2 %vm169_vm0, %v89_v27  ;;  %v1738_v27 = vperm.slane %v4733_v29, 5 }
  0x85   :  { %1743 = vperm.xlu2 %4205, %v1738_v27  }
  0x87   :  { %v4740_v33 = vpop.f32.mrf.mxu0 }
  0x88   :  { %v1045_v9 = vperm.slane %v4740_v33, 0  ;;  %v1010_v14 = vrot.slane %v4740_v33, 1  ;;  %v1011_v22 = vrot.slane %v4740_v33, 2  ;;  %v1012_v31 = vrot.slane %v4740_v33, 3 }
  0x89   :  { %v1013_v42 = vrot.slane %v4740_v33, 4  ;;  %v1014_v55 = vrot.slane %v4740_v33, 5  ;;  %v1016_v48 = vrot.slane %v4740_v33, 7 }
  0x8a   :  { %v1046_v18 = vperm.slane %v1010_v14, 0  ;;  %v1047_v26 = vperm.slane %v1011_v22, 0  ;;  %v1048_v35 = vperm.slane %v1012_v31, 0  ;;  %v103_v14 = vld [vmem:[%s6917_s2 + $0xb8] sm:$0xff] }
  0x8b   :  { %4029 = vmatmul.msk.f32.gmra.mxu2 %vm169_vm0, %v90_v34  ;;  %v99_v34 = vld [vmem:[%s6917_s2 + $0x98] sm:$0xff]  ;;  %v1050_v61 = vperm.slane %v1014_v55, 0 }
  0x8d   :  { %1764 = vperm.xlu2 %4205, %v1759_v36  }
  0x8e   :  { %v4749_v38 = vpop.f32.mrf.mxu2 }
  0x8f   :  { %v4751_v39 = vpop.f32.mrf.mxu0  ;;  %v4902_v55 = vpop.f32.mrf.mxu3 }
  0x90   :  { %v1018_v36 = vrot.slane %v4751_v39, 2 }
  0x93   :  { %4030 = vmatmul.msk.f32.gmra.mxu2 %vm169_vm0, %v91_v40 }
  0x95   :  { %1785 = vperm.xlu2 %4205, %v1780_v49   ;;  %v1019_v49 = vrot.slane %v4751_v39, 3 }
  0x96   :  { %v4765_v45 = vpop.f32.mrf.mxu2 }
  0x97   :  { %v4767_v46 = vpop.f32.mrf.mxu0 }
  0x9b   :  { %4031 = vmatmul.msk.f32.gmra.mxu2 %vm169_vm0, %v92_v47  ;;  %v1049_v47 = vperm.slane %v1013_v42, 0  ;;  %v106_v42 = vld [vmem:[%s6917_s2 + $0xd0] sm:$0xff] }
  0x9d   :  { %1806 = vperm.xlu2 %4205, %v1801_v62  }
  0x9e   :  { %v4781_v52 = vpop.f32.mrf.mxu2 }
  0x9f   :  { %v4783_v53 = vpop.f32.mrf.mxu0 }
  0xa3   :  { %4032 = vmatmul.msk.f32.gmra.mxu2 %vm169_vm0, %v93_v54 }
  0xa6   :  { %v4792_v58 = vpop.f32.mrf.mxu2 }
  0xa7   :  { %v4794_v59 = vpop.f32.mrf.mxu0 }
  0xab   :  { %4033 = vmatmul.msk.f32.gmra.mxu2 %vm169_vm0, %v94_v60  ;;  %v382_v60 = vpop.f32.mrf.mxu1 }
  0xae   :  { %v4803_v0 = vpop.f32.mrf.mxu2 }
  0xaf   :  { %v358_v1 = vpop.f32.mrf.mxu0 }
  0xb0   :  { %v1125_v12 = vmul.f32 %v1045_v9, %v358_v1 }
  0xb3   :  { %4034 = vmatmul.msk.f32.gmra.mxu2 %vm169_vm0, %v95_v3  ;;  %v1015_v3 = vrot.slane %v4740_v33, 6  ;;  %v1233_v33 = vadd.s32 1, %v4571_v41 }
  0xb5   :  { %v1051_v9 = vperm.slane %v1015_v3, 0  ;;  %v108_v3 = vld [vmem:[%s6917_s2 + $0xe0] sm:$0xff] }
  0xb6   :  { %v4811_v6 = vpop.f32.mrf.mxu2 }
  0xb7   :  { %v361_v7 = vpop.f32.mrf.mxu0 }
  0xb8   :  { %v1126_v20 = vmul.f32 %v1046_v18, %v361_v7  ;;  %v102_v7 = vld [vmem:[%s6917_s2 + $0xb0] sm:$0xff] }
  0xbb   :  { %4035 = vmatmul.msk.f32.gmra.mxu2 %vm169_vm0, %v96_v8  ;;  %v385_v8 = vpop.f32.mrf.mxu1 }
  0xbe   :  { %v619_v13 = vpop.f32.mrf.mxu2 }
  0xbf   :  { %v1165_v15 = vmul.f32 %v1125_v12, %v619_v13  ;;  %v364_v16 = vpop.f32.mrf.mxu0  ;;  %v746_v13 = vld [vmem:[%s6919_s8 + $0x38] sm:$0xff] }
  0xc0   :  { %v1127_v28 = vmul.f32 %v1047_v26, %v364_v16  ;;  %876 = vmatpush.msrb.mxu3 %v746_v13  ;;  %v1052_v16 = vperm.slane %v1016_v48, 0  ;;  %v745_v26 = vld [vmem:[%s6919_s8 + $0x30] sm:$0xff]  ;;  %v109_v48 = vld [vmem:[%s6917_s2 + $0xe8] sm:$0xff] }
  0xc1   :  { %4103 = vmatmul.msk.f32.vlgmr.msra.gmra.mxu0 %vm169_vm0, %v1165_v15 }
  0xc2   :  { %877 = vmatpush.msrb.mxu3 %v745_v26 }
  0xc3   :  { %4036 = vmatmul.msk.f32.gmra.mxu2 %vm169_vm0, %v97_v17  ;;  %v1231_v17 = vmul.u32 8, %v4571_v41  ;;  %v388_v18 = vpop.f32.mrf.mxu1  ;;  %v4367_v41 = vmov 0.0  }
  0xc5   :  { %vm1232_vm13 = vcmp.ge.s32.totalorder %v4656_v2, %v1231_v17 }
  0xc6   :  { %v622_v21 = vpop.f32.mrf.mxu2 }
  0xc7   :  { %v1166_v23 = vmul.f32 %v1126_v20, %v622_v21  ;;  %v367_v25 = vpop.f32.mrf.mxu0  ;;  %v1234_v20 = vmul.u32 8, %v1233_v33 }
  0xc8   :  { %v1128_v40 = vmul.f32 %v1048_v35, %v367_v25 }
  0xc9   :  { %4104 = vmatmul.msk.f32.gmra.mxu0 %vm169_vm0, %v1166_v23  ;;  %vm1235_vm14 = vcmp.lt.s32.totalorder %v4656_v2, %v1234_v20  ;;  %v104_v23 = vld [vmem:[%s6917_s2 + $0xc0] sm:$0xff]  ;;  %v1017_v2 = vrot.slane %v4751_v39, 1 }
  0xca   :  { %vm1236_vm1 = vmand %vm1232_vm13, %vm1235_vm14 }
  0xcb   :  { %4037 = vmatmul.msk.f32.gmra.mxu2 %vm169_vm0, %v98_v24  ;;  %v1053_v24 = vperm.slane %v4751_v39, 0  ;;  %v1237_v25 = vsel %vm1236_vm1, 1.0, %v4367_v41  ;;  %v111_v41 = vld [vmem:[%s6917_s2 + $0xf8] sm:$0xff] }
  0xcc   :  { %4143 = vmatpush.msk.msrb.mxu1 %vm3376_vm15, %v1237_v25 }
  0xcd   :  { %v1133_v27 = vmul.f32 %v1053_v24, %v382_v60  ;;  %v743_v60 = vld [vmem:[%s6919_s8 + $0x20] sm:$0xff] }
  0xce   :  { %v625_v30 = vpop.f32.mrf.mxu2 }
  0xcf   :  { %v1167_v32 = vmul.f32 %v1127_v28, %v625_v30  ;;  %v370_v37 = vpop.f32.mrf.mxu0  ;;  %v391_v30 = vpop.f32.mrf.mxu1 }
  0xd0   :  { %v1129_v50 = vmul.f32 %v1049_v47, %v370_v37 }
  0xd1   :  { %4105 = vmatmul.msk.f32.gmra.mxu0 %vm169_vm0, %v1167_v32  ;;  %v105_v32 = vld [vmem:[%s6917_s2 + $0xc8] sm:$0xff] }
  0xd3   :  { %4038 = vmatmul.msk.f32.gmra.mxu2 %vm169_vm0, %v99_v34  ;;  %v1054_v34 = vperm.slane %v1017_v2, 0 }
  0xd5   :  { %v1134_v35 = vmul.f32 %v1054_v34, %v385_v8 }
  0xd6   :  { %v628_v29 = vpop.f32.mrf.mxu2 }
  0xd7   :  { %v1168_v43 = vmul.f32 %v1128_v40, %v628_v29  ;;  %v373_v51 = vpop.f32.mrf.mxu0  ;;  %v744_v29 = vld [vmem:[%s6919_s8 + $0x28] sm:$0xff] }
  0xd8   :  { %v1130_v63 = vmul.f32 %v1050_v61, %v373_v51  ;;  %878 = vmatpush.msrb.mxu3 %v744_v29 }
  0xd9   :  { %4106 = vmatmul.msk.f32.gmra.mxu0 %vm169_vm0, %v1168_v43  ;;  %v1055_v43 = vperm.slane %v1018_v36, 0 }
  0xda   :  { %879 = vmatpush.msrb.mxu3 %v743_v60 }
  0xdb   :  { %4039 = vmatmul.msk.f32.gmra.mxu2 %vm169_vm0, %v100_v44  ;;  %v394_v44 = vpop.f32.mrf.mxu1  ;;  %v1135_v47 = vmul.f32 %v1055_v43, %v388_v18  ;;  %v110_v18 = vld [vmem:[%s6917_s2 + $0xf0] sm:$0xff]  ;;  %v113_v43 = vld [vmem:[%s6917_s2 + $0x108] sm:$0xff] }
  0xde   :  { %v631_v54 = vpop.f32.mrf.mxu2 }
  0xdf   :  { %v1169_v56 = vmul.f32 %v1129_v50, %v631_v54  ;;  %v376_v5 = vpop.f32.mrf.mxu0  ;;  %v107_v54 = vld [vmem:[%s6917_s2 + $0xd8] sm:$0xff] }
  0xe0   :  { %v1131_v10 = vmul.f32 %v1051_v9, %v376_v5 }
  0xe1   :  { %4107 = vmatmul.msk.f32.gmra.mxu0 %vm169_vm0, %v1169_v56  ;;  %v1056_v56 = vperm.slane %v1019_v49, 0 }
  0xe3   :  { %4040 = vmatmul.msk.f32.gmra.mxu2 %vm169_vm0, %v101_v57  ;;  %v397_v57 = vpop.f32.mrf.mxu1  ;;  %v1136_v61 = vmul.f32 %v1056_v56, %v391_v30  ;;  %v112_v30 = vld [vmem:[%s6917_s2 + $0x100] sm:$0xff] }
  0xe6   :  { %v634_v1 = vpop.f32.mrf.mxu2 }
  0xe7   :  { %v1170_v4 = vmul.f32 %v1130_v63, %v634_v1  ;;  %v379_v15 = vpop.f32.mrf.mxu0  ;;  %v1020_v63 = vrot.slane %v4751_v39, 4 }
  0xe8   :  { %v1132_v19 = vmul.f32 %v1052_v16, %v379_v15  ;;  %v1022_v16 = vrot.slane %v4751_v39, 6 }
  0xe9   :  { %4108 = vmatmul.msk.f32.gmra.mxu0 %vm169_vm0, %v1170_v4  ;;  %v4914_v4 = vpop.f32.mrf.mxu3  ;;  %v1057_v5 = vperm.slane %v1020_v63, 0 }
  0xeb   :  { %4041 = vmatmul.msk.f32.gmra.mxu2 %vm169_vm0, %v102_v7  ;;  %v1137_v7 = vmul.f32 %v1057_v5, %v394_v44  ;;  %v400_v8 = vpop.f32.mrf.mxu1 }
  0xee   :  { %v637_v11 = vpop.f32.mrf.mxu2 }
  0xef   :  { %v1171_v12 = vmul.f32 %v1131_v10, %v637_v11  ;;  %v1021_v10 = vrot.slane %v4751_v39, 5 }
  0xf1   :  { %4109 = vmatmul.msk.f32.gmra.mxu0 %vm169_vm0, %v1171_v12  ;;  %v1058_v12 = vperm.slane %v1021_v10, 0  ;;  %v4923_v13 = vpop.f32.mrf.mxu3 }
  0xf3   :  { %4042 = vmatmul.msk.f32.gmra.mxu2 %vm169_vm0, %v103_v14  ;;  %v1138_v14 = vmul.f32 %v1058_v12, %v397_v57  ;;  %v403_v17 = vpop.f32.mrf.mxu1  ;;  %v1029_v12 = vrot.slane %v4767_v46, 6 }
  0xf6   :  { %v640_v21 = vpop.f32.mrf.mxu2 }
  0xf7   :  { %v1172_v22 = vmul.f32 %v1132_v19, %v640_v21  ;;  %v1059_v19 = vperm.slane %v1022_v16, 0 }
  0xf9   :  { %4110 = vmatmul.msk.f32.gmra.mxu0 %vm169_vm0, %v1172_v22  ;;  %v1139_v20 = vmul.f32 %v1059_v19, %v400_v8  ;;  %v4931_v22 = vpop.f32.mrf.mxu3  ;;  %v114_v8 = vld [vmem:[%s6917_s2 + $0x110] sm:$0xff] }
  0xfb   :  { %4043 = vmatmul.msk.f32.gmra.mxu2 %vm169_vm0, %v104_v23  ;;  %v1023_v23 = vrot.slane %v4751_v39, 7  ;;  %v406_v25 = vpop.f32.mrf.mxu1  ;;  %v1061_v39 = vperm.slane %v4767_v46, 0 }
  0xfd   :  { %v1060_v26 = vperm.slane %v1023_v23, 0  ;;  %v1141_v34 = vmul.f32 %v1061_v39, %v406_v25  ;;  %v4982_v23 = vpop.permute.xlu1 %1554 }
  0xfe   :  { %v643_v28 = vpop.f32.mrf.mxu2  ;;  %vm1817_vm5 = vcmp.gt.f32.partialorder %v4982_v23, 0.0 }
  0xff   :  { %v1173_v31 = vmul.f32 %v1133_v27, %v643_v28  ;;  %v1140_v2 = vmul.f32 %v1060_v26, %v403_v17  ;;  %v1030_v17 = vrot.slane %v4767_v46, 7 }
 0x101   :  { %4111 = vmatmul.msk.f32.gmra.mxu0 %vm169_vm0, %v1173_v31  ;;  %v4942_v31 = vpop.f32.mrf.mxu3 }
 0x103   :  { %4044 = vmatmul.msk.f32.gmra.mxu2 %vm169_vm0, %v105_v32  ;;  %v409_v32 = vpop.f32.mrf.mxu1 }
 0x106   :  { %v646_v37 = vpop.f32.mrf.mxu2 }
 0x107   :  { %v1174_v40 = vmul.f32 %v1134_v35, %v646_v37  ;;  %v4947_v35 = vpop.permute.xlu0 %1540 }
 0x108   :  { %vm1815_vm2 = vcmp.gt.f32.partialorder %v4947_v35, 0.0 }
 0x109   :  { %4112 = vmatmul.msk.f32.gmra.mxu0 %vm169_vm0, %v1174_v40  ;;  %v1024_v40 = vrot.slane %v4767_v46, 1  ;;  %v4956_v49 = vpop.f32.mrf.mxu3 }
 0x10b   :  { %4045 = vmatmul.msk.f32.gmra.mxu2 %vm169_vm0, %v106_v42  ;;  %v412_v56 = vpop.f32.mrf.mxu1 }
 0x10e   :  { %v649_v50 = vpop.f32.mrf.mxu2 }
 0x10f   :  { %v1175_v51 = vmul.f32 %v1135_v47, %v649_v50  ;;  %v1062_v50 = vperm.slane %v1024_v40, 0  ;;  %v4960_v63 = vpop.permute.xlu0 %1547  ;;  %v115_v40 = vld [vmem:[%s6917_s2 + $0x118] sm:$0xff] }
 0x110   :  { %vm1816_vm4 = vcmp.gt.f32.partialorder %v4960_v63, 0.0 }
 0x111   :  { %4113 = vmatmul.msk.f32.gmra.mxu0 %vm169_vm0, %v1175_v51 }
 0x113   :  { %4046 = vmatmul.msk.f32.gmra.mxu2 %vm169_vm0, %v107_v54  ;;  %v1142_v54 = vmul.f32 %v1062_v50, %v409_v32  ;;  %v1068_v32 = vperm.slane %v1030_v17, 0  ;;  %v1031_v50 = vrot.slane %v4783_v53, 1 }
 0x116   :  { %v652_v62 = vpop.f32.mrf.mxu2 }
 0x117   :  { %v1176_v1 = vmul.f32 %v1136_v61, %v652_v62  ;;  %v1025_v62 = vrot.slane %v4767_v46, 2 }
 0x119   :  { %4114 = vmatmul.msk.f32.gmra.mxu0 %vm169_vm0, %v1176_v1 }
 0x11b   :  { %4047 = vmatmul.msk.f32.gmra.mxu2 %vm169_vm0, %v108_v3  ;;  %v742_v3 = vld [vmem:[%s6919_s8 + $0x18] sm:$0xff] }
 0x11c   :  { %880 = vmatpush.msrb.mxu3 %v742_v3  ;;  %v1037_v3 = vrot.slane %v4783_v53, 7 }
 0x11e   :  { %v655_v9 = vpop.f32.mrf.mxu2 }
 0x11f   :  { %v1177_v11 = vmul.f32 %v1137_v7, %v655_v9  ;;  %v1028_v9 = vrot.slane %v4767_v46, 5 }
 0x121   :  { %4115 = vmatmul.msk.f32.gmra.mxu0 %vm169_vm0, %v1177_v11  ;;  %v1066_v19 = vperm.slane %v1028_v9, 0 }
 0x123   :  { %4048 = vmatmul.msk.f32.gmra.mxu2 %vm169_vm0, %v109_v48 }
 0x126   :  { %v658_v15 = vpop.f32.mrf.mxu2 }
 0x127   :  { %v1178_v33 = vmul.f32 %v1138_v14, %v658_v15  ;;  %v1063_v14 = vperm.slane %v1025_v62, 0  ;;  %v5015_v62 = vmul.f32 %v1068_v32, %v4781_v52  ;;  %v739_v52 = vld [vmem:[%s6919_s8] sm:$0xff] }
 0x129   :  { %4116 = vmatmul.msk.f32.gmra.mxu0 %vm169_vm0, %v1178_v33  ;;  %v1026_v33 = vrot.slane %v4767_v46, 3 }
 0x12b   :  { %4049 = vmatmul.msk.f32.gmra.mxu2 %vm169_vm0, %v110_v18  ;;  %v1027_v18 = vrot.slane %v4767_v46, 4  ;;  %v1064_v46 = vperm.slane %v1026_v33, 0  ;;  %v5028_v33 = vpop.permute.xlu1 %1561 }
 0x12c   :  { %vm1818_vm6 = vcmp.gt.f32.partialorder %v5028_v33, 0.0 }
 0x12e   :  { %v661_v21 = vpop.f32.mrf.mxu2 }
 0x12f   :  { %v1179_v24 = vmul.f32 %v1139_v20, %v661_v21  ;;  %v4980_v20 = vpop.f32.mrf.mxu3  ;;  %v1143_v21 = vmul.f32 %v1063_v14, %v412_v56  ;;  %v1034_v56 = vrot.slane %v4783_v53, 4 }
 0x131   :  { %4117 = vmatmul.msk.f32.gmra.mxu0 %vm169_vm0, %v1179_v24 }
 0x133   :  { %4050 = vmatmul.msk.f32.gmra.mxu2 %vm169_vm0, %v111_v41 }
 0x136   :  { %v664_v27 = vpop.f32.mrf.mxu2 }
 0x137   :  { %v1180_v28 = vmul.f32 %v1140_v2, %v664_v27  ;;  %v1067_v2 = vperm.slane %v1029_v12, 0  ;;  %v5021_v12 = vperm.slane %v1031_v50, 0  ;;  %v5026_v17 = vpop.f32.mrf.mxu3 }
 0x139   :  { %4118 = vmatmul.msk.f32.gmra.mxu0 %vm169_vm0, %v1180_v28 }
 0x13b   :  { %4051 = vmatmul.msk.f32.gmra.mxu2 %vm169_vm0, %v112_v30 }
 0x13e   :  { %v667_v36 = vpop.f32.mrf.mxu2  ;;  %v1375_v37 = vpop.f32.mrf.mxu0 }
 0x13f   :  { %v1181_v29 = vmul.f32 %v1141_v34, %v667_v36  ;;  %v1495_v42 = vmul.f32 0.125, %v1375_v37  ;;  %v415_v34 = vpop.f32.mrf.mxu1  ;;  %v4985_v36 = vperm.slane %v1027_v18, 0  ;;  %v741_v37 = vld [vmem:[%s6919_s8 + $0x10] sm:$0xff] }
 0x140   :  { %881 = vmatpush.msrb.mxu3 %v741_v37 }
 0x141   :  { %v1855_v44 = vsel %vm1815_vm2, %v1495_v42, -3.4028235e+38  ;;  %4119 = vmatmul.msk.f32.gmra.mxu0 %vm169_vm0, %v1181_v29  ;;  %v4994_v29 = vmul.f32 %v1066_v19, %v4749_v38  ;;  %v1036_v42 = vrot.slane %v4783_v53, 6  ;;  %v740_v38 = vld [vmem:[%s6919_s8 + $0x8] sm:$0xff] }
 0x142   :  { %v1896_v47 = vsel %vm1895_vm3, %v1855_v44, -inf  ;;  %882 = vmatpush.msrb.mxu3 %v740_v38  ;;  %v5070_v38 = vpop.permute.xlu2 %1568 }
 0x143   :  { %v1897_v51 = vrot.slane %v1896_v47, 4  ;;  %4052 = vmatmul.msk.f32.gmra.mxu2 %vm169_vm0, %v113_v43  ;;  %vm1819_vm8 = vcmp.gt.f32.partialorder %v5070_v38, 0.0 }
 0x144   :  { %883 = vmatpush.msrb.mxu3 %v739_v52 }
 0x145   :  { %v1898_v57 = vmax.f32 %v1896_v47, %v1897_v51 }
 0x146   :  { %v670_v60 = vpop.f32.mrf.mxu2  ;;  %v1378_v61 = vpop.f32.mrf.mxu0 }
 0x147   :  { %v1899_v1 = vrot.slane %v1898_v57, 2  ;;  %v1182_v5 = vmul.f32 %v1142_v54, %v670_v60  ;;  %v1496_v7 = vmul.f32 0.125, %v1378_v61  ;;  %v1033_v54 = vrot.slane %v4783_v53, 3 }
 0x148   :  { %v5012_v61 = vmul.f32 %v1067_v2, %v4765_v45 }
 0x149   :  { %v1900_v10 = vmax.f32 %v1898_v57, %v1899_v1  ;;  %v4970_v11 = vsel %vm1816_vm4, %v1496_v7, -3.4028235e+38  ;;  %4120 = vmatmul.msk.f32.gmra.mxu0 %vm169_vm0, %v1182_v5  ;;  %v1069_v1 = vperm.slane %v4783_v53, 0  ;;  %v1035_v5 = vrot.slane %v4783_v53, 5 }
 0x14a   :  { %v1903_v48 = vsel %vm1895_vm3, %v4970_v11, -inf  ;;  %v1032_v7 = vrot.slane %v4783_v53, 2 }
 0x14b   :  { %v1901_v15 = vrot.slane %v1900_v10, 1  ;;  %v1904_v16 = vrot.slane %v1903_v48, 4  ;;  %4053 = vmatmul.msk.f32.gmra.mxu2 %vm169_vm0, %v114_v8  ;;  %v1144_v8 = vmul.f32 %v1064_v46, %v415_v34 }
 0x14d   :  { %v1902_v24 = vmax.f32 %v1900_v10, %v1901_v15  ;;  %v1905_v41 = vmax.f32 %v1903_v48, %v1904_v16  ;;  %v1075_v48 = vperm.slane %v1036_v42, 0  ;;  %v1072_v15 = vperm.slane %v1033_v54, 0 }
 0x14e   :  { %v673_v25 = vpop.f32.mrf.mxu2  ;;  %v1381_v26 = vpop.f32.mrf.mxu0  ;;  %v1073_v16 = vperm.slane %v1034_v56, 0 }
 0x14f   :  { %v2176_v27 = vsub.f32 %v1855_v44, %v1902_v24  ;;  %v1906_v28 = vrot.slane %v1905_v41, 2  ;;  %v1183_v30 = vmul.f32 %v1143_v21, %v673_v25  ;;  %v1497_v39 = vmul.f32 0.125, %v1381_v26  ;;  %v120_v25 = vld [vmem:[%s6920_s3] sm:$0xff] }
 0x150   :  { %v5031_v24 = vperm.slane %v1037_v3, 0  ;;  %v1074_v26 = vperm.slane %v1035_v5, 0  ;;  %4059 = vmatmul.msk.f32.vlgmr.msrb.gmra.mxu3 %vm747_vm7, %v120_v25  ;;  %v5053_v46 = vmul.f32 %v1072_v15, %v4902_v55  ;;  %v5056_v37 = vmul.f32 %v1073_v16, %v4914_v4  ;;  %v463_v15 = vpop.f32.mrf.mxu3 }
 0x151   :  { %v2216_v43 = vmul.f32 1.442695, %v2176_v27  ;;  %v1907_v44 = vmax.f32 %v1905_v41, %v1906_v28  ;;  %v4999_v47 = vsel %vm1817_vm5, %v1497_v39, -3.4028235e+38  ;;  %4121 = vmatmul.msk.f32.gmra.mxu0 %vm169_vm0, %v1183_v30  ;;  %v116_v41 = vld [vmem:[%s6917_s2 + $0x120] sm:$0xff]  ;;  %v418_v39 = vpop.f32.mrf.mxu1  ;;  %v5063_v50 = vmul.f32 %v1075_v48, %v4931_v22 }
 0x152   :  { %v1910_v51 = vsel %vm1895_vm3, %v4999_v47, -inf  ;;  %v5067_v55 = vmul.f32 %v1074_v26, %v4923_v13  ;;  %v1145_v4 = vmul.f32 %v4985_v36, %v418_v39 }
 0x153   :  { %4206 = vpow2.f32 %v2216_v43  ;;  %v1908_v57 = vrot.slane %v1907_v44, 1  ;;  %v1911_v60 = vrot.slane %v1910_v51, 4  ;;  %4054 = vmatmul.msk.f32.gmra.mxu2 %vm169_vm0, %v115_v40 }
 0x155   :  { %v1909_v9 = vmax.f32 %v1907_v44, %v1908_v57  ;;  %v1912_v10 = vmax.f32 %v1910_v51, %v1911_v60  ;;  %v5060_v44 = vmul.f32 %v1069_v1, %v4792_v58  ;;  %v1038_v51 = vrot.slane %v4794_v59, 1 }
 0x156   :  { %v676_v14 = vpop.f32.mrf.mxu2  ;;  %v1384_v45 = vpop.f32.mrf.mxu0  ;;  %v1077_v60 = vperm.slane %v4794_v59, 0  ;;  %v1039_v58 = vrot.slane %v4794_v59, 2  ;;  %v1040_v1 = vrot.slane %v4794_v59, 3 }
 0x157   :  { %v2177_v53 = vsub.f32 %v4970_v11, %v1909_v9  ;;  %v1913_v18 = vrot.slane %v1912_v10, 2  ;;  %v1184_v19 = vmul.f32 %v1144_v8, %v676_v14  ;;  %v1498_v21 = vmul.f32 0.125, %v1384_v45  ;;  %v117_v14 = vld [vmem:[%s6917_s2 + $0x128] sm:$0xff] }
 0x158   :  { %v5042_v11 = vperm.slane %v1032_v7, 0  ;;  %v1041_v8 = vrot.slane %v4794_v59, 4  ;;  %v1042_v9 = vrot.slane %v4794_v59, 5  ;;  %v121_v45 = vld [vmem:[%s6920_s3 + $0x8] sm:$0xff]  ;;  %v1080_v39 = vperm.slane %v1040_v1, 0 }
 0x159   :  { %v5040_v2 = vpop.eup %4206  ;;  %v2218_v27 = vmul.f32 1.442695, %v2177_v53  ;;  %v1914_v28 = vmax.f32 %v1912_v10, %v1913_v18  ;;  %v5044_v30 = vsel %vm1818_vm6, %v1498_v21, -3.4028235e+38  ;;  %4122 = vmatmul.msk.f32.gmra.mxu0 %vm169_vm0, %v1184_v19  ;;  %v1043_v10 = vrot.slane %v4794_v59, 6  ;;  %4060 = vmatmul.msk.f32.gmra.mxu3 %vm747_vm7, %v121_v45 }
 0x15a   :  { %v2296_v32 = vsel %vm1895_vm3, %v5040_v2, 0.0  ;;  %v1917_v34 = vsel %vm1895_vm3, %v5044_v30, -inf  ;;  %v1079_v19 = vperm.slane %v1039_v58, 0  ;;  %v1044_v21 = vrot.slane %v4794_v59, 7 }
 0x15b   :  { %v2297_v40 = vrot.slane %v2296_v32, 4  ;;  %4208 = vpow2.f32 %v2218_v27  ;;  %v1915_v42 = vrot.slane %v1914_v28, 1  ;;  %v1918_v43 = vrot.slane %v1917_v34, 4  ;;  %4055 = vmatmul.msk.f32.gmra.mxu2 %vm169_vm0, %v116_v41 }
 0x15d   :  { %v2298_v54 = vadd.f32 %v2297_v40, %v2296_v32  ;;  %v1916_v56 = vmax.f32 %v1914_v28, %v1915_v42  ;;  %v1919_v57 = vmax.f32 %v1917_v34, %v1918_v43  ;;  %v1081_v32 = vperm.slane %v1041_v8, 0 }
 0x15e   :  { %v679_v22 = vpop.f32.mrf.mxu2  ;;  %v1387_v3 = vpop.f32.mrf.mxu0  ;;  %v5098_v34 = vperm.slane %v1042_v9, 0 }
 0x15f   :  { %v2299_v5 = vrot.slane %v2298_v54, 2  ;;  %v2178_v13 = vsub.f32 %v4999_v47, %v1916_v56  ;;  %v1920_v7 = vrot.slane %v1919_v57, 2  ;;  %v1185_v36 = vmul.f32 %v1145_v4, %v679_v22 }
 0x160   :  { %v1499_v48 = vmul.f32 0.125, %v1387_v3  ;;  %v1078_v47 = vperm.slane %v1038_v51, 0  ;;  %v5106_v4 = vmul.f32 %v5021_v12, %v4803_v0  ;;  %v5112_v56 = vperm.slane %v1043_v10, 0  ;;  %v466_v10 = vpop.f32.mrf.mxu3 }
 0x161   :  { %v5086_v52 = vpop.eup %4208  ;;  %v2300_v16 = vadd.f32 %v2299_v5, %v2298_v54  ;;  %v2220_v53 = vmul.f32 1.442695, %v2178_v13  ;;  %v1921_v18 = vmax.f32 %v1919_v57, %v1920_v7  ;;  %4123 = vmatmul.msk.f32.gmra.mxu0 %vm169_vm0, %v1185_v36  ;;  %v5110_v54 = vmul.f32 %v5031_v24, %v4942_v31  ;;  %v5125_v31 = vpop.permute.xlu2 %1575  ;;  %v118_v7 = vld [vmem:[%s6917_s2 + $0x130] sm:$0xff] }
 0x162   :  { %v2303_v41 = vsel %vm1895_vm3, %v5086_v52, 0.0  ;;  %v5095_v25 = vsel %vm1819_vm8, %v1499_v48, -3.4028235e+38  ;;  %v5114_v57 = vperm.slane %v1044_v21, 0  ;;  %v5120_v0 = vmul.f32 %v5042_v11, %v4811_v6  ;;  %v5147_v48 = vpop.permute.xlu0 %1582 }
 0x163   :  { %v2301_v26 = vrot.slane %v2300_v16, 1  ;;  %v2304_v27 = vrot.slane %v2303_v41, 4  ;;  %4210 = vpow2.f32 %v2220_v53  ;;  %v1922_v28 = vrot.slane %v1921_v18, 1  ;;  %4056 = vmatmul.msk.f32.gmra.mxu2 %vm169_vm0, %v117_v14 }
 0x164   :  { %v1924_v59 = vsel %vm1895_vm3, %v5095_v25, -inf  ;;  %v5123_v12 = vmul.f32 %v1077_v60, %v4956_v49  ;;  %vm1820_vm9 = vcmp.gt.f32.partialorder %v5125_v31, 0.0  ;;  %vm1821_vm10 = vcmp.gt.f32.partialorder %v5147_v48, 0.0 }
 0x165   :  { %v5102_v40 = vadd.f32 %v2301_v26, %v2300_v16  ;;  %v2305_v42 = vadd.f32 %v2304_v27, %v2303_v41  ;;  %v1923_v43 = vmax.f32 %v1921_v18, %v1922_v28  ;;  %v1925_v51 = vrot.slane %v1924_v59, 4 }
 0x166   :  { %v682_v58 = vpop.f32.mrf.mxu2  ;;  %v1390_v1 = vpop.f32.mrf.mxu0  ;;  %v5162_v28 = vmul.f32 %v1081_v32, %v466_v10 }
 0x167   :  { %4212 = vrcp.f32 %v5102_v40  ;;  %v2306_v22 = vrot.slane %v2305_v42, 2  ;;  %v2179_v3 = vsub.f32 %v5044_v30, %v1923_v43  ;;  %v1926_v5 = vmax.f32 %v1924_v59, %v1925_v51  ;;  %v122_v30 = vld [vmem:[%s6920_s3 + $0x10] sm:$0xff]  ;;  %v5173_v32 = vpop.permute.xlu1 %1589 }
 0x168   :  { %v1186_v24 = vmul.f32 %v4994_v29, %v682_v58  ;;  %v1500_v13 = vmul.f32 0.125, %v1390_v1  ;;  %4061 = vmatmul.msk.f32.gmra.mxu3 %vm747_vm7, %v122_v30  ;;  %v5139_v29 = vmul.f32 %v1078_v47, %v4980_v20  ;;  %v2585_v9 = vand.u32 2147483647, %v5102_v40 }
 0x169   :  { %v5134_v36 = vpop.eup %4210  ;;  %v2307_v6 = vadd.f32 %v2306_v22, %v2305_v42  ;;  %v2222_v49 = vmul.f32 1.442695, %v2179_v3  ;;  %v1927_v11 = vrot.slane %v1926_v5, 2  ;;  %v5151_v20 = vmul.f32 %v1079_v19, %v5026_v17  ;;  %v119_v22 = vld [vmem:[%s6917_s2 + $0x138] sm:$0xff] }
 0x16a   :  { %v2310_v60 = vsel %vm1895_vm3, %v5134_v36, 0.0  ;;  %v5143_v8 = vsel %vm1820_vm9, %v1500_v13, -3.4028235e+38  ;;  %4124 = vmatmul.msk.f32.gmra.mxu0 %vm169_vm0, %v1186_v24  ;;  %v5153_v47 = vmul.f32 %v1080_v39, %v463_v15  ;;  %vm2581_vm11 = vweird.f32 %v5102_v40 }
 0x16b   :  { %v2308_v14 = vrot.slane %v2307_v6, 1  ;;  %v2311_v45 = vrot.slane %v2310_v60, 4  ;;  %4214 = vpow2.f32 %v2222_v49  ;;  %v1928_v16 = vmax.f32 %v1926_v5, %v1927_v11  ;;  %4057 = vmatmul.msk.f32.gmra.mxu2 %vm169_vm0, %v118_v7 }
 0x16c   :  { %v1931_v53 = vsel %vm1895_vm3, %v5143_v8, -inf  ;;  %v2587_v15 = vand.u32 2147483648, %v5102_v40  ;;  %vm5169_vm12 = vcmp.eq.f32.partialorder %v2585_v9, 8.507059e+37  ;;  %vm1822_vm14 = vcmp.gt.f32.partialorder %v5173_v32, 0.0 }
 0x16d   :  { %v5158_v18 = vpop.eup %4212  ;;  %v5160_v21 = vadd.f32 %v2308_v14, %v2307_v6  ;;  %v2312_v41 = vadd.f32 %v2311_v45, %v2310_v60  ;;  %v1929_v26 = vrot.slane %v1928_v16, 1  ;;  %v1932_v27 = vrot.slane %v1931_v53, 4 }
 0x16e   :  { %v685_v59 = vpop.f32.mrf.mxu2  ;;  %v1393_v42 = vpop.f32.mrf.mxu0  ;;  %v2577_v17 = vmul.f32 %v5158_v18, %v5102_v40  ;;  %vm2582_vm13 = vweird.f32 %v5158_v18 }
 0x16f   :  { %4216 = vrcp.f32 %v5160_v21  ;;  %v2313_v19 = vrot.slane %v2312_v41, 2  ;;  %v1930_v39 = vmax.f32 %v1928_v16, %v1929_v26  ;;  %v1933_v43 = vmax.f32 %v1931_v53, %v1932_v27  ;;  %vm5207_vm1 = vmor %vm2581_vm11, %vm2582_vm13 }
 0x170   :  { %v1187_v58 = vmul.f32 %v5012_v61, %v685_v59  ;;  %v1501_v1 = vmul.f32 0.125, %v1393_v42  ;;  %v2578_v3 = vsub.f32 1.0, %v2577_v17  ;;  %v2600_v30 = vand.u32 2147483647, %v5160_v21 }
 0x171   :  { %v5180_v5 = vpop.eup %4214  ;;  %v2314_v24 = vadd.f32 %v2313_v19, %v2312_v41  ;;  %v2180_v13 = vsub.f32 %v5095_v25, %v1930_v39  ;;  %v1934_v7 = vrot.slane %v1933_v43, 2  ;;  %v2602_v11 = vand.u32 2147483648, %v5160_v21 }
 0x172   :  { %v2317_v61 = vsel %vm1895_vm3, %v5180_v5, 0.0  ;;  %v5189_v6 = vsel %vm1821_vm10, %v1501_v1, -3.4028235e+38  ;;  %4125 = vmatmul.msk.f32.gmra.mxu0 %vm169_vm0, %v1187_v58  ;;  %v2579_v49 = vmul.f32 %v5158_v18, %v2578_v3  ;;  %v2588_v16 = vor.u32 1.1754944e-38, %v2587_v15  ;;  %v5216_v58 = vpop.permute.xlu2 %1596 }
 0x173   :  { %v2315_v60 = vrot.slane %v2314_v24, 1  ;;  %v2318_v9 = vrot.slane %v2317_v61, 4  ;;  %v2224_v10 = vmul.f32 1.442695, %v2180_v13  ;;  %v1935_v25 = vmax.f32 %v1933_v43, %v1934_v7  ;;  %4058 = vmatmul.msk.f32.gmra.mxu2 %vm169_vm0, %v119_v22 }
 0x174   :  { %v1938_v14 = vsel %vm1895_vm3, %v5189_v6, -inf  ;;  %v2580_v45 = vadd.f32 %v5158_v18, %v2579_v49  ;;  %vm2596_vm15 = vweird.f32 %v5160_v21  ;;  %v2603_v43 = vor.u32 1.1754944e-38, %v2602_v11 }
 0x175   :  { %v5199_v53 = vpop.eup %4216  ;;  %v5201_v41 = vadd.f32 %v2315_v60, %v2314_v24  ;;  %v2319_v26 = vadd.f32 %v2318_v9, %v2317_v61  ;;  %4218 = vpow2.f32 %v2224_v10  ;;  %v1936_v27 = vrot.slane %v1935_v25, 1 }
 0x176   :  { %v1939_v42 = vrot.slane %v1938_v14, 4  ;;  %v688_v17 = vpop.f32.mrf.mxu2  ;;  %v1396_v15 = vpop.f32.mrf.mxu0  ;;  %v2584_v19 = vsel %vm5207_vm1, %v5158_v18, %v2580_v45  ;;  %v2592_v39 = vmul.f32 %v5199_v53, %v5160_v21  ;;  %vm5220_vm2 = vcmp.eq.f32.partialorder %v2600_v30, 8.507059e+37 }
 0x177   :  { %4220 = vrcp.f32 %v5201_v41  ;;  %v2320_v40 = vrot.slane %v2319_v26, 2  ;;  %v1937_v1 = vmax.f32 %v1935_v25, %v1936_v27  ;;  %v1188_v22 = vmul.f32 %v5015_v62, %v688_v17  ;;  %v123_v62 = vld [vmem:[%s6920_s3 + $0x18] sm:$0xff] }
 0x178   :  { %vm1823_vm4 = vcmp.gt.f32.partialorder %v5216_v58, 0.0  ;;  %v1940_v24 = vmax.f32 %v1938_v14, %v1939_v42  ;;  %v1502_v18 = vmul.f32 0.125, %v1396_v15  ;;  %v2589_v13 = vsel %vm5169_vm12, %v2588_v16, %v2584_v19  ;;  %4062 = vmatmul.msk.f32.gmra.mxu3 %vm747_vm7, %v123_v62 }
 0x179   :  { %v2593_v7 = vsub.f32 1.0, %v2592_v39  ;;  %v2321_v61 = vadd.f32 %v2320_v40, %v2319_v26  ;;  %v2181_v49 = vsub.f32 %v5143_v8, %v1937_v1  ;;  %v3176_v11 = vmul.f32 %v5040_v2, %v2589_v13 }
 0x17a   :  { %vm2597_vm5 = vweird.f32 %v5199_v53  ;;  %v1941_v30 = vrot.slane %v1940_v24, 2  ;;  %v5235_v60 = vsel %vm1822_vm14, %v1502_v18, -3.4028235e+38  ;;  %4126 = vmatmul.msk.f32.gmra.mxu0 %vm169_vm0, %v1188_v22  ;;  %v2615_v9 = vand.u32 2147483647, %v5201_v41 }
 0x17b   :  { %v2594_v51 = vmul.f32 %v5199_v53, %v2593_v7  ;;  %v5241_v2 = vpop.eup %4218  ;;  %v2322_v8 = vrot.slane %v2321_v61, 1  ;;  %v2226_v10 = vmul.f32 1.442695, %v2181_v49  ;;  %v1945_v25 = vsel %vm1895_vm3, %v5235_v60, -inf  ;;  %vm5258_vm6 = vmor %vm2596_vm15, %vm2597_vm5  ;;  %v5274_v7 = vpop.permute.xlu0 %1603 }
 0x17c   :  { %v3216_v14 = vmul.f32 %v3176_v11, %v4947_v35  ;;  %v2324_v45 = vsel %vm1895_vm3, %v5241_v2, 0.0  ;;  %v1942_v16 = vmax.f32 %v1940_v24, %v1941_v30  ;;  %v1946_v26 = vrot.slane %v1945_v25, 4 }
 0x17d   :  { %v2595_v27 = vadd.f32 %v5199_v53, %v2594_v51  ;;  %v5249_v59 = vpop.eup %4220  ;;  %v5251_v42 = vadd.f32 %v2322_v8, %v2321_v61  ;;  %v2325_v17 = vrot.slane %v2324_v45, 4  ;;  %4222 = vpow2.f32 %v2226_v10 }
 0x17e   :  { %4144 = vmatmul.msk.f32.vlgmr.msrb.gmra.mxu1 %vm1895_vm3, %v3216_v14  ;;  %vm2611_vm8 = vweird.f32 %v5201_v41  ;;  %v1943_v15 = vrot.slane %v1942_v16, 1  ;;  %v1947_v19 = vmax.f32 %v1945_v25, %v1946_v26  ;;  %v691_v39 = vpop.f32.mrf.mxu2  ;;  %v1399_v40 = vpop.f32.mrf.mxu0  ;;  %v2607_v22 = vmul.f32 %v5249_v59, %v5201_v41 }
 0x17f   :  { %v2599_v1 = vsel %vm5258_vm6, %v5199_v53, %v2595_v27  ;;  %4224 = vrcp.f32 %v5251_v42  ;;  %v2326_v21 = vadd.f32 %v2325_v17, %v2324_v45  ;;  %v1189_v24 = vmul.f32 %v5060_v44, %v691_v39  ;;  %v124_v27 = vld [vmem:[%s6920_s3 + $0x20] sm:$0xff] }
 0x180   :  { %v1503_v18 = vmul.f32 0.125, %v1399_v40  ;;  %vm5270_vm9 = vcmp.eq.f32.partialorder %v2615_v9, 8.507059e+37  ;;  %v1944_v61 = vmax.f32 %v1942_v16, %v1943_v15  ;;  %v1948_v49 = vrot.slane %v1947_v19, 2  ;;  %4063 = vmatmul.msk.f32.gmra.mxu3 %vm747_vm7, %v124_v27 }
 0x181   :  { %v2604_v53 = vsel %vm5220_vm2, %v2603_v43, %v2599_v1  ;;  %v2608_v11 = vsub.f32 1.0, %v2607_v22  ;;  %vm1824_vm10 = vcmp.gt.f32.partialorder %v5274_v7, 0.0  ;;  %v2327_v62 = vrot.slane %v2326_v21, 2 }
 0x182   :  { %v5281_v30 = vsel %vm1823_vm4, %v1503_v18, -3.4028235e+38  ;;  %v3177_v44 = vmul.f32 %v5086_v52, %v2604_v53  ;;  %vm2612_vm11 = vweird.f32 %v5249_v59  ;;  %v2182_v51 = vsub.f32 %v5189_v6, %v1944_v61  ;;  %4127 = vmatmul.msk.f32.gmra.mxu0 %vm169_vm0, %v1189_v24  ;;  %v5317_v18 = vpop.permute.xlu1 %1610 }
 0x183   :  { %v1949_v9 = vmax.f32 %v1947_v19, %v1948_v49  ;;  %v1952_v8 = vsel %vm1895_vm3, %v5281_v30, -inf  ;;  %v2609_v43 = vmul.f32 %v5249_v59, %v2608_v11  ;;  %v5290_v3 = vpop.eup %4222  ;;  %v2328_v10 = vadd.f32 %v2327_v62, %v2326_v21  ;;  %vm5307_vm12 = vmor %vm2611_vm8, %vm2612_vm11 }
 0x184   :  { %v1953_v25 = vrot.slane %v1952_v8, 4  ;;  %v3217_v14 = vmul.f32 %v3177_v44, %v4960_v63  ;;  %v2617_v52 = vand.u32 2147483648, %v5201_v41  ;;  %v2331_v45 = vsel %vm1895_vm3, %v5290_v3, 0.0 }
 0x185   :  { %v2228_v6 = vmul.f32 1.442695, %v2182_v51  ;;  %v1950_v16 = vrot.slane %v1949_v9, 1  ;;  %v2610_v26 = vadd.f32 %v5249_v59, %v2609_v43  ;;  %v5300_v17 = vpop.eup %4224  ;;  %v2329_v35 = vrot.slane %v2328_v10, 1 }
 0x186   :  { %v2332_v15 = vrot.slane %v2331_v45, 4  ;;  %v1954_v19 = vmax.f32 %v1952_v8, %v1953_v25  ;;  %4145 = vmatmul.msk.f32.gmra.mxu1 %vm1895_vm3, %v3217_v14  ;;  %v2618_v39 = vor.u32 1.1754944e-38, %v2617_v52  ;;  %v694_v1 = vpop.f32.mrf.mxu2  ;;  %v1402_v22 = vpop.f32.mrf.mxu0  ;;  %v2622_v24 = vmul.f32 %v5300_v17, %v5251_v42 }
 0x187   :  { %4226 = vpow2.f32 %v2228_v6  ;;  %v1951_v40 = vmax.f32 %v1949_v9, %v1950_v16  ;;  %v2614_v21 = vsel %vm5307_vm12, %v5249_v59, %v2610_v26  ;;  %v5319_v41 = vadd.f32 %v2329_v35, %v2328_v10 }
 0x188   :  { %v2333_v61 = vadd.f32 %v2332_v15, %v2331_v45  ;;  %v1955_v49 = vrot.slane %v1954_v19, 2  ;;  %v1190_v53 = vmul.f32 %v5106_v4, %v694_v1  ;;  %vm1825_vm13 = vcmp.gt.f32.partialorder %v5317_v18, 0.0 }
 0x189   :  { %v2183_v11 = vsub.f32 %v5235_v60, %v1951_v40  ;;  %v1504_v62 = vmul.f32 0.125, %v1402_v22  ;;  %v2619_v44 = vsel %vm5270_vm9, %v2618_v39, %v2614_v21  ;;  %v2623_v59 = vsub.f32 1.0, %v2622_v24  ;;  %v5356_v22 = vpop.permute.xlu2 %1617 }
 0x18a   :  { %4228 = vrcp.f32 %v5319_v41  ;;  %v2334_v51 = vrot.slane %v2333_v61, 2  ;;  %v1956_v9 = vmax.f32 %v1954_v19, %v1955_v49  ;;  %v3178_v8 = vmul.f32 %v5134_v36, %v2619_v44  ;;  %4128 = vmatmul.msk.f32.gmra.mxu0 %vm169_vm0, %v1190_v53 }
 0x18b   :  { %v2230_v43 = vmul.f32 1.442695, %v2183_v11  ;;  %v5330_v10 = vsel %vm1824_vm10, %v1504_v62, -3.4028235e+38  ;;  %v2624_v4 = vmul.f32 %v5300_v17, %v2623_v59  ;;  %vm2626_vm14 = vweird.f32 %v5251_v42 }
 0x18c   :  { %v2335_v60 = vadd.f32 %v2334_v51, %v2333_v61  ;;  %v1957_v13 = vrot.slane %v1956_v9, 1  ;;  %v1959_v25 = vsel %vm1895_vm3, %v5330_v10, -inf  ;;  %v3218_v14 = vmul.f32 %v3178_v8, %v4982_v23 }
 0x18d   :  { %v5338_v52 = vpop.eup %4226  ;;  %4230 = vpow2.f32 %v2230_v43  ;;  %v1960_v36 = vrot.slane %v1959_v25, 4  ;;  %v2625_v45 = vadd.f32 %v5300_v17, %v2624_v4  ;;  %vm2627_vm15 = vweird.f32 %v5300_v17 }
 0x18e   :  { %v2336_v6 = vrot.slane %v2335_v60, 1  ;;  %v2338_v16 = vsel %vm1895_vm3, %v5338_v52, 0.0  ;;  %v1958_v26 = vmax.f32 %v1956_v9, %v1957_v13  ;;  %4146 = vmatmul.msk.f32.gmra.mxu1 %vm1895_vm3, %v3218_v14  ;;  %vm5345_vm1 = vmor %vm2626_vm14, %vm2627_vm15  ;;  %v2630_v23 = vand.u32 2147483647, %v5251_v42  ;;  %v697_v19 = vpop.f32.mrf.mxu2  ;;  %v1405_v63 = vpop.f32.mrf.mxu0 }
 0x18f   :  { %v2339_v35 = vrot.slane %v2338_v16, 4  ;;  %v1961_v15 = vmax.f32 %v1959_v25, %v1960_v36  ;;  %v2629_v39 = vsel %vm5345_vm1, %v5300_v17, %v2625_v45  ;;  %v2632_v40 = vand.u32 2147483648, %v5251_v42  ;;  %v125_v42 = vld [vmem:[%s6920_s3 + $0x28] sm:$0xff] }
 0x190   :  { %v5354_v1 = vpop.eup %4228  ;;  %v5358_v21 = vadd.f32 %v2336_v6, %v2335_v60  ;;  %v2184_v24 = vsub.f32 %v5281_v30, %v1958_v26  ;;  %v1191_v61 = vmul.f32 %v5120_v0, %v697_v19  ;;  %v1505_v49 = vmul.f32 0.125, %v1405_v63  ;;  %4064 = vmatmul.msk.f32.gmra.mxu3 %vm747_vm7, %v125_v42 }
 0x191   :  { %vm1826_vm2 = vcmp.gt.f32.partialorder %v5356_v22, 0.0  ;;  %v2340_v53 = vadd.f32 %v2339_v35, %v2338_v16  ;;  %v1962_v11 = vrot.slane %v1961_v15, 2  ;;  %vm2631_vm4 = vcmp.eq.f32.partialorder %v2630_v23, 8.507059e+37 }
 0x192   :  { %v2633_v62 = vor.u32 1.1754944e-38, %v2632_v40  ;;  %4232 = vrcp.f32 %v5358_v21  ;;  %v2232_v17 = vmul.f32 1.442695, %v2184_v24  ;;  %v5369_v44 = vsel %vm1825_vm13, %v1505_v49, -3.4028235e+38  ;;  %4129 = vmatmul.msk.f32.gmra.mxu0 %vm169_vm0, %v1191_v61  ;;  %v5391_v40 = vpop.permute.xlu0 %1624 }
 0x193   :  { %v2637_v0 = vmul.f32 %v5354_v1, %v5319_v41  ;;  %v5374_v30 = vpop.eup %4230  ;;  %v2341_v59 = vrot.slane %v2340_v53, 2  ;;  %v1963_v51 = vmax.f32 %v1961_v15, %v1962_v11  ;;  %v1966_v9 = vsel %vm1895_vm3, %v5369_v44, -inf }
 0x194   :  { %v2634_v8 = vsel %vm2631_vm4, %v2633_v62, %v2629_v39  ;;  %v2345_v43 = vsel %vm1895_vm3, %v5374_v30, 0.0  ;;  %4234 = vpow2.f32 %v2232_v17  ;;  %v1967_v4 = vrot.slane %v1966_v9, 4 }
 0x195   :  { %v3179_v60 = vmul.f32 %v5180_v5, %v2634_v8  ;;  %v2342_v13 = vadd.f32 %v2341_v59, %v2340_v53  ;;  %v2346_v25 = vrot.slane %v2345_v43, 4  ;;  %v1964_v14 = vrot.slane %v1963_v51, 1 }
 0x196   :  { %v2638_v36 = vsub.f32 1.0, %v2637_v0  ;;  %v1968_v45 = vmax.f32 %v1966_v9, %v1967_v4  ;;  %vm2641_vm5 = vweird.f32 %v5319_v41  ;;  %vm2642_vm6 = vweird.f32 %v5354_v1  ;;  %v700_v23 = vpop.f32.mrf.mxu2  ;;  %v1408_v35 = vpop.f32.mrf.mxu0  ;;  %v127_v9 = vld [vmem:[%s6920_s3 + $0x38] sm:$0xff] }
 0x197   :  { %v3219_v6 = vmul.f32 %v3179_v60, %v5028_v33  ;;  %v2343_v16 = vrot.slane %v2342_v13, 1  ;;  %v2347_v26 = vadd.f32 %v2346_v25, %v2345_v43  ;;  %v1965_v27 = vmax.f32 %v1963_v51, %v1964_v14  ;;  %vm5420_vm10 = vmor %vm2641_vm5, %vm2642_vm6 }
 0x198   :  { %v2639_v15 = vmul.f32 %v5354_v1, %v2638_v36  ;;  %v5386_v19 = vpop.eup %4232  ;;  %v1969_v5 = vrot.slane %v1968_v45, 2  ;;  %v1192_v63 = vmul.f32 %v5053_v46, %v700_v23  ;;  %v1506_v39 = vmul.f32 0.125, %v1408_v35 }
 0x199   :  { %4147 = vmatmul.msk.f32.gmra.mxu1 %vm1895_vm3, %v3219_v6  ;;  %v2645_v33 = vand.u32 2147483647, %v5319_v41  ;;  %v5393_v24 = vadd.f32 %v2343_v16, %v2342_v13  ;;  %v2348_v61 = vrot.slane %v2347_v26, 2  ;;  %v2185_v49 = vsub.f32 %v5330_v10, %v1965_v27  ;;  %v126_v10 = vld [vmem:[%s6920_s3 + $0x30] sm:$0xff] }
 0x19a   :  { %v2640_v53 = vadd.f32 %v5354_v1, %v2639_v15  ;;  %v5397_v11 = vpop.eup %4234  ;;  %vm1827_vm8 = vcmp.gt.f32.partialorder %v5391_v40, 0.0  ;;  %v1970_v62 = vmax.f32 %v1968_v45, %v1969_v5  ;;  %v5402_v46 = vsel %vm1826_vm2, %v1506_v39, -3.4028235e+38  ;;  %4130 = vmatmul.msk.f32.gmra.mxu0 %vm169_vm0, %v1192_v63  ;;  %4065 = vmatmul.msk.f32.gmra.mxu3 %vm747_vm7, %v126_v10 }
 0x19b   :  { %vm5404_vm9 = vcmp.eq.f32.partialorder %v2645_v33, 8.507059e+37  ;;  %v2647_v17 = vand.u32 2147483648, %v5319_v41  ;;  %4236 = vrcp.f32 %v5393_v24  ;;  %v2349_v0 = vadd.f32 %v2348_v61, %v2347_v26 }
 0x19c   :  { %v2352_v59 = vsel %vm1895_vm3, %v5397_v11, 0.0  ;;  %v2234_v51 = vmul.f32 1.442695, %v2185_v49  ;;  %v1971_v43 = vrot.slane %v1970_v62, 1  ;;  %v1973_v4 = vsel %vm1895_vm3, %v5402_v46, -inf }
 0x19d   :  { %v2353_v8 = vrot.slane %v2352_v59, 4  ;;  %v2644_v60 = vsel %vm5420_vm10, %v5354_v1, %v2640_v53  ;;  %v2350_v13 = vrot.slane %v2349_v0, 1  ;;  %v1974_v25 = vrot.slane %v1973_v4, 4  ;;  %v5438_v1 = vpop.permute.xlu1 %1631 }
 0x19e   :  { %4238 = vpow2.f32 %v2234_v51  ;;  %v2648_v14 = vor.u32 1.1754944e-38, %v2647_v17  ;;  %v1972_v36 = vmax.f32 %v1970_v62, %v1971_v43  ;;  %v2652_v45 = vmul.f32 %v5386_v19, %v5358_v21  ;;  %v703_v27 = vpop.f32.mrf.mxu2  ;;  %v1411_v23 = vpop.f32.mrf.mxu0 }
 0x19f   :  { %v2354_v41 = vadd.f32 %v2353_v8, %v2352_v59  ;;  %vm2656_vm11 = vweird.f32 %v5358_v21  ;;  %v5433_v6 = vadd.f32 %v2350_v13, %v2349_v0  ;;  %v1975_v16 = vmax.f32 %v1973_v4, %v1974_v25 }
 0x1a0   :  { %v2649_v26 = vsel %vm5404_vm9, %v2648_v14, %v2644_v60  ;;  %vm2657_vm12 = vweird.f32 %v5386_v19  ;;  %v2186_v15 = vsub.f32 %v5369_v44, %v1972_v36  ;;  %v1193_v63 = vmul.f32 %v5056_v37, %v703_v27 }
 0x1a1   :  { %v2355_v35 = vrot.slane %v2354_v41, 2  ;;  %v3180_v5 = vmul.f32 %v5241_v2, %v2649_v26  ;;  %v5443_v39 = vpop.eup %4236  ;;  %vm1828_vm13 = vcmp.gt.f32.partialorder %v5438_v1, 0.0  ;;  %4240 = vrcp.f32 %v5433_v6  ;;  %vm2658_vm14 = vmor %vm2656_vm11, %vm2657_vm12 }
 0x1a2   :  { %v1976_v33 = vrot.slane %v1975_v16, 2  ;;  %v1507_v61 = vmul.f32 0.125, %v1411_v23  ;;  %v2653_v49 = vsub.f32 1.0, %v2652_v45  ;;  %v2236_v62 = vmul.f32 1.442695, %v2186_v15  ;;  %4131 = vmatmul.msk.f32.gmra.mxu0 %vm169_vm0, %v1193_v63  ;;  %4066 = vmatmul.msk.f32.gmra.mxu3 %vm747_vm7, %v127_v9 }
 0x1a3   :  { %v2356_v53 = vadd.f32 %v2355_v35, %v2354_v41  ;;  %v3220_v42 = vmul.f32 %v3180_v5, %v5070_v38  ;;  %v2660_v17 = vand.u32 2147483647, %v5358_v21  ;;  %v2662_v0 = vand.u32 2147483648, %v5358_v21 }
 0x1a4   :  { %v5449_v44 = vpop.eup %4238  ;;  %v1977_v2 = vmax.f32 %v1975_v16, %v1976_v33  ;;  %v5453_v37 = vsel %vm1827_vm8, %v1507_v61, -3.4028235e+38  ;;  %v2654_v10 = vmul.f32 %v5386_v19, %v2653_v49  ;;  %4242 = vpow2.f32 %v2236_v62 }
 0x1a5   :  { %v2357_v59 = vrot.slane %v2356_v53, 1  ;;  %v2359_v51 = vsel %vm1895_vm3, %v5449_v44, 0.0  ;;  %4148 = vmatmul.msk.f32.gmra.mxu1 %vm1895_vm3, %v3220_v42  ;;  %v1980_v38 = vsel %vm1895_vm3, %v5453_v37, -inf  ;;  %vm2661_vm15 = vcmp.eq.f32.partialorder %v2660_v17, 8.507059e+37 }
 0x1a6   :  { %v2360_v8 = vrot.slane %v2359_v51, 4  ;;  %v1978_v43 = vrot.slane %v1977_v2, 1  ;;  %v1981_v4 = vrot.slane %v1980_v38, 4  ;;  %v2655_v60 = vadd.f32 %v5386_v19, %v2654_v10  ;;  %v706_v27 = vpop.f32.mrf.mxu2  ;;  %v1414_v23 = vpop.f32.mrf.mxu0 }
 0x1a7   :  { %v5468_v13 = vadd.f32 %v2357_v59, %v2356_v53  ;;  %v2663_v25 = vor.u32 1.1754944e-38, %v2662_v0  ;;  %v2667_v14 = vmul.f32 %v5443_v39, %v5393_v24  ;;  %v5476_v41 = vpop.eup %4240  ;;  %v1194_v21 = vmul.f32 %v5067_v55, %v706_v27  ;;  %v5485_v53 = vpop.permute.xlu2 %1638 }
 0x1a8   :  { %v2361_v36 = vadd.f32 %v2360_v8, %v2359_v51  ;;  %v1979_v45 = vmax.f32 %v1977_v2, %v1978_v43  ;;  %v1982_v16 = vmax.f32 %v1980_v38, %v1981_v4  ;;  %v2659_v26 = vsel %vm2658_vm14, %v5386_v19, %v2655_v60  ;;  %v128_v60 = vld [vmem:[%s6920_s3 + $0x40] sm:$0xff] }
 0x1a9   :  { %4244 = vrcp.f32 %v5468_v13  ;;  %v2664_v35 = vsel %vm2661_vm15, %v2663_v25, %v2659_v26  ;;  %v1508_v15 = vmul.f32 0.125, %v1414_v23  ;;  %v2668_v62 = vsub.f32 1.0, %v2667_v14 }
 0x1aa   :  { %v2362_v5 = vrot.slane %v2361_v36, 2  ;;  %v2187_v63 = vsub.f32 %v5402_v46, %v1979_v45  ;;  %v1983_v33 = vrot.slane %v1982_v16, 2  ;;  %v3181_v61 = vmul.f32 %v5290_v3, %v2664_v35  ;;  %v5483_v49 = vpop.eup %4242  ;;  %4132 = vmatmul.msk.f32.gmra.mxu0 %vm169_vm0, %v1194_v21  ;;  %4067 = vmatmul.msk.f32.gmra.mxu3 %vm747_vm7, %v128_v60 }
 0x1ab   :  { %v5489_v19 = vsel %vm1828_vm13, %v1508_v15, -3.4028235e+38  ;;  %vm2671_vm1 = vweird.f32 %v5393_v24  ;;  %vm2672_vm2 = vweird.f32 %v5443_v39  ;;  %vm1829_vm4 = vcmp.gt.f32.partialorder %v5485_v53, 0.0 }
 0x1ac   :  { %v2363_v55 = vadd.f32 %v2362_v5, %v2361_v36  ;;  %v2366_v46 = vsel %vm1895_vm3, %v5483_v49, 0.0  ;;  %v2238_v3 = vmul.f32 1.442695, %v2187_v63  ;;  %v1984_v42 = vmax.f32 %v1982_v16, %v1983_v33  ;;  %vm2673_vm5 = vmor %vm2671_vm1, %vm2672_vm2 }
 0x1ad   :  { %v2367_v17 = vrot.slane %v2366_v46, 4  ;;  %v3221_v2 = vmul.f32 %v3181_v61, %v5125_v31  ;;  %v1987_v10 = vsel %vm1895_vm3, %v5489_v19, -inf  ;;  %v2669_v0 = vmul.f32 %v5443_v39, %v2668_v62 }
 0x1ae   :  { %v2364_v59 = vrot.slane %v2363_v55, 1  ;;  %4246 = vpow2.f32 %v2238_v3  ;;  %v1985_v51 = vrot.slane %v1984_v42, 1  ;;  %v1988_v38 = vrot.slane %v1987_v10, 4  ;;  %v709_v45 = vpop.f32.mrf.mxu2  ;;  %v1417_v16 = vpop.f32.mrf.mxu0 }
 0x1af   :  { %v5501_v9 = vpop.eup %4244  ;;  %v2368_v8 = vadd.f32 %v2367_v17, %v2366_v46  ;;  %4149 = vmatmul.msk.f32.gmra.mxu1 %vm1895_vm3, %v3221_v2  ;;  %v2670_v43 = vadd.f32 %v5443_v39, %v2669_v0  ;;  %v2675_v4 = vand.u32 2147483647, %v5393_v24  ;;  %v2677_v31 = vand.u32 2147483648, %v5393_v24 }
 0x1b0   :  { %v5510_v25 = vadd.f32 %v2364_v59, %v2363_v55  ;;  %v1986_v14 = vmax.f32 %v1984_v42, %v1985_v51  ;;  %v1989_v36 = vmax.f32 %v1987_v10, %v1988_v38  ;;  %v2682_v26 = vmul.f32 %v5476_v41, %v5433_v6  ;;  %v129_v38 = vld [vmem:[%s6920_s3 + $0x48] sm:$0xff] }
 0x1b1   :  { %v2369_v27 = vrot.slane %v2368_v8, 2  ;;  %v2674_v23 = vsel %vm2673_vm5, %v5443_v39, %v2670_v43  ;;  %vm2676_vm6 = vcmp.eq.f32.partialorder %v2675_v4, 8.507059e+37  ;;  %v2678_v35 = vor.u32 1.1754944e-38, %v2677_v31 }
 0x1b2   :  { %4248 = vrcp.f32 %v5510_v25  ;;  %v2188_v21 = vsub.f32 %v5453_v37, %v1986_v14  ;;  %v1990_v15 = vrot.slane %v1989_v36, 2  ;;  %v1195_v24 = vmul.f32 %v5063_v50, %v709_v45  ;;  %4068 = vmatmul.msk.f32.gmra.mxu3 %vm747_vm7, %v129_v38 }
 0x1b3   :  { %v2370_v5 = vadd.f32 %v2369_v27, %v2368_v8  ;;  %v2679_v63 = vsel %vm2676_vm6, %v2678_v35, %v2674_v23  ;;  %v1509_v33 = vmul.f32 0.125, %v1417_v16  ;;  %v2683_v61 = vsub.f32 1.0, %v2682_v26 }
 0x1b4   :  { %v5523_v62 = vpop.eup %4246  ;;  %v2240_v55 = vmul.f32 1.442695, %v2188_v21  ;;  %v1991_v46 = vmax.f32 %v1989_v36, %v1990_v15  ;;  %v3182_v3 = vmul.f32 %v5338_v52, %v2679_v63  ;;  %4133 = vmatmul.msk.f32.gmra.mxu0 %vm169_vm0, %v1195_v24  ;;  %vm2686_vm8 = vweird.f32 %v5433_v6  ;;  %v5536_v52 = vpop.permute.xlu0 %1645 }
 0x1b5   :  { %v2371_v39 = vrot.slane %v2370_v5, 1  ;;  %v2373_v37 = vsel %vm1895_vm3, %v5523_v62, 0.0  ;;  %v5532_v50 = vsel %vm1829_vm4, %v1509_v33, -3.4028235e+38  ;;  %v2684_v42 = vmul.f32 %v5476_v41, %v2683_v61  ;;  %v5566_v21 = vpop.permute.xlu1 %1652 }
 0x1b6   :  { %v2374_v17 = vrot.slane %v2373_v37, 4  ;;  %4250 = vpow2.f32 %v2240_v55  ;;  %v1992_v2 = vrot.slane %v1991_v46, 1  ;;  %v3222_v10 = vmul.f32 %v3182_v3, %v5147_v48  ;;  %v712_v60 = vpop.f32.mrf.mxu2  ;;  %v1420_v14 = vpop.f32.mrf.mxu0 }
 0x1b7   :  { %v5538_v0 = vadd.f32 %v2371_v39, %v2370_v5  ;;  %v1994_v59 = vsel %vm1895_vm3, %v5532_v50, -inf  ;;  %v2685_v51 = vadd.f32 %v5476_v41, %v2684_v42  ;;  %vm2687_vm9 = vweird.f32 %v5476_v41 }
 0x1b8   :  { %v5547_v8 = vpop.eup %4248  ;;  %v2375_v43 = vadd.f32 %v2374_v17, %v2373_v37  ;;  %v1993_v4 = vmax.f32 %v1991_v46, %v1992_v2  ;;  %4150 = vmatmul.msk.f32.gmra.mxu1 %vm1895_vm3, %v3222_v10  ;;  %v1995_v48 = vrot.slane %v1994_v59, 4  ;;  %v2690_v31 = vand.u32 2147483647, %v5433_v6  ;;  %vm5556_vm11 = vmor %vm2686_vm8, %vm2687_vm9 }
 0x1b9   :  { %vm1830_vm10 = vcmp.gt.f32.partialorder %v5536_v52, 0.0  ;;  %4252 = vrcp.f32 %v5538_v0  ;;  %v2692_v45 = vand.u32 2147483648, %v5433_v6  ;;  %v1196_v16 = vmul.f32 %v5110_v54, %v712_v60 }
 0x1ba   :  { %v2376_v26 = vrot.slane %v2375_v43, 2  ;;  %v2189_v27 = vsub.f32 %v5489_v19, %v1993_v4  ;;  %v1996_v23 = vmax.f32 %v1994_v59, %v1995_v48  ;;  %v2689_v35 = vsel %vm5556_vm11, %v5476_v41, %v2685_v51  ;;  %v130_v48 = vld [vmem:[%s6920_s3 + $0x50] sm:$0xff] }
 0x1bb   :  { %vm2691_vm12 = vcmp.eq.f32.partialorder %v2690_v31, 8.507059e+37  ;;  %v2693_v15 = vor.u32 1.1754944e-38, %v2692_v45  ;;  %v1510_v24 = vmul.f32 0.125, %v1420_v14  ;;  %v2697_v5 = vmul.f32 %v5501_v9, %v5468_v13  ;;  %4069 = vmatmul.msk.f32.gmra.mxu3 %vm747_vm7, %v130_v48 }
 0x1bc   :  { %v5570_v63 = vpop.eup %4250  ;;  %vm1831_vm13 = vcmp.gt.f32.partialorder %v5566_v21, 0.0  ;;  %v2377_v54 = vadd.f32 %v2376_v26, %v2375_v43  ;;  %v2242_v6 = vmul.f32 1.442695, %v2189_v27  ;;  %v1997_v19 = vrot.slane %v1996_v23, 2  ;;  %4134 = vmatmul.msk.f32.gmra.mxu0 %vm169_vm0, %v1196_v16 }
 0x1bd   :  { %vm2702_vm14 = vweird.f32 %v5501_v9  ;;  %v2380_v41 = vsel %vm1895_vm3, %v5570_v63, 0.0  ;;  %v2694_v33 = vsel %vm2691_vm12, %v2693_v15, %v2689_v35  ;;  %v5579_v61 = vsel %vm1830_vm10, %v1510_v24, -3.4028235e+38  ;;  %v5611_v15 = vpop.permute.xlu2 %1659 }
 0x1be   :  { %v2698_v55 = vsub.f32 1.0, %v2697_v5  ;;  %v2378_v46 = vrot.slane %v2377_v54, 1  ;;  %v2381_v3 = vrot.slane %v2380_v41, 4  ;;  %4254 = vpow2.f32 %v2242_v6  ;;  %v715_v43 = vpop.f32.mrf.mxu2  ;;  %v1423_v4 = vpop.f32.mrf.mxu0 }
 0x1bf   :  { %v1998_v39 = vmax.f32 %v1996_v23, %v1997_v19  ;;  %v5581_v37 = vpop.eup %4252  ;;  %v3183_v42 = vmul.f32 %v5374_v30, %v2694_v33  ;;  %v2001_v17 = vsel %vm1895_vm3, %v5579_v61, -inf  ;;  %v2705_v10 = vand.u32 2147483647, %v5468_v13 }
 0x1c0   :  { %v2699_v2 = vmul.f32 %v5501_v9, %v2698_v55  ;;  %v2382_v59 = vadd.f32 %v2381_v3, %v2380_v41  ;;  %v2002_v38 = vrot.slane %v2001_v17, 4  ;;  %vm2701_vm15 = vweird.f32 %v5468_v13 }
 0x1c1   :  { %v1999_v51 = vrot.slane %v1998_v39, 1  ;;  %v5592_v31 = vadd.f32 %v2378_v46, %v2377_v54  ;;  %v3223_v30 = vmul.f32 %v3183_v42, %v5173_v32  ;;  %v2707_v14 = vand.u32 2147483648, %v5468_v13  ;;  %vm5600_vm1 = vmor %vm2701_vm15, %vm2702_vm14 }
 0x1c2   :  { %v2700_v60 = vadd.f32 %v5501_v9, %v2699_v2  ;;  %v2383_v36 = vrot.slane %v2382_v59, 2  ;;  %v2003_v16 = vmax.f32 %v2001_v17, %v2002_v38  ;;  %vm2706_vm2 = vcmp.eq.f32.partialorder %v2705_v10, 8.507059e+37 }
 0x1c3   :  { %v2000_v45 = vmax.f32 %v1998_v39, %v1999_v51  ;;  %4151 = vmatmul.msk.f32.gmra.mxu1 %vm1895_vm3, %v3223_v30  ;;  %v2708_v27 = vor.u32 1.1754944e-38, %v2707_v14  ;;  %v1197_v13 = vmul.f32 %v5123_v12, %v715_v43  ;;  %v1511_v23 = vmul.f32 0.125, %v1423_v4  ;;  %v131_v4 = vld [vmem:[%s6920_s3 + $0x58] sm:$0xff] }
 0x1c4   :  { %v2704_v32 = vsel %vm5600_vm1, %v5501_v9, %v2700_v60  ;;  %v5609_v35 = vpop.eup %4254  ;;  %v2384_v24 = vadd.f32 %v2383_v36, %v2382_v59  ;;  %v2004_v54 = vrot.slane %v2003_v16, 2  ;;  %v2712_v6 = vmul.f32 %v5547_v8, %v5510_v25  ;;  %4070 = vmatmul.msk.f32.gmra.mxu3 %vm747_vm7, %v131_v4 }
 0x1c5   :  { %v2190_v5 = vsub.f32 %v5532_v50, %v2000_v45  ;;  %vm1832_vm4 = vcmp.gt.f32.partialorder %v5611_v15, 0.0  ;;  %4256 = vrcp.f32 %v5592_v31  ;;  %v2387_v9 = vsel %vm1895_vm3, %v5609_v35, 0.0  ;;  %4135 = vmatmul.msk.f32.gmra.mxu0 %vm169_vm0, %v1197_v13 }
 0x1c6   :  { %v2709_v12 = vsel %vm2706_vm2, %v2708_v27, %v2704_v32  ;;  %v5622_v19 = vsel %vm1831_vm13, %v1511_v23, -3.4028235e+38  ;;  %v2385_v41 = vrot.slane %v2384_v24, 1  ;;  %v2388_v50 = vrot.slane %v2387_v9, 4  ;;  %v718_v10 = vpop.f32.mrf.mxu2  ;;  %v1426_v59 = vpop.f32.mrf.mxu0 }
 0x1c7   :  { %v2244_v33 = vmul.f32 1.442695, %v2190_v5  ;;  %v2005_v55 = vmax.f32 %v2003_v16, %v2004_v54  ;;  %v3184_v46 = vmul.f32 %v5397_v11, %v2709_v12  ;;  %v2008_v3 = vsel %vm1895_vm3, %v5622_v19, -inf  ;;  %v5646_v16 = vpop.permute.xlu0 %1666 }
 0x1c8   :  { %v2713_v39 = vsub.f32 1.0, %v2712_v6  ;;  %vm2717_vm5 = vweird.f32 %v5547_v8  ;;  %v5629_v42 = vadd.f32 %v2385_v41, %v2384_v24  ;;  %v2389_v17 = vadd.f32 %v2388_v50, %v2387_v9 }
 0x1c9   :  { %4258 = vpow2.f32 %v2244_v33  ;;  %v2006_v2 = vrot.slane %v2005_v55, 1  ;;  %v3224_v51 = vmul.f32 %v3184_v46, %v5216_v58  ;;  %v2009_v38 = vrot.slane %v2008_v3, 4 }
 0x1ca   :  { %v2714_v43 = vmul.f32 %v5547_v8, %v2713_v39  ;;  %v2720_v11 = vand.u32 2147483647, %v5510_v25  ;;  %v2390_v48 = vrot.slane %v2389_v17, 2  ;;  %vm2716_vm6 = vweird.f32 %v5510_v25 }
 0x1cb   :  { %v2007_v30 = vmax.f32 %v2005_v55, %v2006_v2  ;;  %v2722_v60 = vand.u32 2147483648, %v5510_v25  ;;  %v5640_v14 = vpop.eup %4256  ;;  %4260 = vrcp.f32 %v5629_v42  ;;  %4152 = vmatmul.msk.f32.gmra.mxu1 %vm1895_vm3, %v3224_v51  ;;  %v2010_v58 = vmax.f32 %v2008_v3, %v2009_v38  ;;  %vm2718_vm8 = vmor %vm2716_vm6, %vm2717_vm5  ;;  %v132_v38 = vld [vmem:[%s6920_s3 + $0x60] sm:$0xff] }
 0x1cc   :  { %v2715_v36 = vadd.f32 %v5547_v8, %v2714_v43  ;;  %v1198_v45 = vmul.f32 %v5139_v29, %v718_v10  ;;  %v2391_v26 = vadd.f32 %v2390_v48, %v2389_v17  ;;  %v1512_v27 = vmul.f32 0.125, %v1426_v59  ;;  %4071 = vmatmul.msk.f32.gmra.mxu3 %vm747_vm7, %v132_v38 }
 0x1cd   :  { %v2191_v32 = vsub.f32 %v5579_v61, %v2007_v30  ;;  %v2723_v25 = vor.u32 1.1754944e-38, %v2722_v60  ;;  %vm1833_vm9 = vcmp.gt.f32.partialorder %v5646_v16, 0.0  ;;  %v2011_v13 = vrot.slane %v2010_v58, 2 }
 0x1ce   :  { %v2719_v23 = vsel %vm2718_vm8, %v5547_v8, %v2715_v36  ;;  %vm2721_vm10 = vcmp.eq.f32.partialorder %v2720_v11, 8.507059e+37  ;;  %4136 = vmatmul.msk.f32.gmra.mxu0 %vm169_vm0, %v1198_v45  ;;  %v2727_v29 = vmul.f32 %v5581_v37, %v5538_v0  ;;  %v2392_v5 = vrot.slane %v2391_v26, 1  ;;  %v721_v46 = vpop.f32.mrf.mxu2  ;;  %v1429_v3 = vpop.f32.mrf.mxu0 }
 0x1cf   :  { %v5656_v24 = vpop.eup %4258  ;;  %v2246_v61 = vmul.f32 1.442695, %v2191_v32  ;;  %v2724_v54 = vsel %vm2721_vm10, %v2723_v25, %v2719_v23  ;;  %v5660_v6 = vsel %vm1832_vm4, %v1512_v27, -3.4028235e+38  ;;  %v2012_v12 = vmax.f32 %v2010_v58, %v2011_v13  ;;  %v5703_v13 = vpop.permute.xlu1 %1673 }
 0x1d0   :  { %v2394_v9 = vsel %vm1895_vm3, %v5656_v24, 0.0  ;;  %v3185_v8 = vmul.f32 %v5449_v44, %v2724_v54  ;;  %v2015_v41 = vsel %vm1895_vm3, %v5660_v6, -inf  ;;  %v5667_v50 = vadd.f32 %v2392_v5, %v2391_v26 }
 0x1d1   :  { %v2395_v33 = vrot.slane %v2394_v9, 4  ;;  %4262 = vpow2.f32 %v2246_v61  ;;  %v2016_v55 = vrot.slane %v2015_v41, 4  ;;  %v5669_v39 = vpop.eup %4260  ;;  %v2013_v17 = vrot.slane %v2012_v12, 1 }
 0x1d2   :  { %v3225_v2 = vmul.f32 %v3185_v8, %v5274_v7  ;;  %v2728_v10 = vsub.f32 1.0, %v2727_v29  ;;  %vm2731_vm11 = vweird.f32 %v5538_v0  ;;  %vm2732_vm12 = vweird.f32 %v5581_v37 }
 0x1d3   :  { %v2396_v59 = vadd.f32 %v2395_v33, %v2394_v9  ;;  %v2017_v44 = vmax.f32 %v2015_v41, %v2016_v55  ;;  %v2735_v51 = vand.u32 2147483647, %v5538_v0  ;;  %v2014_v43 = vmax.f32 %v2012_v12, %v2013_v17  ;;  %vm2733_vm14 = vmor %vm2731_vm11, %vm2732_vm12 }
 0x1d4   :  { %4153 = vmatmul.msk.f32.gmra.mxu1 %vm1895_vm3, %v3225_v2  ;;  %v2729_v11 = vmul.f32 %v5581_v37, %v2728_v10  ;;  %v2737_v7 = vand.u32 2147483648, %v5538_v0  ;;  %v1199_v4 = vmul.f32 %v5151_v20, %v721_v46  ;;  %4264 = vrcp.f32 %v5667_v50  ;;  %v133_v10 = vld [vmem:[%s6920_s3 + $0x68] sm:$0xff] }
 0x1d5   :  { %v2397_v48 = vrot.slane %v2396_v59, 2  ;;  %v2018_v30 = vrot.slane %v2017_v44, 2  ;;  %v1513_v60 = vmul.f32 0.125, %v1429_v3  ;;  %v2192_v58 = vsub.f32 %v5622_v19, %v2014_v43  ;;  %4072 = vmatmul.msk.f32.gmra.mxu3 %vm747_vm7, %v133_v10  ;;  %v134_v10 = vld [vmem:[%s6920_s3 + $0x70] sm:$0xff] }
 0x1d6   :  { %v2730_v36 = vadd.f32 %v5581_v37, %v2729_v11  ;;  %vm5686_vm13 = vcmp.eq.f32.partialorder %v2735_v51, 8.507059e+37  ;;  %4137 = vmatmul.msk.f32.gmra.mxu0 %vm169_vm0, %v1199_v4  ;;  %v2742_v20 = vmul.f32 %v5640_v14, %v5592_v31  ;;  %v2738_v19 = vor.u32 1.1754944e-38, %v2737_v7  ;;  %v724_v8 = vpop.f32.mrf.mxu2  ;;  %v1432_v41 = vpop.f32.mrf.mxu0 }
 0x1d7   :  { %v5693_v26 = vpop.eup %4262  ;;  %v2398_v32 = vadd.f32 %v2397_v48, %v2396_v59  ;;  %v2019_v25 = vmax.f32 %v2017_v44, %v2018_v30  ;;  %v5701_v27 = vsel %vm1833_vm9, %v1513_v60, -3.4028235e+38  ;;  %v2248_v29 = vmul.f32 1.442695, %v2192_v58  ;;  %v5733_v48 = vpop.permute.xlu2 %1680 }
 0x1d8   :  { %v2401_v23 = vsel %vm1895_vm3, %v5693_v26, 0.0  ;;  %v2734_v5 = vsel %vm2733_vm14, %v5581_v37, %v2730_v36  ;;  %v2022_v61 = vsel %vm1895_vm3, %v5701_v27, -inf  ;;  %vm1834_vm15 = vcmp.gt.f32.partialorder %v5703_v13, 0.0 }
 0x1d9   :  { %v2399_v0 = vrot.slane %v2398_v32, 1  ;;  %v2402_v54 = vrot.slane %v2401_v23, 4  ;;  %v2020_v9 = vrot.slane %v2019_v25, 1  ;;  %v2739_v12 = vsel %vm5686_vm13, %v2738_v19, %v2734_v5 }
 0x1da   :  { %4266 = vpow2.f32 %v2248_v29  ;;  %v3186_v33 = vmul.f32 %v5483_v49, %v2739_v12  ;;  %v2023_v55 = vrot.slane %v2022_v61, 4  ;;  %v2743_v46 = vsub.f32 1.0, %v2742_v20  ;;  %v5714_v3 = vpop.eup %4264 }
 0x1db   :  { %v5716_v37 = vadd.f32 %v2399_v0, %v2398_v32  ;;  %v2403_v17 = vadd.f32 %v2402_v54, %v2401_v23  ;;  %v2021_v2 = vmax.f32 %v2019_v25, %v2020_v9  ;;  %vm2747_vm1 = vweird.f32 %v5640_v14 }
 0x1dc   :  { %v3226_v59 = vmul.f32 %v3186_v33, %v5317_v18  ;;  %v2024_v44 = vmax.f32 %v2022_v61, %v2023_v55  ;;  %v2744_v51 = vmul.f32 %v5640_v14, %v2743_v46  ;;  %v2750_v49 = vand.u32 2147483647, %v5592_v31 }
 0x1dd   :  { %v2404_v38 = vrot.slane %v2403_v17, 2  ;;  %v2193_v43 = vsub.f32 %v5660_v6, %v2021_v2  ;;  %vm2746_vm2 = vweird.f32 %v5592_v31  ;;  %v2752_v11 = vand.u32 2147483648, %v5592_v31  ;;  %4073 = vmatmul.msk.f32.gmra.mxu3 %vm747_vm7, %v134_v10 }
 0x1de   :  { %4268 = vrcp.f32 %v5716_v37  ;;  %4154 = vmatmul.msk.f32.gmra.mxu1 %vm1895_vm3, %v3226_v59  ;;  %v2025_v7 = vrot.slane %v2024_v44, 2  ;;  %v2745_v18 = vadd.f32 %v5640_v14, %v2744_v51  ;;  %v1200_v4 = vmul.f32 %v5153_v47, %v724_v8  ;;  %vm2748_vm4 = vmor %vm2746_vm2, %vm2747_vm1  ;;  %v727_v19 = vpop.f32.mrf.mxu2  ;;  %v1435_v23 = vpop.f32.mrf.mxu0 }
 0x1df   :  { %v2405_v30 = vadd.f32 %v2404_v38, %v2403_v17  ;;  %v2250_v60 = vmul.f32 1.442695, %v2193_v43  ;;  %v2753_v6 = vor.u32 1.1754944e-38, %v2752_v11  ;;  %v1514_v58 = vmul.f32 0.125, %v1432_v41 }
 0x1e0   :  { %v5737_v36 = vpop.eup %4266  ;;  %vm1835_vm5 = vcmp.gt.f32.partialorder %v5733_v48, 0.0  ;;  %v2026_v31 = vmax.f32 %v2024_v44, %v2025_v7  ;;  %v2749_v45 = vsel %vm2748_vm4, %v5640_v14, %v2745_v18  ;;  %vm2751_vm6 = vcmp.eq.f32.partialorder %v2750_v49, 8.507059e+37  ;;  %4138 = vmatmul.msk.f32.gmra.mxu0 %vm169_vm0, %v1200_v4 }
 0x1e1   :  { %v2757_v47 = vmul.f32 %v5669_v39, %v5629_v42  ;;  %v2406_v20 = vrot.slane %v2405_v30, 1  ;;  %v2408_v32 = vsel %vm1895_vm3, %v5737_v36, 0.0  ;;  %4270 = vpow2.f32 %v2250_v60 }
 0x1e2   :  { %v2754_v25 = vsel %vm2751_vm6, %v2753_v6, %v2749_v45  ;;  %v2409_v29 = vrot.slane %v2408_v32, 4  ;;  %v2027_v5 = vrot.slane %v2026_v31, 1  ;;  %v5749_v14 = vsel %vm1834_vm15, %v1514_v58, -3.4028235e+38 }
 0x1e3   :  { %v3187_v61 = vmul.f32 %v5523_v62, %v2754_v25  ;;  %v5751_v0 = vadd.f32 %v2406_v20, %v2405_v30  ;;  %v2029_v54 = vsel %vm1895_vm3, %v5749_v14, -inf  ;;  %v2758_v9 = vsub.f32 1.0, %v2757_v47  ;;  %v469_v62 = vpop.f32.mrf.mxu3  ;;  %v5794_v25 = vpop.permute.xlu0 %1687 }
 0x1e4   :  { %vm2761_vm8 = vweird.f32 %v5629_v42  ;;  %v5756_v12 = vpop.eup %4268  ;;  %v2410_v8 = vadd.f32 %v2409_v29, %v2408_v32  ;;  %v2028_v41 = vmax.f32 %v2026_v31, %v2027_v5  ;;  %v2030_v55 = vrot.slane %v2029_v54, 4 }
 0x1e5   :  { %v3227_v33 = vmul.f32 %v3187_v61, %v5356_v22  ;;  %v2759_v46 = vmul.f32 %v5669_v39, %v2758_v9  ;;  %vm2762_vm9 = vweird.f32 %v5669_v39  ;;  %v2765_v17 = vand.u32 2147483647, %v5629_v42 }
 0x1e6   :  { %v2767_v2 = vand.u32 2147483648, %v5629_v42  ;;  %v2411_v59 = vrot.slane %v2410_v8, 2  ;;  %v2194_v44 = vsub.f32 %v5701_v27, %v2028_v41  ;;  %v2031_v22 = vmax.f32 %v2029_v54, %v2030_v55  ;;  %vm2763_vm11 = vmor %vm2761_vm8, %vm2762_vm9  ;;  %v730_v31 = vpop.f32.mrf.mxu2 }
 0x1e7   :  { %4155 = vmatmul.msk.f32.gmra.mxu1 %vm1895_vm3, %v3227_v33  ;;  %v1201_v51 = vmul.f32 %v5162_v28, %v727_v19  ;;  %v5770_v49 = vpop.eup %4270  ;;  %v2760_v38 = vadd.f32 %v5669_v39, %v2759_v46  ;;  %vm5773_vm10 = vcmp.eq.f32.partialorder %v2765_v17, 8.507059e+37  ;;  %v1515_v7 = vmul.f32 0.125, %v1435_v23  ;;  %v1438_v20 = vpop.f32.mrf.mxu0 }
 0x1e8   :  { %v2768_v11 = vor.u32 1.1754944e-38, %v2767_v2  ;;  %v2412_v18 = vadd.f32 %v2411_v59, %v2410_v8  ;;  %v2415_v27 = vsel %vm1895_vm3, %v5770_v49, 0.0  ;;  %v2252_v4 = vmul.f32 1.442695, %v2194_v44  ;;  %v3840_v44 = vld [vmem:[%s6921_s9 + $0x18] sm:$0xff] }
 0x1e9   :  { %v2032_v30 = vrot.slane %v2031_v22, 2  ;;  %4139 = vmatmul.msk.f32.gmra.mxu0 %vm169_vm0, %v1201_v51  ;;  %v2416_v28 = vrot.slane %v2415_v27, 4  ;;  %v2764_v60 = vsel %vm2763_vm11, %v5669_v39, %v2760_v38  ;;  %v5787_v6 = vsel %vm1835_vm5, %v1515_v7, -3.4028235e+38  ;;  %3945 = vmatpush.msra.mxu2 %v3840_v44 }
 0x1ea   :  { %v2772_v58 = vmul.f32 %v5714_v3, %v5667_v50  ;;  %v2413_v45 = vrot.slane %v2412_v18, 1  ;;  %4272 = vpow2.f32 %v2252_v4  ;;  %v2769_v42 = vsel %vm5773_vm10, %v2768_v11, %v2764_v60 }
 0x1eb   :  { %v2033_v47 = vmax.f32 %v2031_v22, %v2032_v30  ;;  %v1162_v32 = vmul.f32 %v5098_v34, %v469_v62  ;;  %v3188_v39 = vmul.f32 %v5570_v63, %v2769_v42  ;;  %v2036_v19 = vsel %vm1895_vm3, %v5787_v6, -inf  ;;  %v135_v34 = vld [vmem:[%s6920_s3 + $0x78] sm:$0xff]  ;;  %v472_v55 = vpop.f32.mrf.mxu3  ;;  %v5840_v30 = vpop.permute.xlu1 %1694 }
 0x1ec   :  { %v2773_v23 = vsub.f32 1.0, %v2772_v58  ;;  %vm1836_vm12 = vcmp.gt.f32.partialorder %v5794_v25, 0.0  ;;  %v2417_v29 = vadd.f32 %v2416_v28, %v2415_v27  ;;  %v2037_v61 = vrot.slane %v2036_v19, 4  ;;  %4074 = vmatmul.msk.f32.gmra.mxu3 %vm747_vm7, %v135_v34 }
 0x1ed   :  { %v2034_v5 = vrot.slane %v2033_v47, 1  ;;  %4274 = vrcp.f32 %v5751_v0  ;;  %v3228_v54 = vmul.f32 %v3188_v39, %v5391_v40  ;;  %vm2777_vm13 = vweird.f32 %v5714_v3 }
 0x1ee   :  { %v2774_v9 = vmul.f32 %v5714_v3, %v2773_v23  ;;  %v5807_v63 = vadd.f32 %v2413_v45, %v2412_v18  ;;  %v2038_v41 = vmax.f32 %v2036_v19, %v2037_v61  ;;  %v2780_v33 = vand.u32 2147483647, %v5667_v50  ;;  %v733_v58 = vpop.f32.mrf.mxu2  ;;  %v136_v23 = vld [vmem:[%s6920_s3 + $0x80] sm:$0xff] }
 0x1ef   :  { %v2035_v8 = vmax.f32 %v2033_v47, %v2034_v5  ;;  %4156 = vmatmul.msk.f32.gmra.mxu1 %vm1895_vm3, %v3228_v54  ;;  %vm2776_vm14 = vweird.f32 %v5667_v50  ;;  %v2782_v62 = vand.u32 2147483648, %v5667_v50  ;;  %v1202_v46 = vmul.f32 %v1162_v32, %v730_v31  ;;  %v1441_v47 = vpop.f32.mrf.mxu0 }
 0x1f0   :  { %v2775_v40 = vadd.f32 %v5714_v3, %v2774_v9  ;;  %v5815_v17 = vpop.eup %4272  ;;  %v2418_v2 = vrot.slane %v2417_v29, 2  ;;  %v2039_v59 = vrot.slane %v2038_v41, 2  ;;  %vm5823_vm15 = vmor %vm2776_vm14, %vm2777_vm13  ;;  %v1516_v51 = vmul.f32 0.125, %v1438_v20 }
 0x1f1   :  { %v2195_v10 = vsub.f32 %v5749_v14, %v2035_v8  ;;  %v2422_v50 = vsel %vm1895_vm3, %v5815_v17, 0.0  ;;  %vm2781_vm1 = vcmp.eq.f32.partialorder %v2780_v33, 8.507059e+37  ;;  %v2783_v38 = vor.u32 1.1754944e-38, %v2782_v62  ;;  %4140 = vmatmul.msk.f32.gmra.mxu0 %vm169_vm0, %v1202_v46 }
 0x1f2   :  { %v2779_v14 = vsel %vm5823_vm15, %v5714_v3, %v2775_v40  ;;  %v2423_v43 = vrot.slane %v2422_v50, 4  ;;  %v2040_v7 = vmax.f32 %v2038_v41, %v2039_v59  ;;  %v5835_v18 = vsel %vm1836_vm12, %v1516_v51, -3.4028235e+38 }
 0x1f3   :  { %v2254_v11 = vmul.f32 1.442695, %v2195_v10  ;;  %v5837_v27 = vpop.eup %4274  ;;  %v1163_v4 = vmul.f32 %v5112_v56, %v472_v55  ;;  %v2784_v28 = vsel %vm2781_vm1, %v2783_v38, %v2779_v14  ;;  %v2043_v3 = vsel %vm1895_vm3, %v5835_v18, -inf  ;;  %v475_v34 = vpop.f32.mrf.mxu3 }
 0x1f4   :  { %v2787_v60 = vmul.f32 %v5756_v12, %v5716_v37  ;;  %vm1837_vm2 = vcmp.gt.f32.partialorder %v5840_v30, 0.0  ;;  %v2041_v31 = vrot.slane %v2040_v7, 1  ;;  %v3189_v45 = vmul.f32 %v5609_v35, %v2784_v28  ;;  %4075 = vmatmul.msk.f32.gmra.mxu3 %vm747_vm7, %v136_v23  ;;  %v5881_v10 = vpop.permute.xlu2 %1701 }
 0x1f5   :  { %4276 = vpow2.f32 %v2254_v11  ;;  %v2424_v56 = vadd.f32 %v2423_v43, %v2422_v50  ;;  %v2044_v42 = vrot.slane %v2043_v3, 4  ;;  %v5849_v32 = vadd.f32 %v2418_v2, %v2417_v29 }
 0x1f6   :  { %4278 = vrcp.f32 %v5807_v63  ;;  %v2788_v20 = vsub.f32 1.0, %v2787_v60  ;;  %v2042_v39 = vmax.f32 %v2040_v7, %v2041_v31  ;;  %v3229_v19 = vmul.f32 %v3189_v45, %v5438_v1 }
 0x1f7   :  { %vm2792_vm4 = vweird.f32 %v5756_v12  ;;  %v2045_v5 = vmax.f32 %v2043_v3, %v2044_v42  ;;  %v2795_v61 = vand.u32 2147483647, %v5716_v37  ;;  %v2797_v54 = vand.u32 2147483648, %v5716_v37  ;;  %v1444_v60 = vpop.f32.mrf.mxu0 }
 0x1f8   :  { %v2789_v35 = vmul.f32 %v5756_v12, %v2788_v20  ;;  %v2196_v29 = vsub.f32 %v5787_v6, %v2042_v39  ;;  %4157 = vmatmul.msk.f32.gmra.mxu1 %vm1895_vm3, %v3229_v19  ;;  %vm2791_vm5 = vweird.f32 %v5716_v37  ;;  %v1203_v1 = vmul.f32 %v1163_v4, %v733_v58  ;;  %v736_v4 = vpop.f32.mrf.mxu2 }
 0x1f9   :  { %v1517_v9 = vmul.f32 0.125, %v1441_v47  ;;  %v2425_v8 = vrot.slane %v2424_v56, 2  ;;  %v2046_v41 = vrot.slane %v2045_v5, 2  ;;  %vm5864_vm6 = vcmp.eq.f32.partialorder %v2795_v61, 8.507059e+37  ;;  %vm2793_vm8 = vmor %vm2791_vm5, %vm2792_vm4 }
 0x1fa   :  { %v2790_v33 = vadd.f32 %v5756_v12, %v2789_v35  ;;  %v2256_v62 = vmul.f32 1.442695, %v2196_v29  ;;  %v2798_v6 = vor.u32 1.1754944e-38, %v2797_v54  ;;  %4141 = vmatmul.msk.f32.gmra.mxu0 %vm169_vm0, %v1203_v1  ;;  %v2802_v46 = vmul.f32 %v5837_v27, %v5751_v0 }
 0x1fb   :  { %v5868_v40 = vpop.eup %4276  ;;  %v5874_v37 = vsel %vm1837_vm2, %v1517_v9, -3.4028235e+38  ;;  %v2047_v44 = vmax.f32 %v2045_v5, %v2046_v41  ;;  %v1164_v50 = vmul.f32 %v5114_v57, %v475_v34  ;;  %vm1838_vm9 = vcmp.gt.f32.partialorder %v5881_v10, 0.0  ;;  %v885_v23 = vpop.f32.mrf.mxu3 }
 0x1fc   :  { %v5879_v2 = vpop.eup %4278  ;;  %v2429_v59 = vsel %vm1895_vm3, %v5868_v40, 0.0  ;;  %v2794_v22 = vsel %vm2793_vm8, %v5756_v12, %v2790_v33  ;;  %v2050_v51 = vsel %vm1895_vm3, %v5874_v37, -inf  ;;  %4280 = vpow2.f32 %v2256_v62 }
 0x1fd   :  { %v2799_v14 = vsel %vm5864_vm6, %v2798_v6, %v2794_v22  ;;  %v2048_v38 = vrot.slane %v2047_v44, 1  ;;  %v2051_v11 = vrot.slane %v2050_v51, 4  ;;  %v2803_v7 = vsub.f32 1.0, %v2802_v46 }
 0x1fe   :  { %v3190_v43 = vmul.f32 %v5656_v24, %v2799_v14  ;;  %v2420_v28 = vrot.slane %v5849_v32, 1  ;;  %v2426_v12 = vadd.f32 %v2425_v8, %v2424_v56  ;;  %v2430_v3 = vrot.slane %v2429_v59, 4 }
 0x1ff   :  { %vm2807_vm10 = vweird.f32 %v5837_v27  ;;  %v2049_v57 = vmax.f32 %v2047_v44, %v2048_v38  ;;  %v2052_v31 = vmax.f32 %v2050_v51, %v2051_v11  ;;  %v2804_v45 = vmul.f32 %v5837_v27, %v2803_v7  ;;  %v5925_v44 = vpop.permute.xlu0 %1708 }
 0x200   :  { %v3230_v58 = vmul.f32 %v3190_v43, %v5485_v53  ;;  %vm2806_vm11 = vweird.f32 %v5751_v0  ;;  %v2810_v24 = vand.u32 2147483647, %v5751_v0  ;;  %v2812_v47 = vand.u32 2147483648, %v5751_v0  ;;  %v3397_v53 = vpop.f32.mrf.mxu1 }
 0x201   :  { %v1204_v42 = vmul.f32 %v1164_v50, %v736_v4  ;;  %v2197_v20 = vsub.f32 %v5835_v18, %v2049_v57  ;;  %v2053_v56 = vrot.slane %v2052_v31, 2  ;;  %v2805_v39 = vadd.f32 %v5837_v27, %v2804_v45  ;;  %vm2808_vm12 = vmor %vm2806_vm11, %vm2807_vm10  ;;  %v137_v18 = vld [vmem:[%s6920_s3 + $0x88] sm:$0xff] }
 0x202   :  { %4158 = vmatmul.msk.f32.gmra.mxu1 %vm1895_vm3, %v3230_v58  ;;  %v1518_v19 = vmul.f32 0.125, %v1444_v60  ;;  %v5903_v5 = vpop.eup %4280  ;;  %v5906_v35 = vadd.f32 %v2420_v28, %v5849_v32  ;;  %v2427_v61 = vrot.slane %v2426_v12, 1  ;;  %vm2811_vm13 = vcmp.eq.f32.partialorder %v2810_v24, 8.507059e+37  ;;  %4076 = vmatmul.msk.f32.gmra.mxu3 %vm747_vm7, %v137_v18 }
 0x203   :  { %v2813_v0 = vor.u32 1.1754944e-38, %v2812_v47  ;;  %4142 = vmatmul.msk.f32.gmra.mxu0 %vm169_vm0, %v1204_v42  ;;  %v2436_v54 = vsel %vm1895_vm3, %v5903_v5, 0.0  ;;  %v2258_v29 = vmul.f32 1.442695, %v2197_v20  ;;  %v2054_v1 = vmax.f32 %v2052_v31, %v2053_v56  ;;  %v888_v42 = vpop.f32.mrf.mxu3  ;;  %v138_v56 = vld [vmem:[%s6920_s3 + $0x90] sm:$0xff] }
 0x204   :  { %v2809_v32 = vsel %vm2808_vm12, %v5837_v27, %v2805_v39  ;;  %v2431_v9 = vadd.f32 %v2430_v3, %v2429_v59  ;;  %v5920_v8 = vsel %vm1838_vm9, %v1518_v19, -3.4028235e+38  ;;  %v3517_v41 = vmul.f32 %v3397_v53, %v885_v23 }
 0x205   :  { %v2814_v34 = vsel %vm2811_vm13, %v2813_v0, %v2809_v32  ;;  %4282 = vpow2.f32 %v2258_v29  ;;  %v2055_v33 = vrot.slane %v2054_v1, 1  ;;  %v2057_v62 = vsel %vm1895_vm3, %v5920_v8, -inf }
 0x206   :  { %v3191_v55 = vmul.f32 %v5693_v26, %v2814_v34  ;;  %v2437_v6 = vrot.slane %v2436_v54, 4  ;;  %v2058_v46 = vrot.slane %v2057_v62, 4  ;;  %v2817_v22 = vmul.f32 %v5879_v2, %v5807_v63  ;;  %v1447_v26 = vpop.f32.mrf.mxu0 }
 0x207   :  { %v2056_v27 = vmax.f32 %v2054_v1, %v2055_v33  ;;  %vm1839_vm14 = vcmp.gt.f32.partialorder %v5925_v44, 0.0  ;;  %4284 = vrcp.f32 %v5906_v35  ;;  %v2432_v51 = vrot.slane %v2431_v9, 2 }
 0x208   :  { %v3231_v59 = vmul.f32 %v3191_v55, %v5536_v52  ;;  %v2059_v50 = vmax.f32 %v2057_v62, %v2058_v46  ;;  %v5932_v14 = vadd.f32 %v2427_v61, %v2426_v12  ;;  %v3557_v43 = vsel %vm169_vm0, %v3517_v41, 0.0  ;;  %v3400_v20 = vpop.f32.mrf.mxu1  ;;  %v5969_v46 = vpop.permute.xlu1 %1715 }
 0x209   :  { %v2198_v38 = vsub.f32 %v5874_v37, %v2056_v27  ;;  %v2818_v11 = vsub.f32 1.0, %v2817_v22  ;;  %v2438_v52 = vadd.f32 %v2437_v6, %v2436_v54  ;;  %vm2822_vm15 = vweird.f32 %v5879_v2 }
 0x20a   :  { %4159 = vmatmul.msk.f32.gmra.mxu1 %vm1895_vm3, %v3231_v59  ;;  %v2060_v7 = vrot.slane %v2059_v50, 2  ;;  %v2827_v4 = vand.u32 2147483648, %v5807_v63  ;;  %v2825_v12 = vand.u32 2147483647, %v5807_v63  ;;  %v1519_v57 = vmul.f32 0.125, %v1447_v26  ;;  %4077 = vmatmul.msk.f32.gmra.mxu3 %vm747_vm7, %v138_v56 }
 0x20b   :  { %v5939_v28 = vpop.eup %4282  ;;  %v2260_v3 = vmul.f32 1.442695, %v2198_v38  ;;  %v2819_v60 = vmul.f32 %v5879_v2, %v2818_v11  ;;  %v2433_v37 = vadd.f32 %v2432_v51, %v2431_v9  ;;  %v3558_v45 = vrot.slane %v3557_v43, 4 }
 0x20c   :  { %v2443_v58 = vsel %vm1895_vm3, %v5939_v28, 0.0  ;;  %v2061_v31 = vmax.f32 %v2059_v50, %v2060_v7  ;;  %vm2821_vm1 = vweird.f32 %v5807_v63  ;;  %v2439_v19 = vrot.slane %v2438_v52, 2 }
 0x20d   :  { %v2444_v24 = vrot.slane %v2443_v58, 4  ;;  %4286 = vpow2.f32 %v2260_v3  ;;  %v2820_v47 = vadd.f32 %v5879_v2, %v2819_v60  ;;  %v5950_v39 = vpop.eup %4284  ;;  %vm2823_vm2 = vmor %vm2821_vm1, %vm2822_vm15  ;;  %v2828_v53 = vor.u32 1.1754944e-38, %v2827_v4 }
 0x20e   :  { %v2062_v23 = vrot.slane %v2061_v31, 1  ;;  %v5956_v61 = vsel %vm1839_vm14, %v1519_v57, -3.4028235e+38  ;;  %4288 = vrcp.f32 %v5932_v14  ;;  %vm2826_vm4 = vcmp.eq.f32.partialorder %v2825_v12, 8.507059e+37  ;;  %v1450_v11 = vpop.f32.mrf.mxu0  ;;  %v891_v12 = vpop.f32.mrf.mxu3 }
 0x20f   :  { %v2824_v63 = vsel %vm2823_vm2, %v5879_v2, %v2820_v47  ;;  %v2064_v0 = vsel %vm1895_vm3, %v5956_v61, -inf  ;;  %v3559_v54 = vadd.f32 %v3558_v45, %v3557_v43  ;;  %v2434_v32 = vrot.slane %v2433_v37, 1 }
 0x210   :  { %v2063_v18 = vmax.f32 %v2061_v31, %v2062_v23  ;;  %v2829_v29 = vsel %vm2826_vm4, %v2828_v53, %v2824_v63  ;;  %v2065_v1 = vrot.slane %v2064_v0, 4  ;;  %v2445_v9 = vadd.f32 %v2444_v24, %v2443_v58  ;;  %v3403_v57 = vpop.f32.mrf.mxu1 }
 0x211   :  { %v3192_v34 = vmul.f32 %v5737_v36, %v2829_v29  ;;  %v3518_v41 = vmul.f32 %v3400_v20, %v888_v42  ;;  %v2440_v33 = vadd.f32 %v2439_v19, %v2438_v52  ;;  %v2832_v2 = vmul.f32 %v5950_v39, %v5906_v35  ;;  %v139_v20 = vld [vmem:[%s6920_s3 + $0x98] sm:$0xff] }
 0x212   :  { %v2199_v55 = vsub.f32 %v5920_v8, %v2063_v18  ;;  %v2066_v62 = vmax.f32 %v2064_v0, %v2065_v1  ;;  %vm1840_vm5 = vcmp.gt.f32.partialorder %v5969_v46, 0.0  ;;  %v3560_v36 = vrot.slane %v3559_v54, 2  ;;  %4078 = vmatmul.msk.f32.gmra.mxu3 %vm747_vm7, %v139_v20 }
 0x213   :  { %v5967_v6 = vpop.eup %4286  ;;  %v3232_v27 = vmul.f32 %v3192_v34, %v5566_v21  ;;  %v3564_v59 = vsel %vm169_vm0, %v3518_v41, 0.0  ;;  %v2446_v8 = vrot.slane %v2445_v9, 2  ;;  %v2833_v43 = vsub.f32 1.0, %v2832_v2 }
 0x214   :  { %v2262_v22 = vmul.f32 1.442695, %v2199_v55  ;;  %v2067_v51 = vrot.slane %v2066_v62, 2  ;;  %v5974_v50 = vpop.eup %4288  ;;  %v2450_v26 = vsel %vm1895_vm3, %v5967_v6, 0.0  ;;  %v3565_v38 = vrot.slane %v3564_v59, 4  ;;  %v6011_v55 = vpop.permute.xlu2 %1722 }
 0x215   :  { %4160 = vmatmul.msk.f32.gmra.mxu1 %vm1895_vm3, %v3232_v27  ;;  %v5979_v52 = vadd.f32 %v2434_v32, %v2433_v37  ;;  %v2441_v21 = vrot.slane %v2440_v33, 1  ;;  %v2834_v4 = vmul.f32 %v5950_v39, %v2833_v43  ;;  %vm2837_vm6 = vweird.f32 %v5950_v39 }
 0x216   :  { %4290 = vpow2.f32 %v2262_v22  ;;  %v2068_v7 = vmax.f32 %v2066_v62, %v2067_v51  ;;  %v2840_v3 = vand.u32 2147483647, %v5906_v35  ;;  %v2842_v60 = vand.u32 2147483648, %v5906_v35  ;;  %v1453_v43 = vpop.f32.mrf.mxu0 }
 0x217   :  { %v2451_v58 = vrot.slane %v2450_v26, 4  ;;  %v5985_v31 = vadd.f32 %v3560_v36, %v3559_v54  ;;  %v1520_v24 = vmul.f32 0.125, %v1450_v11  ;;  %v2447_v37 = vadd.f32 %v2446_v8, %v2445_v9 }
 0x218   :  { %v2069_v45 = vrot.slane %v2068_v7, 1  ;;  %v3566_v47 = vadd.f32 %v3565_v38, %v3564_v59  ;;  %v2835_v42 = vadd.f32 %v5950_v39, %v2834_v4  ;;  %vm2836_vm8 = vweird.f32 %v5906_v35 }
 0x219   :  { %vm2838_vm9 = vmor %vm2836_vm8, %vm2837_vm6  ;;  %v2843_v19 = vor.u32 1.1754944e-38, %v2842_v60  ;;  %v5996_v23 = vsel %vm1840_vm5, %v1520_v24, -3.4028235e+38  ;;  %v3519_v53 = vmul.f32 %v3403_v57, %v891_v12  ;;  %vm2841_vm10 = vcmp.eq.f32.partialorder %v2840_v3, 8.507059e+37  ;;  %v894_v3 = vpop.f32.mrf.mxu3  ;;  %v3406_v60 = vpop.f32.mrf.mxu1 }
 0x21a   :  { %v2070_v56 = vmax.f32 %v2068_v7, %v2069_v45  ;;  %v2839_v63 = vsel %vm2838_vm9, %v5950_v39, %v2835_v42  ;;  %v2071_v35 = vsel %vm1895_vm3, %v5996_v23, -inf  ;;  %v2847_v0 = vmul.f32 %v5974_v50, %v5932_v14 }
 0x21b   :  { %v2452_v54 = vadd.f32 %v2451_v58, %v2450_v26  ;;  %v2844_v1 = vsel %vm2841_vm10, %v2843_v19, %v2839_v63  ;;  %v2072_v32 = vrot.slane %v2071_v35, 4  ;;  %v3567_v34 = vrot.slane %v3566_v47, 2  ;;  %v6044_v63 = vpop.permute.xlu0 %1729 }
 0x21c   :  { %v6004_v18 = vpop.eup %4290  ;;  %v2200_v29 = vsub.f32 %v5956_v61, %v2070_v56  ;;  %v3193_v39 = vmul.f32 %v5770_v49, %v2844_v1  ;;  %v3571_v41 = vsel %vm169_vm0, %v3519_v53, 0.0  ;;  %v6013_v62 = vadd.f32 %v2441_v21, %v2440_v33 }
 0x21d   :  { %v2457_v9 = vsel %vm1895_vm3, %v6004_v18, 0.0  ;;  %v2073_v59 = vmax.f32 %v2071_v35, %v2072_v32  ;;  %vm1841_vm11 = vcmp.gt.f32.partialorder %v6011_v55, 0.0  ;;  %4292 = vrcp.f32 %v5979_v52 }
 0x21e   :  { %v2458_v2 = vrot.slane %v2457_v9, 4  ;;  %v2264_v27 = vmul.f32 1.442695, %v2200_v29  ;;  %v3233_v61 = vmul.f32 %v3193_v39, %v5611_v15  ;;  %v2848_v22 = vsub.f32 1.0, %v2847_v0 }
 0x21f   :  { %v2453_v36 = vrot.slane %v2452_v54, 2  ;;  %v2074_v51 = vrot.slane %v2073_v59, 2  ;;  %v3572_v49 = vrot.slane %v3571_v41, 4  ;;  %v2448_v8 = vrot.slane %v2447_v37, 1 }
 0x220   :  { %4294 = vpow2.f32 %v2264_v27  ;;  %v3562_v26 = vrot.slane %v5985_v31, 1  ;;  %v3568_v38 = vadd.f32 %v3567_v34, %v3566_v47  ;;  %4161 = vmatmul.msk.f32.gmra.mxu1 %vm1895_vm3, %v3233_v61  ;;  %v2849_v33 = vmul.f32 %v5974_v50, %v2848_v22  ;;  %v140_v47 = vld [vmem:[%s6920_s3 + $0xa0] sm:$0xff] }
 0x221   :  { %4296 = vrcp.f32 %v6013_v62  ;;  %v2459_v11 = vadd.f32 %v2458_v2, %v2457_v9  ;;  %v2075_v21 = vmax.f32 %v2073_v59, %v2074_v51  ;;  %vm2852_vm12 = vweird.f32 %v5974_v50  ;;  %4079 = vmatmul.msk.f32.gmra.mxu3 %vm747_vm7, %v140_v47 }
 0x222   :  { %v2850_v15 = vadd.f32 %v5974_v50, %v2849_v33  ;;  %vm2851_vm13 = vweird.f32 %v5932_v14  ;;  %v2855_v7 = vand.u32 2147483647, %v5932_v14  ;;  %v2857_v4 = vand.u32 2147483648, %v5932_v14  ;;  %v1456_v33 = vpop.f32.mrf.mxu0 }
 0x223   :  { %v2454_v12 = vadd.f32 %v2453_v36, %v2452_v54  ;;  %v2076_v57 = vrot.slane %v2075_v21, 1  ;;  %v3573_v58 = vadd.f32 %v3572_v49, %v3571_v41  ;;  %vm6027_vm14 = vmor %vm2851_vm13, %vm2852_vm12  ;;  %v1521_v24 = vmul.f32 0.125, %v1453_v43  ;;  %v6034_v42 = vpop.eup %4292 }
 0x224   :  { %v6036_v20 = vadd.f32 %v2448_v8, %v2447_v37  ;;  %v3569_v56 = vrot.slane %v3568_v38, 1  ;;  %v2854_v14 = vsel %vm6027_vm14, %v5974_v50, %v2850_v15  ;;  %v2858_v19 = vor.u32 1.1754944e-38, %v2857_v4 }
 0x225   :  { %v2077_v35 = vmax.f32 %v2075_v21, %v2076_v57  ;;  %vm2856_vm15 = vcmp.eq.f32.partialorder %v2855_v7, 8.507059e+37  ;;  %v6048_v0 = vsel %vm1841_vm11, %v1521_v24, -3.4028235e+38  ;;  %v3520_v37 = vmul.f32 %v3406_v60, %v894_v3  ;;  %v3409_v7 = vpop.f32.mrf.mxu1 }
 0x226   :  { %v6042_v53 = vpop.eup %4294  ;;  %vm1842_vm1 = vcmp.gt.f32.partialorder %v6044_v63, 0.0  ;;  %v2460_v54 = vrot.slane %v2459_v11, 2  ;;  %v2859_v29 = vsel %vm2856_vm15, %v2858_v19, %v2854_v14  ;;  %v2078_v1 = vsel %vm1895_vm3, %v6048_v0, -inf }
 0x227   :  { %v2464_v50 = vsel %vm1895_vm3, %v6042_v53, 0.0  ;;  %v6055_v32 = vpop.eup %4296  ;;  %v2455_v9 = vrot.slane %v2454_v12, 1  ;;  %v2201_v34 = vsub.f32 %v5996_v23, %v2077_v35  ;;  %v3574_v39 = vrot.slane %v3573_v58, 2 }
 0x228   :  { %v3194_v41 = vmul.f32 %v5815_v17, %v2859_v29  ;;  %v3563_v2 = vadd.f32 %v3562_v26, %v5985_v31  ;;  %vm3881_vm2 = vcmask 1041409   ;;  %v2079_v27 = vrot.slane %v2078_v1, 4 }
 0x229   :  { %v2862_v59 = vmul.f32 %v6034_v42, %v5979_v52  ;;  %v2465_v61 = vrot.slane %v2464_v50, 4  ;;  %v2266_v22 = vmul.f32 1.442695, %v2201_v34  ;;  %v3578_v51 = vsel %vm169_vm0, %v3520_v37, 0.0 }
 0x22a   :  { %v3234_v36 = vmul.f32 %v3194_v41, %v5646_v16  ;;  %4298 = vrcp.f32 %v6036_v20  ;;  %v2461_v49 = vadd.f32 %v2460_v54, %v2459_v11  ;;  %v2080_v23 = vmax.f32 %v2078_v1, %v2079_v27  ;;  %v897_v16 = vpop.f32.mrf.mxu3 }
 0x22b   :  { %v2863_v8 = vsub.f32 1.0, %v2862_v59  ;;  %v6065_v17 = vadd.f32 %v2455_v9, %v2454_v12  ;;  %v3570_v31 = vadd.f32 %v3569_v56, %v3568_v38  ;;  %4300 = vpow2.f32 %v2266_v22 }
 0x22c   :  { %v3575_v26 = vadd.f32 %v3574_v39, %v3573_v58  ;;  %4162 = vmatmul.msk.f32.gmra.mxu1 %vm1895_vm3, %v3234_v36  ;;  %v2081_v43 = vrot.slane %v2080_v23, 2  ;;  %v3579_v21 = vrot.slane %v3578_v51, 4  ;;  %vm2867_vm4 = vweird.f32 %v6034_v42  ;;  %v141_v58 = vld [vmem:[%s6920_s3 + $0xa8] sm:$0xff] }
 0x22d   :  { %v2864_v15 = vmul.f32 %v6034_v42, %v2863_v8  ;;  %v2466_v4 = vadd.f32 %v2465_v61, %v2464_v50  ;;  %v2870_v11 = vand.u32 2147483647, %v5979_v52  ;;  %v2872_v3 = vand.u32 2147483648, %v5979_v52  ;;  %4080 = vmatmul.msk.f32.gmra.mxu3 %vm747_vm7, %v141_v58  ;;  %v142_v58 = vld [vmem:[%s6920_s3 + $0xb0] sm:$0xff] }
 0x22e   :  { %v1522_v60 = vmul.f32 0.125, %v1456_v33  ;;  %v2462_v12 = vrot.slane %v2461_v49, 1  ;;  %v2082_v38 = vmax.f32 %v2080_v23, %v2081_v43  ;;  %vm2866_vm5 = vweird.f32 %v5979_v52  ;;  %v6088_v52 = vpop.permute.xlu1 %1736 }
 0x22f   :  { %v2865_v57 = vadd.f32 %v6034_v42, %v2864_v15  ;;  %v3576_v45 = vrot.slane %v3575_v26, 1  ;;  %vm6077_vm6 = vmor %vm2866_vm5, %vm2867_vm4  ;;  %v2873_v47 = vor.u32 1.1754944e-38, %v2872_v3  ;;  %v3521_v14 = vmul.f32 %v3409_v7, %v897_v16  ;;  %v3412_v15 = vpop.f32.mrf.mxu1 }
 0x230   :  { %v6083_v56 = vsel %vm1842_vm1, %v1522_v60, -3.4028235e+38  ;;  %v6086_v19 = vpop.eup %4298  ;;  %v2083_v35 = vrot.slane %v2082_v38, 1  ;;  %vm2871_vm8 = vcmp.eq.f32.partialorder %v2870_v11, 8.507059e+37  ;;  %vm1843_vm9 = vcmp.gt.f32.partialorder %v6088_v52, 0.0 }
 0x231   :  { %v2869_v37 = vsel %vm6077_vm6, %v6034_v42, %v2865_v57  ;;  %v2085_v54 = vsel %vm1895_vm3, %v6083_v56, -inf  ;;  %v6095_v50 = vpop.eup %4300  ;;  %v2467_v29 = vrot.slane %v2466_v4, 2  ;;  %v3580_v1 = vadd.f32 %v3579_v21, %v3578_v51 }
 0x232   :  { %v2874_v9 = vsel %vm2871_vm8, %v2873_v47, %v2869_v37  ;;  %v2086_v34 = vrot.slane %v2085_v54, 4  ;;  %v6098_v39 = vadd.f32 %v2462_v12, %v2461_v49  ;;  %v2471_v41 = vsel %vm1895_vm3, %v6095_v50, 0.0 }
 0x233   :  { %v2084_v27 = vmax.f32 %v2082_v38, %v2083_v35  ;;  %v3195_v42 = vmul.f32 %v5868_v40, %v2874_v9  ;;  %4302 = vrcp.f32 %v6065_v17  ;;  %v3882_v59 = vsel %vm3881_vm2, %v3570_v31, %v3563_v2  ;;  %v1459_v40 = vpop.f32.mrf.mxu0 }
 0x234   :  { %vm3883_vm10 = vcmask 1042434   ;;  %v2087_v61 = vmax.f32 %v2085_v54, %v2086_v34  ;;  %v3585_v51 = vsel %vm169_vm0, %v3521_v14, 0.0  ;;  %v2877_v49 = vmul.f32 %v6055_v32, %v6013_v62  ;;  %v6128_v14 = vpop.permute.xlu2 %1743 }
 0x235   :  { %v2202_v22 = vsub.f32 %v6048_v0, %v2084_v27  ;;  %v3235_v36 = vmul.f32 %v3195_v42, %v5703_v13  ;;  %v2468_v23 = vadd.f32 %v2467_v29, %v2466_v4  ;;  %v2472_v8 = vrot.slane %v2471_v41, 4  ;;  %v900_v0 = vpop.f32.mrf.mxu3  ;;  %4081 = vmatmul.msk.f32.gmra.mxu3 %vm747_vm7, %v142_v58 }
 0x236   :  { %v3581_v33 = vrot.slane %v3580_v1, 2  ;;  %v2088_v43 = vrot.slane %v2087_v61, 2  ;;  %4304 = vrcp.f32 %v6098_v39  ;;  %v3577_v21 = vadd.f32 %v3576_v45, %v3575_v26 }
 0x237   :  { %v2268_v2 = vmul.f32 1.442695, %v2202_v22  ;;  %4163 = vmatmul.msk.f32.gmra.mxu1 %vm1895_vm3, %v3235_v36  ;;  %v2878_v31 = vsub.f32 1.0, %v2877_v49  ;;  %v3586_v16 = vrot.slane %v3585_v51, 4  ;;  %vm2882_vm11 = vweird.f32 %v6055_v32 }
 0x238   :  { %v2089_v13 = vmax.f32 %v2087_v61, %v2088_v43  ;;  %v2885_v7 = vand.u32 2147483647, %v6013_v62  ;;  %v2887_v11 = vand.u32 2147483648, %v6013_v62  ;;  %v1523_v3 = vmul.f32 0.125, %v1459_v40 }
 0x239   :  { %4306 = vpow2.f32 %v2268_v2  ;;  %v2879_v4 = vmul.f32 %v6055_v32, %v2878_v31  ;;  %v6116_v60 = vpop.eup %4302  ;;  %v2469_v26 = vrot.slane %v2468_v23, 1  ;;  %v2473_v12 = vadd.f32 %v2472_v8, %v2471_v41 }
 0x23a   :  { %v3582_v38 = vadd.f32 %v3581_v33, %v3580_v1  ;;  %v2090_v57 = vrot.slane %v2089_v13, 1  ;;  %vm2881_vm12 = vweird.f32 %v6013_v62  ;;  %v6125_v24 = vsel %vm1843_vm9, %v1523_v3, -3.4028235e+38 }
 0x23b   :  { %v2880_v45 = vadd.f32 %v6055_v32, %v2879_v4  ;;  %v3522_v47 = vmul.f32 %v3412_v15, %v900_v0  ;;  %v3587_v37 = vadd.f32 %v3586_v16, %v3585_v51  ;;  %vm2883_vm13 = vmor %vm2881_vm12, %vm2882_vm11  ;;  %v2888_v54 = vor.u32 1.1754944e-38, %v2887_v11 }
 0x23c   :  { %v2091_v35 = vmax.f32 %v2089_v13, %v2090_v57  ;;  %v2092_v29 = vsel %vm1895_vm3, %v6125_v24, -inf  ;;  %v6134_v1 = vpop.eup %4304  ;;  %vm1844_vm14 = vcmp.gt.f32.partialorder %v6128_v14, 0.0  ;;  %vm2886_vm15 = vcmp.eq.f32.partialorder %v2885_v7, 8.507059e+37 }
 0x23d   :  { %v2884_v62 = vsel %vm2883_vm13, %v6055_v32, %v2880_v45  ;;  %v2093_v9 = vrot.slane %v2092_v29, 4  ;;  %v2892_v34 = vmul.f32 %v6086_v19, %v6036_v20  ;;  %v2474_v41 = vrot.slane %v2473_v12, 2  ;;  %v903_v13 = vpop.f32.mrf.mxu3 }
 0x23e   :  { %v2203_v27 = vsub.f32 %v6083_v56, %v2091_v35  ;;  %v2889_v42 = vsel %vm2886_vm15, %v2888_v54, %v2884_v62  ;;  %v3592_v61 = vsel %vm169_vm0, %v3522_v47, 0.0  ;;  %v3884_v36 = vsel %vm3883_vm10, %v3577_v21, %v3882_v59  ;;  %v1462_v56 = vpop.f32.mrf.mxu0  ;;  %v3415_v59 = vpop.f32.mrf.mxu1  ;;  %v143_v47 = vld [vmem:[%s6920_s3 + $0xb8] sm:$0xff] }
 0x23f   :  { %v6142_v22 = vpop.eup %4306  ;;  %v3196_v51 = vmul.f32 %v5903_v5, %v2889_v42  ;;  %v2094_v49 = vmax.f32 %v2092_v29, %v2093_v9  ;;  %v2893_v8 = vsub.f32 1.0, %v2892_v34  ;;  %v6146_v32 = vadd.f32 %v2469_v26, %v2468_v23  ;;  %4082 = vmatmul.msk.f32.gmra.mxu3 %vm747_vm7, %v143_v47 }
 0x240   :  { %v2478_v33 = vsel %vm1895_vm3, %v6142_v22, 0.0  ;;  %v3583_v43 = vrot.slane %v3582_v38, 1  ;;  %vm3885_vm1 = vcmask 1043459   ;;  %v2270_v40 = vmul.f32 1.442695, %v2203_v27 }
 0x241   :  { %v3588_v2 = vrot.slane %v3587_v37, 2  ;;  %v3236_v31 = vmul.f32 %v3196_v51, %v5733_v48  ;;  %v2095_v0 = vrot.slane %v2094_v49, 2  ;;  %v3593_v15 = vrot.slane %v3592_v61, 4 }
 0x242   :  { %v2475_v21 = vadd.f32 %v2474_v41, %v2473_v12  ;;  %4308 = vpow2.f32 %v2270_v40  ;;  %v2894_v5 = vmul.f32 %v6086_v19, %v2893_v8  ;;  %vm2897_vm4 = vweird.f32 %v6086_v19 }
 0x243   :  { %v2479_v23 = vrot.slane %v2478_v33, 4  ;;  %4164 = vmatmul.msk.f32.gmra.mxu1 %vm1895_vm3, %v3236_v31  ;;  %v2096_v16 = vmax.f32 %v2094_v49, %v2095_v0  ;;  %vm2896_vm5 = vweird.f32 %v6036_v20  ;;  %v2900_v7 = vand.u32 2147483647, %v6036_v20 }
 0x244   :  { %v2895_v48 = vadd.f32 %v6086_v19, %v2894_v5  ;;  %v2902_v4 = vand.u32 2147483648, %v6036_v20  ;;  %v1524_v11 = vmul.f32 0.125, %v1462_v56  ;;  %v3523_v3 = vmul.f32 %v3415_v59, %v903_v13  ;;  %vm6158_vm6 = vmor %vm2896_vm5, %vm2897_vm4 }
 0x245   :  { %v3584_v26 = vadd.f32 %v3583_v43, %v3582_v38  ;;  %v3589_v12 = vadd.f32 %v3588_v2, %v3587_v37  ;;  %v2097_v57 = vrot.slane %v2096_v16, 1  ;;  %v3594_v58 = vadd.f32 %v3593_v15, %v3592_v61  ;;  %v6173_v37 = vpop.permute.xlu0 %1750 }
 0x246   :  { %v2476_v35 = vrot.slane %v2475_v21, 1  ;;  %v2899_v54 = vsel %vm6158_vm6, %v6086_v19, %v2895_v48  ;;  %v2903_v20 = vor.u32 1.1754944e-38, %v2902_v4  ;;  %v6170_v38 = vsel %vm1844_vm14, %v1524_v11, -3.4028235e+38 }
 0x247   :  { %v2098_v29 = vmax.f32 %v2096_v16, %v2097_v57  ;;  %vm2901_vm8 = vcmp.eq.f32.partialorder %v2900_v7, 8.507059e+37  ;;  %v2099_v62 = vsel %vm1895_vm3, %v6170_v38, -inf  ;;  %v3599_v9 = vsel %vm169_vm0, %v3523_v3, 0.0  ;;  %v3418_v7 = vpop.f32.mrf.mxu1 }
 0x248   :  { %v6178_v34 = vpop.eup %4308  ;;  %vm1845_vm9 = vcmp.gt.f32.partialorder %v6173_v37, 0.0  ;;  %v2480_v19 = vadd.f32 %v2479_v23, %v2478_v33  ;;  %v2904_v41 = vsel %vm2901_vm8, %v2903_v20, %v2899_v54  ;;  %v2100_v27 = vrot.slane %v2099_v62, 4 }
 0x249   :  { %v2907_v42 = vmul.f32 %v6116_v60, %v6065_v17  ;;  %v2485_v61 = vsel %vm1895_vm3, %v6178_v34, 0.0  ;;  %v3590_v51 = vrot.slane %v3589_v12, 1  ;;  %v2204_v49 = vsub.f32 %v6125_v24, %v2098_v29  ;;  %v1465_v24 = vpop.f32.mrf.mxu0 }
 0x24a   :  { %v3595_v8 = vrot.slane %v3594_v58, 2  ;;  %4310 = vrcp.f32 %v6146_v32  ;;  %v3197_v43 = vmul.f32 %v5939_v28, %v2904_v41  ;;  %v2101_v40 = vmax.f32 %v2099_v62, %v2100_v27 }
 0x24b   :  { %v3600_v56 = vrot.slane %v3599_v9, 4  ;;  %v6188_v2 = vadd.f32 %v2476_v35, %v2475_v21  ;;  %v6191_v33 = vsel %vm3885_vm1, %v3584_v26, %v3884_v36  ;;  %v2272_v31 = vmul.f32 1.442695, %v2204_v49  ;;  %v906_v21 = vpop.f32.mrf.mxu3  ;;  %v6213_v35 = vpop.permute.xlu1 %1757 }
 0x24c   :  { %v2908_v0 = vsub.f32 1.0, %v2907_v42  ;;  %v2481_v15 = vrot.slane %v2480_v19, 2  ;;  %v2486_v13 = vrot.slane %v2485_v61, 4  ;;  %v3237_v59 = vmul.f32 %v3197_v43, %v5794_v25  ;;  %v144_v25 = vld [vmem:[%s6920_s3 + $0xc0] sm:$0xff] }
 0x24d   :  { %v2102_v5 = vrot.slane %v2101_v40, 2  ;;  %v6194_v23 = vadd.f32 %v3590_v51, %v3589_v12  ;;  %v6196_v16 = vadd.f32 %v3595_v8, %v3594_v58  ;;  %vm2912_vm11 = vweird.f32 %v6116_v60  ;;  %4083 = vmatmul.msk.f32.gmra.mxu3 %vm747_vm7, %v144_v25 }
 0x24e   :  { %v2909_v28 = vmul.f32 %v6116_v60, %v2908_v0  ;;  %4312 = vpow2.f32 %v2272_v31  ;;  %4165 = vmatmul.msk.f32.gmra.mxu1 %vm1895_vm3, %v3237_v59  ;;  %v3601_v48 = vadd.f32 %v3600_v56, %v3599_v9  ;;  %v2915_v4 = vand.u32 2147483647, %v6065_v17 }
 0x24f   :  { %v2103_v36 = vmax.f32 %v2101_v40, %v2102_v5  ;;  %vm2911_vm12 = vweird.f32 %v6065_v17  ;;  %v2917_v3 = vand.u32 2147483648, %v6065_v17  ;;  %v1525_v26 = vmul.f32 0.125, %v1465_v24  ;;  %v3839_v40 = vld [vmem:[%s6921_s9 + $0x10] sm:$0xff]  ;;  %v3421_v25 = vpop.f32.mrf.mxu1 }
 0x250   :  { %v2910_v11 = vadd.f32 %v6116_v60, %v2909_v28  ;;  %v6209_v12 = vpop.eup %4310  ;;  %v2482_v57 = vadd.f32 %v2481_v15, %v2480_v19  ;;  %v2487_v58 = vadd.f32 %v2486_v13, %v2485_v61  ;;  %vm2913_vm13 = vmor %vm2911_vm12, %vm2912_vm11  ;;  %v3524_v47 = vmul.f32 %v3418_v7, %v906_v21  ;;  %3946 = vmatpush.msra.mxu2 %v3839_v40 }
 0x251   :  { %v2104_v45 = vrot.slane %v2103_v36, 1  ;;  %v2918_v20 = vor.u32 1.1754944e-38, %v2917_v3  ;;  %v6218_v17 = vsel %vm1845_vm9, %v1525_v26, -3.4028235e+38  ;;  %v2922_v29 = vmul.f32 %v6134_v1, %v6098_v39  ;;  %v1468_v24 = vpop.f32.mrf.mxu0 }
 0x252   :  { %v2914_v54 = vsel %vm2913_vm13, %v6116_v60, %v2910_v11  ;;  %vm1846_vm14 = vcmp.gt.f32.partialorder %v6213_v35, 0.0  ;;  %v3602_v9 = vrot.slane %v3601_v48, 2  ;;  %vm2916_vm15 = vcmp.eq.f32.partialorder %v2915_v4, 8.507059e+37 }
 0x253   :  { %v2105_v62 = vmax.f32 %v2103_v36, %v2104_v45  ;;  %v2106_v19 = vsel %vm1895_vm3, %v6218_v17, -inf  ;;  %vm3887_vm4 = vcmask 1044484   ;;  %v2919_v41 = vsel %vm2916_vm15, %v2918_v20, %v2914_v54  ;;  %v909_v4 = vpop.f32.mrf.mxu3  ;;  %v145_v45 = vld [vmem:[%s6920_s3 + $0xc8] sm:$0xff] }
 0x254   :  { %v2107_v27 = vrot.slane %v2106_v19, 4  ;;  %v3606_v60 = vsel %vm169_vm0, %v3524_v47, 0.0  ;;  %v2923_v42 = vsub.f32 1.0, %v2922_v29  ;;  %v6226_v61 = vpop.eup %4312  ;;  %v2483_v51 = vrot.slane %v2482_v57, 1 }
 0x255   :  { %v2205_v49 = vsub.f32 %v6170_v38, %v2105_v62  ;;  %v3198_v8 = vmul.f32 %v5967_v6, %v2919_v41  ;;  %v3607_v43 = vrot.slane %v3606_v60, 4  ;;  %v2488_v56 = vrot.slane %v2487_v58, 2  ;;  %4084 = vmatmul.msk.f32.gmra.mxu3 %vm747_vm7, %v145_v45 }
 0x256   :  { %v2492_v31 = vsel %vm1895_vm3, %v6226_v61, 0.0  ;;  %v2108_v0 = vmax.f32 %v2106_v19, %v2107_v27  ;;  %v2924_v15 = vmul.f32 %v6134_v1, %v2923_v42  ;;  %v3603_v5 = vadd.f32 %v3602_v9, %v3601_v48 }
 0x257   :  { %v2493_v13 = vrot.slane %v2492_v31, 4  ;;  %v2274_v59 = vmul.f32 1.442695, %v2205_v49  ;;  %v3238_v38 = vmul.f32 %v3198_v8, %v5840_v30  ;;  %vm2926_vm5 = vweird.f32 %v6098_v39 }
 0x258   :  { %v2109_v6 = vrot.slane %v2108_v0, 2  ;;  %v2925_v28 = vadd.f32 %v6134_v1, %v2924_v15  ;;  %vm2927_vm6 = vweird.f32 %v6134_v1  ;;  %v3608_v7 = vadd.f32 %v3607_v43, %v3606_v60  ;;  %v3837_v60 = vld [vmem:[%s6921_s9] sm:$0xff] }
 0x259   :  { %v2494_v21 = vadd.f32 %v2493_v13, %v2492_v31  ;;  %4166 = vmatmul.msk.f32.gmra.mxu1 %vm1895_vm3, %v3238_v38  ;;  %vm6241_vm8 = vmor %vm2926_vm5, %vm2927_vm6  ;;  %v2930_v48 = vand.u32 2147483647, %v6098_v39  ;;  %v2932_v30 = vand.u32 2147483648, %v6098_v39  ;;  %4314 = vpow2.f32 %v2274_v59  ;;  %v3838_v39 = vld [vmem:[%s6921_s9 + $0x8] sm:$0xff] }
 0x25a   :  { %v2110_v11 = vmax.f32 %v2108_v0, %v2109_v6  ;;  %v2929_v3 = vsel %vm6241_vm8, %v6134_v1, %v2925_v28  ;;  %v1526_v26 = vmul.f32 0.125, %v1468_v24  ;;  %v6253_v47 = vadd.f32 %v2483_v51, %v2482_v57  ;;  %3947 = vmatpush.msra.mxu2 %v3838_v39 }
 0x25b   :  { %v2489_v54 = vadd.f32 %v2488_v56, %v2487_v58  ;;  %v3597_v20 = vrot.slane %v6196_v16, 1  ;;  %v2933_v29 = vor.u32 1.1754944e-38, %v2932_v30  ;;  %vm2931_vm9 = vcmp.eq.f32.partialorder %v2930_v48, 8.507059e+37  ;;  %v6266_v58 = vpop.permute.xlu2 %1764 }
 0x25c   :  { %v2111_v62 = vrot.slane %v2110_v11, 1  ;;  %v6262_v1 = vsel %vm1846_vm14, %v1526_v26, -3.4028235e+38  ;;  %v2937_v57 = vmul.f32 %v6209_v12, %v6146_v32  ;;  %v2495_v9 = vrot.slane %v2494_v21, 2  ;;  %3948 = vmatpush.msra.mxu2 %v3837_v60 }
 0x25d   :  { %v3609_v19 = vrot.slane %v3608_v7, 2  ;;  %v2934_v41 = vsel %vm2931_vm9, %v2933_v29, %v2929_v3  ;;  %v2113_v27 = vsel %vm1895_vm3, %v6262_v1, -inf  ;;  %vm1847_vm11 = vcmp.gt.f32.partialorder %v6266_v58, 0.0 }
 0x25e   :  { %v3604_v42 = vrot.slane %v3603_v5, 1  ;;  %v2112_v51 = vmax.f32 %v2110_v11, %v2111_v62  ;;  %v3199_v49 = vmul.f32 %v6004_v18, %v2934_v41  ;;  %v2114_v8 = vrot.slane %v2113_v27, 4 }
 0x25f   :  { %4316 = vrcp.f32 %v6188_v2  ;;  %v3888_v43 = vsel %vm3887_vm4, %v6194_v23, %v6191_v33  ;;  %v3525_v40 = vmul.f32 %v3421_v25, %v909_v4  ;;  %v2938_v56 = vsub.f32 1.0, %v2937_v57  ;;  %v6279_v31 = vpop.eup %4314  ;;  %v1471_v23 = vpop.f32.mrf.mxu0 }
 0x260   :  { %4318 = vrcp.f32 %v6253_v47  ;;  %v3598_v0 = vadd.f32 %v3597_v20, %v6196_v16  ;;  %v2206_v15 = vsub.f32 %v6218_v17, %v2112_v51  ;;  %v3239_v18 = vmul.f32 %v3199_v49, %v5881_v10 }
 0x261   :  { %v2490_v13 = vrot.slane %v2489_v54, 1  ;;  %v2496_v59 = vadd.f32 %v2495_v9, %v2494_v21  ;;  %v3610_v38 = vadd.f32 %v3609_v19, %v3608_v7  ;;  %v2115_v24 = vmax.f32 %v2113_v27, %v2114_v8  ;;  %v912_v21 = vpop.f32.mrf.mxu3  ;;  %v3424_v7 = vpop.f32.mrf.mxu1 }
 0x262   :  { %v3605_v6 = vadd.f32 %v3604_v42, %v3603_v5  ;;  %v2276_v28 = vmul.f32 1.442695, %v2206_v15  ;;  %4167 = vmatmul.msk.f32.gmra.mxu1 %vm1895_vm3, %v3239_v18  ;;  %v2939_v33 = vmul.f32 %v6209_v12, %v2938_v56  ;;  %vm2942_vm12 = vweird.f32 %v6209_v12 }
 0x263   :  { %v2499_v16 = vsel %vm1895_vm3, %v6279_v31, 0.0  ;;  %v2116_v36 = vrot.slane %v2115_v24, 2  ;;  %v3613_v17 = vsel %vm169_vm0, %v3525_v40, 0.0  ;;  %v2945_v10 = vand.u32 2147483647, %v6146_v32 }
 0x264   :  { %4320 = vpow2.f32 %v2276_v28  ;;  %v2940_v5 = vadd.f32 %v6209_v12, %v2939_v33  ;;  %vm2941_vm13 = vweird.f32 %v6146_v32  ;;  %v2947_v48 = vand.u32 2147483648, %v6146_v32  ;;  %v146_v32 = vld [vmem:[%s6920_s3 + $0xd0] sm:$0xff] }
 0x265   :  { %v6295_v30 = vpop.eup %4316  ;;  %v2497_v4 = vrot.slane %v2496_v59, 1  ;;  %v3611_v25 = vrot.slane %v3610_v38, 1  ;;  %v2117_v11 = vmax.f32 %v2115_v24, %v2116_v36  ;;  %vm2943_vm14 = vmor %vm2941_vm13, %vm2942_vm12  ;;  %v1527_v3 = vmul.f32 0.125, %v1471_v23  ;;  %4085 = vmatmul.msk.f32.gmra.mxu3 %vm747_vm7, %v146_v32 }
 0x266   :  { %v6299_v26 = vpop.eup %4318  ;;  %v6301_v45 = vadd.f32 %v2490_v13, %v2489_v54  ;;  %v2500_v20 = vrot.slane %v2499_v16, 4  ;;  %v2944_v29 = vsel %vm2943_vm14, %v6209_v12, %v2940_v5  ;;  %v2948_v39 = vor.u32 1.1754944e-38, %v2947_v48 }
 0x267   :  { %v2118_v62 = vrot.slane %v2117_v11, 1  ;;  %v3614_v57 = vrot.slane %v3613_v17, 4  ;;  %vm2946_vm15 = vcmp.eq.f32.partialorder %v2945_v10, 8.507059e+37  ;;  %v6309_v9 = vsel %vm1847_vm11, %v1527_v3, -3.4028235e+38 }
 0x268   :  { %v2949_v19 = vsel %vm2946_vm15, %v2948_v39, %v2944_v29  ;;  %v2120_v54 = vsel %vm1895_vm3, %v6309_v9, -inf  ;;  %v3526_v41 = vmul.f32 %v3424_v7, %v912_v21  ;;  %vm3889_vm5 = vcmask 1045509   ;;  %v147_v29 = vld [vmem:[%s6920_s3 + $0xd8] sm:$0xff] }
 0x269   :  { %v6314_v12 = vadd.f32 %v2497_v4, %v2496_v59  ;;  %v3612_v27 = vadd.f32 %v3611_v25, %v3610_v38  ;;  %v2119_v60 = vmax.f32 %v2117_v11, %v2118_v62  ;;  %v3200_v42 = vmul.f32 %v6042_v53, %v2949_v19  ;;  %v3427_v33 = vpop.f32.mrf.mxu1  ;;  %v6356_v19 = vpop.permute.xlu1 %1778 }
 0x26a   :  { %v6317_v51 = vpop.eup %4320  ;;  %v2501_v49 = vadd.f32 %v2500_v20, %v2499_v16  ;;  %v2121_v8 = vrot.slane %v2120_v54, 4  ;;  %vm3891_vm6 = vcmask 1046534   ;;  %vm3893_vm8 = vcmask 1047559  }
 0x26b   :  { %4322 = vrcp.f32 %v6301_v45  ;;  %v2207_v40 = vsub.f32 %v6262_v1, %v2119_v60  ;;  %v3240_v56 = vmul.f32 %v3200_v42, %v5925_v44  ;;  %v3890_v15 = vsel %vm3889_vm5, %v3598_v0, %v3888_v43  ;;  %v915_v44 = vpop.f32.mrf.mxu3  ;;  %v6331_v43 = vpop.permute.xlu0 %1771 }
 0x26c   :  { %v3615_v18 = vadd.f32 %v3614_v57, %v3613_v17  ;;  %v2122_v13 = vmax.f32 %v2120_v54, %v2121_v8  ;;  %v3620_v59 = vsel %vm169_vm0, %v3526_v41, 0.0  ;;  %v3892_v53 = vsel %vm3891_vm6, %v3605_v6, %v3890_v15  ;;  %v1474_v6 = vpop.f32.mrf.mxu0 }
 0x26d   :  { %v2506_v38 = vsel %vm1895_vm3, %v6317_v51, 0.0  ;;  %v2278_v24 = vmul.f32 1.442695, %v2207_v40  ;;  %4168 = vmatmul.msk.f32.gmra.mxu1 %vm1895_vm3, %v3240_v56  ;;  %v3894_v28 = vsel %vm3893_vm8, %v3612_v27, %v3892_v53  ;;  %v2952_v1 = vmul.f32 %v6295_v30, %v6188_v2  ;;  %4086 = vmatmul.msk.f32.gmra.mxu3 %vm747_vm7, %v147_v29 }
 0x26e   :  { %4324 = vrcp.f32 %v6314_v12  ;;  %v2502_v0 = vrot.slane %v2501_v49, 2  ;;  %v2123_v23 = vrot.slane %v2122_v13, 2  ;;  %4184 = vmatmul.msk.f32.vlgmr.msra.gmra.mxu2 %vm169_vm0, %v3894_v28  ;;  %vm1848_vm9 = vcmp.gt.f32.partialorder %v6331_v43, 0.0 }
 0x26f   :  { %4326 = vpow2.f32 %v2278_v24  ;;  %v2953_v16 = vsub.f32 1.0, %v2952_v1  ;;  %v2507_v36 = vrot.slane %v2506_v38, 4  ;;  %v3616_v17 = vrot.slane %v3615_v18, 2 }
 0x270   :  { %v2124_v10 = vmax.f32 %v2122_v13, %v2123_v23  ;;  %v3621_v21 = vrot.slane %v3620_v59, 4  ;;  %vm2957_vm11 = vweird.f32 %v6295_v30  ;;  %v2962_v48 = vand.u32 2147483648, %v6188_v2 }
 0x271   :  { %v6336_v7 = vpop.eup %4322  ;;  %v2954_v5 = vmul.f32 %v6295_v30, %v2953_v16  ;;  %v1528_v4 = vmul.f32 0.125, %v1474_v6  ;;  %v2503_v25 = vadd.f32 %v2502_v0, %v2501_v49  ;;  %v2960_v3 = vand.u32 2147483647, %v6188_v2  ;;  %v3430_v1 = vpop.f32.mrf.mxu1 }
 0x272   :  { %v2125_v11 = vrot.slane %v2124_v10, 1  ;;  %v3527_v20 = vmul.f32 %v3427_v33, %v915_v44  ;;  %vm2956_vm12 = vweird.f32 %v6188_v2  ;;  %v2967_v62 = vmul.f32 %v6299_v26, %v6253_v47 }
 0x273   :  { %v2955_v39 = vadd.f32 %v6295_v30, %v2954_v5  ;;  %v6349_v32 = vsel %vm1848_vm9, %v1528_v4, -3.4028235e+38  ;;  %v2508_v54 = vadd.f32 %v2507_v36, %v2506_v38  ;;  %v3622_v27 = vadd.f32 %v3621_v21, %v3620_v59  ;;  %vm2958_vm13 = vmor %vm2956_vm12, %vm2957_vm11  ;;  %v918_v28 = vpop.f32.mrf.mxu3  ;;  %v149_v4 = vld [vmem:[%s6920_s3 + $0xe8] sm:$0xff] }
 0x274   :  { %v6354_v57 = vpop.eup %4324  ;;  %v2126_v41 = vmax.f32 %v2124_v10, %v2125_v11  ;;  %v2127_v2 = vsel %vm1895_vm3, %v6349_v32, -inf  ;;  %vm1849_vm14 = vcmp.gt.f32.partialorder %v6356_v19, 0.0  ;;  %v2963_v49 = vor.u32 1.1754944e-38, %v2962_v48 }
 0x275   :  { %v6362_v60 = vpop.eup %4326  ;;  %v2959_v42 = vsel %vm2958_vm13, %v6295_v30, %v2955_v39  ;;  %v2128_v8 = vrot.slane %v2127_v2, 4  ;;  %v2968_v40 = vsub.f32 1.0, %v2967_v62  ;;  %vm2961_vm15 = vcmp.eq.f32.partialorder %v2960_v3, 8.507059e+37  ;;  %v148_v3 = vld [vmem:[%s6920_s3 + $0xe0] sm:$0xff] }
 0x276   :  { %v2513_v56 = vsel %vm1895_vm3, %v6362_v60, 0.0  ;;  %v2208_v15 = vsub.f32 %v6309_v9, %v2126_v41  ;;  %v3627_v13 = vsel %vm169_vm0, %v3527_v20, 0.0  ;;  %v2504_v59 = vrot.slane %v2503_v25, 1  ;;  %v1477_v9 = vpop.f32.mrf.mxu0  ;;  %4087 = vmatmul.msk.f32.gmra.mxu3 %vm747_vm7, %v148_v3 }
 0x277   :  { %v3617_v53 = vadd.f32 %v3616_v17, %v3615_v18  ;;  %v2964_v38 = vsel %vm2961_vm15, %v2963_v49, %v2959_v42  ;;  %v2129_v24 = vmax.f32 %v2127_v2, %v2128_v8  ;;  %v3623_v33 = vrot.slane %v3622_v27, 2  ;;  %v6398_v2 = vpop.permute.xlu2 %1785 }
 0x278   :  { %v2280_v44 = vmul.f32 1.442695, %v2208_v15  ;;  %v3201_v30 = vmul.f32 %v6095_v50, %v2964_v38  ;;  %v2969_v0 = vmul.f32 %v6299_v26, %v2968_v40  ;;  %v2509_v23 = vrot.slane %v2508_v54, 2 }
 0x279   :  { %v2514_v6 = vrot.slane %v2513_v56, 4  ;;  %v2130_v16 = vrot.slane %v2129_v24, 2  ;;  %v3628_v36 = vrot.slane %v3627_v13, 4  ;;  %vm2972_vm9 = vweird.f32 %v6299_v26 }
 0x27a   :  { %4328 = vpow2.f32 %v2280_v44  ;;  %v3241_v10 = vmul.f32 %v3201_v30, %v5969_v46  ;;  %v2970_v18 = vadd.f32 %v6299_v26, %v2969_v0  ;;  %v3618_v17 = vrot.slane %v3617_v53, 1  ;;  %v3433_v44 = vpop.f32.mrf.mxu1 }
 0x27b   :  { %v2131_v21 = vmax.f32 %v2129_v24, %v2130_v16  ;;  %vm2971_vm11 = vweird.f32 %v6253_v47  ;;  %v2975_v50 = vand.u32 2147483647, %v6253_v47  ;;  %v6377_v5 = vadd.f32 %v2504_v59, %v2503_v25  ;;  %v921_v24 = vpop.f32.mrf.mxu3 }
 0x27c   :  { %v3624_v48 = vadd.f32 %v3623_v33, %v3622_v27  ;;  %4169 = vmatmul.msk.f32.gmra.mxu1 %vm1895_vm3, %v3241_v10  ;;  %vm6380_vm12 = vmor %vm2971_vm11, %vm2972_vm9  ;;  %v2977_v46 = vand.u32 2147483648, %v6253_v47  ;;  %v1529_v11 = vmul.f32 0.125, %v1477_v9  ;;  %v2510_v20 = vadd.f32 %v2509_v23, %v2508_v54 }
 0x27d   :  { %v2132_v29 = vrot.slane %v2131_v21, 1  ;;  %v3629_v39 = vadd.f32 %v3628_v36, %v3627_v13  ;;  %v2974_v25 = vsel %vm6380_vm12, %v6299_v26, %v2970_v18  ;;  %v2515_v62 = vadd.f32 %v2514_v6, %v2513_v56 }
 0x27e   :  { %v2978_v41 = vor.u32 1.1754944e-38, %v2977_v46  ;;  %v6394_v27 = vsel %vm1849_vm14, %v1529_v11, -3.4028235e+38  ;;  %v2982_v47 = vmul.f32 %v6336_v7, %v6301_v45  ;;  %vm2976_vm13 = vcmp.eq.f32.partialorder %v2975_v50, 8.507059e+37  ;;  %v1480_v16 = vpop.f32.mrf.mxu0  ;;  %4088 = vmatmul.msk.f32.gmra.mxu3 %vm747_vm7, %v149_v4 }
 0x27f   :  { %v2133_v54 = vmax.f32 %v2131_v21, %v2132_v29  ;;  %v2134_v42 = vsel %vm1895_vm3, %v6394_v27, -inf  ;;  %v3528_v49 = vmul.f32 %v3430_v1, %v918_v28  ;;  %vm1850_vm15 = vcmp.gt.f32.partialorder %v6398_v2, 0.0 }
 0x280   :  { %v6402_v26 = vpop.eup %4328  ;;  %v3619_v8 = vadd.f32 %v3618_v17, %v3617_v53  ;;  %v2979_v40 = vsel %vm2976_vm13, %v2978_v41, %v2974_v25  ;;  %v2135_v56 = vrot.slane %v2134_v42, 4  ;;  %v2983_v15 = vsub.f32 1.0, %v2982_v47 }
 0x281   :  { %4330 = vrcp.f32 %v6377_v5  ;;  %v2520_v13 = vsel %vm1895_vm3, %v6402_v26, 0.0  ;;  %v3625_v59 = vrot.slane %v3624_v48, 1  ;;  %v2209_v38 = vsub.f32 %v6349_v32, %v2133_v54 }
 0x282   :  { %v2511_v33 = vrot.slane %v2510_v20, 1  ;;  %v3630_v28 = vrot.slane %v3629_v39, 2  ;;  %v3202_v1 = vmul.f32 %v6142_v22, %v2979_v40  ;;  %v2136_v30 = vmax.f32 %v2134_v42, %v2135_v56 }
 0x283   :  { %v2516_v0 = vrot.slane %v2515_v62, 2  ;;  %v2282_v53 = vmul.f32 1.442695, %v2209_v38  ;;  %v3634_v23 = vsel %vm169_vm0, %v3528_v49, 0.0  ;;  %v2984_v6 = vmul.f32 %v6336_v7, %v2983_v15 }
 0x284   :  { %v2521_v36 = vrot.slane %v2520_v13, 4  ;;  %v3242_v9 = vmul.f32 %v3202_v1, %v6011_v55  ;;  %v2137_v10 = vrot.slane %v2136_v30, 2  ;;  %vm2986_vm14 = vweird.f32 %v6301_v45 }
 0x285   :  { %4332 = vpow2.f32 %v2282_v53  ;;  %v2985_v32 = vadd.f32 %v6336_v7, %v2984_v6  ;;  %vm2987_vm9 = vweird.f32 %v6336_v7  ;;  %v2990_v22 = vand.u32 2147483647, %v6301_v45 }
 0x286   :  { %v3626_v18 = vadd.f32 %v3625_v59, %v3624_v48  ;;  %v3631_v17 = vadd.f32 %v3630_v28, %v3629_v39  ;;  %4170 = vmatmul.msk.f32.gmra.mxu1 %vm1895_vm3, %v3242_v9  ;;  %v2138_v21 = vmax.f32 %v2136_v30, %v2137_v10  ;;  %vm6418_vm11 = vmor %vm2986_vm14, %vm2987_vm9  ;;  %v2992_v55 = vand.u32 2147483648, %v6301_v45  ;;  %v6434_v39 = vpop.permute.xlu0 %1792  ;;  %v1483_v6 = vpop.f32.mrf.mxu0 }
 0x287   :  { %v6426_v46 = vpop.eup %4330  ;;  %v6428_v11 = vadd.f32 %v2511_v33, %v2510_v20  ;;  %v2517_v3 = vadd.f32 %v2516_v0, %v2515_v62  ;;  %v2989_v48 = vsel %vm6418_vm11, %v6336_v7, %v2985_v32  ;;  %v1530_v29 = vmul.f32 0.125, %v1480_v16 }
 0x288   :  { %v2139_v25 = vrot.slane %v2138_v21, 1  ;;  %v3635_v45 = vrot.slane %v3634_v23, 4  ;;  %v2993_v41 = vor.u32 1.1754944e-38, %v2992_v55  ;;  %v3529_v47 = vmul.f32 %v3433_v44, %v921_v24  ;;  %v924_v24 = vpop.f32.mrf.mxu3  ;;  %v3436_v44 = vpop.f32.mrf.mxu1 }
 0x289   :  { %vm1851_vm12 = vcmp.gt.f32.partialorder %v6434_v39, 0.0  ;;  %v2522_v54 = vadd.f32 %v2521_v36, %v2520_v13  ;;  %vm2991_vm13 = vcmp.eq.f32.partialorder %v2990_v22, 8.507059e+37  ;;  %v6439_v20 = vsel %vm1850_vm15, %v1530_v29, -3.4028235e+38  ;;  %v150_v29 = vld [vmem:[%s6920_s3 + $0xf0] sm:$0xff] }
 0x28a   :  { %v2997_v7 = vmul.f32 %v6354_v57, %v6314_v12  ;;  %v3895_v62 = vsel %vm3881_vm2, %v3626_v18, %v3619_v8  ;;  %v3632_v42 = vrot.slane %v3631_v17, 1  ;;  %v2140_v49 = vmax.f32 %v2138_v21, %v2139_v25  ;;  %v6465_v21 = vpop.permute.xlu1 %1799  ;;  %4089 = vmatmul.msk.f32.gmra.mxu3 %vm747_vm7, %v150_v29 }
 0x28b   :  { %v2994_v40 = vsel %vm2991_vm13, %v2993_v41, %v2989_v48  ;;  %v6444_v56 = vpop.eup %4332  ;;  %v2518_v15 = vrot.slane %v2517_v3, 1  ;;  %v2141_v13 = vsel %vm1895_vm3, %v6439_v20, -inf  ;;  %v3641_v1 = vsel %vm169_vm0, %v3529_v47, 0.0 }
 0x28c   :  { %v3203_v59 = vmul.f32 %v6178_v34, %v2994_v40  ;;  %v2998_v38 = vsub.f32 1.0, %v2997_v7  ;;  %v2527_v33 = vsel %vm1895_vm3, %v6444_v56, 0.0  ;;  %v2210_v28 = vsub.f32 %v6394_v27, %v2140_v49 }
 0x28d   :  { %v2142_v8 = vrot.slane %v2141_v13, 4  ;;  %v2523_v30 = vrot.slane %v2522_v54, 2  ;;  %v3636_v0 = vadd.f32 %v3635_v45, %v3634_v23  ;;  %vm3001_vm15 = vweird.f32 %v6314_v12 }
 0x28e   :  { %v3243_v53 = vmul.f32 %v3203_v59, %v6044_v63  ;;  %v2999_v34 = vmul.f32 %v6354_v57, %v2998_v38  ;;  %v2284_v16 = vmul.f32 1.442695, %v2210_v28  ;;  %vm3002_vm14 = vweird.f32 %v6354_v57  ;;  %v152_v63 = vld [vmem:[%s6920_s3 + $0x100] sm:$0xff] }
 0x28f   :  { %v2143_v36 = vmax.f32 %v2141_v13, %v2142_v8  ;;  %v2528_v9 = vrot.slane %v2527_v33, 4  ;;  %v3642_v27 = vrot.slane %v3641_v1, 4  ;;  %v3005_v32 = vand.u32 2147483647, %v6314_v12  ;;  %vm6460_vm9 = vmor %vm3001_vm15, %vm3002_vm14 }
 0x290   :  { %4171 = vmatmul.msk.f32.gmra.mxu1 %vm1895_vm3, %v3243_v53  ;;  %v3000_v10 = vadd.f32 %v6354_v57, %v2999_v34  ;;  %4334 = vpow2.f32 %v2284_v16  ;;  %v3007_v22 = vand.u32 2147483648, %v6314_v12  ;;  %v1531_v18 = vmul.f32 0.125, %v1483_v6  ;;  %v927_v59 = vpop.f32.mrf.mxu3  ;;  %v3439_v13 = vpop.f32.mrf.mxu1 }
 0x291   :  { %v2144_v23 = vrot.slane %v2143_v36, 2  ;;  %v6467_v50 = vadd.f32 %v2518_v15, %v2517_v3  ;;  %v3633_v55 = vadd.f32 %v3632_v42, %v3631_v17  ;;  %v3637_v4 = vrot.slane %v3636_v0, 2 }
 0x292   :  { %v3004_v48 = vsel %vm6460_vm9, %v6354_v57, %v3000_v10  ;;  %v2524_v25 = vadd.f32 %v2523_v30, %v2522_v54  ;;  %v3008_v41 = vor.u32 1.1754944e-38, %v3007_v22  ;;  %v6477_v12 = vsel %vm1851_vm12, %v1531_v18, -3.4028235e+38 }
 0x293   :  { %v2145_v45 = vmax.f32 %v2143_v36, %v2144_v23  ;;  %v3643_v3 = vadd.f32 %v3642_v27, %v3641_v1  ;;  %vm3006_vm11 = vcmp.eq.f32.partialorder %v3005_v32, 8.507059e+37  ;;  %v2148_v17 = vsel %vm1895_vm3, %v6477_v12, -inf  ;;  %v151_v27 = vld [vmem:[%s6920_s3 + $0xf8] sm:$0xff] }
 0x294   :  { %v3012_v57 = vmul.f32 %v6426_v46, %v6377_v5  ;;  %vm1852_vm13 = vcmp.gt.f32.partialorder %v6465_v21, 0.0  ;;  %v2529_v47 = vadd.f32 %v2528_v9, %v2527_v33  ;;  %v3009_v7 = vsel %vm3006_vm11, %v3008_v41, %v3004_v48  ;;  %4090 = vmatmul.msk.f32.gmra.mxu3 %vm747_vm7, %v151_v27 }
 0x295   :  { %v2146_v54 = vrot.slane %v2145_v45, 1  ;;  %v2149_v42 = vrot.slane %v2148_v17, 4  ;;  %4336 = vrcp.f32 %v6428_v11  ;;  %v6487_v49 = vsel %vm3883_vm10, %v3633_v55, %v3895_v62 }
 0x296   :  { %v3204_v40 = vmul.f32 %v6226_v61, %v3009_v7  ;;  %v3530_v15 = vmul.f32 %v3436_v44, %v924_v24  ;;  %v6490_v38 = vpop.eup %4334  ;;  %4338 = vrcp.f32 %v6467_v50  ;;  %v3013_v33 = vsub.f32 1.0, %v3012_v57  ;;  %v1486_v44 = vpop.f32.mrf.mxu0 }
 0x297   :  { %v2147_v28 = vmax.f32 %v2145_v45, %v2146_v54  ;;  %v2150_v8 = vmax.f32 %v2148_v17, %v2149_v42  ;;  %v2525_v1 = vrot.slane %v2524_v25, 1  ;;  %v6493_v30 = vadd.f32 %v3637_v4, %v3636_v0  ;;  %v6523_v4 = vpop.permute.xlu2 %1806 }
 0x298   :  { %v3644_v53 = vrot.slane %v3643_v3, 2  ;;  %v3244_v34 = vmul.f32 %v3204_v40, %v6088_v52  ;;  %v2530_v62 = vrot.slane %v2529_v47, 2  ;;  %v3014_v24 = vmul.f32 %v6426_v46, %v3013_v33  ;;  %v930_v42 = vpop.f32.mrf.mxu3  ;;  %v3442_v40 = vpop.f32.mrf.mxu1 }
 0x299   :  { %v2211_v6 = vsub.f32 %v6439_v20, %v2147_v28  ;;  %v2151_v61 = vrot.slane %v2150_v8, 2  ;;  %v2534_v16 = vsel %vm1895_vm3, %v6490_v38, 0.0  ;;  %v3648_v36 = vsel %vm169_vm0, %v3530_v15, 0.0 }
 0x29a   :  { %4172 = vmatmul.msk.f32.gmra.mxu1 %vm1895_vm3, %v3244_v34  ;;  %vm3016_vm12 = vweird.f32 %v6377_v5  ;;  %vm3017_vm15 = vweird.f32 %v6426_v46  ;;  %v3015_v9 = vadd.f32 %v6426_v46, %v3014_v24  ;;  %v3020_v20 = vand.u32 2147483647, %v6377_v5 }
 0x29b   :  { %v2286_v0 = vmul.f32 1.442695, %v2211_v6  ;;  %v2152_v52 = vmax.f32 %v2150_v8, %v2151_v61  ;;  %v6509_v10 = vpop.eup %4336  ;;  %v6511_v32 = vadd.f32 %v2525_v1, %v2524_v25  ;;  %v6513_v23 = vadd.f32 %v3644_v53, %v3643_v3  ;;  %vm6515_vm14 = vmor %vm3016_vm12, %vm3017_vm15 }
 0x29c   :  { %v3022_v22 = vand.u32 2147483648, %v6377_v5  ;;  %v1532_v18 = vmul.f32 0.125, %v1486_v44  ;;  %v6521_v55 = vpop.eup %4338  ;;  %v3649_v29 = vrot.slane %v3648_v36, 4  ;;  %v3019_v25 = vsel %vm6515_vm14, %v6426_v46, %v3015_v9  ;;  %4091 = vmatmul.msk.f32.gmra.mxu3 %vm747_vm7, %v152_v63 }
 0x29d   :  { %4340 = vpow2.f32 %v2286_v0  ;;  %v2153_v48 = vrot.slane %v2152_v52, 1  ;;  %v6528_v45 = vadd.f32 %v2530_v62, %v2529_v47  ;;  %v2535_v41 = vrot.slane %v2534_v16, 4 }
 0x29e   :  { %v3023_v3 = vor.u32 1.1754944e-38, %v3022_v22  ;;  %v6532_v5 = vsel %vm1852_vm13, %v1532_v18, -3.4028235e+38  ;;  %vm3021_vm9 = vcmp.eq.f32.partialorder %v3020_v20, 8.507059e+37  ;;  %v3027_v54 = vmul.f32 %v6509_v10, %v6428_v11 }
 0x29f   :  { %v2154_v17 = vmax.f32 %v2152_v52, %v2153_v48  ;;  %v2155_v57 = vsel %vm1895_vm3, %v6532_v5, -inf  ;;  %vm1853_vm11 = vcmp.gt.f32.partialorder %v6523_v4, 0.0  ;;  %4342 = vrcp.f32 %v6511_v32 }
 0x2a0   :  { %v3639_v46 = vrot.slane %v6493_v30, 1  ;;  %v3024_v47 = vsel %vm3021_vm9, %v3023_v3, %v3019_v25  ;;  %v2156_v7 = vrot.slane %v2155_v57, 4  ;;  %v3650_v28 = vadd.f32 %v3649_v29, %v3648_v36  ;;  %v6566_v29 = vpop.permute.xlu0 %1813 }
 0x2a1   :  { %v2212_v15 = vsub.f32 %v6477_v12, %v2154_v17  ;;  %v3205_v8 = vmul.f32 %v6279_v31, %v3024_v47  ;;  %v3531_v33 = vmul.f32 %v3439_v13, %v927_v59  ;;  %v2532_v1 = vrot.slane %v6528_v45, 1  ;;  %v1489_v13 = vpop.f32.mrf.mxu0 }
 0x2a2   :  { %v3646_v53 = vrot.slane %v6513_v23, 1  ;;  %v2157_v34 = vmax.f32 %v2155_v57, %v2156_v7  ;;  %v3028_v62 = vsub.f32 1.0, %v3027_v54  ;;  %v2536_v61 = vadd.f32 %v2535_v41, %v2534_v16 }
 0x2a3   :  { %v6545_v6 = vpop.eup %4340  ;;  %v2288_v24 = vmul.f32 1.442695, %v2212_v15  ;;  %v3245_v44 = vmul.f32 %v3205_v8, %v6128_v14  ;;  %vm3032_vm13 = vweird.f32 %v6509_v10  ;;  %v3035_v59 = vand.u32 2147483647, %v6428_v11 }
 0x2a4   :  { %v2541_v12 = vsel %vm1895_vm3, %v6545_v6, 0.0  ;;  %v2158_v36 = vrot.slane %v2157_v34, 2  ;;  %v3029_v31 = vmul.f32 %v6509_v10, %v3028_v62  ;;  %v3651_v52 = vrot.slane %v3650_v28, 2 }
 0x2a5   :  { %v2542_v0 = vrot.slane %v2541_v12, 4  ;;  %4173 = vmatmul.msk.f32.gmra.mxu1 %vm1895_vm3, %v3245_v44  ;;  %v3655_v16 = vsel %vm169_vm0, %v3531_v33, 0.0  ;;  %v3037_v9 = vand.u32 2147483648, %v6428_v11  ;;  %v6556_v14 = vpop.eup %4342  ;;  %4344 = vpow2.f32 %v2288_v24 }
 0x2a6   :  { %v2159_v20 = vmax.f32 %v2157_v34, %v2158_v36  ;;  %v3030_v27 = vadd.f32 %v6509_v10, %v3029_v31  ;;  %vm3031_vm12 = vweird.f32 %v6428_v11  ;;  %v2537_v22 = vrot.slane %v2536_v61, 2 }
 0x2a7   :  { %vm3033_vm15 = vmor %vm3031_vm12, %vm3032_vm13  ;;  %vm3036_vm14 = vcmp.eq.f32.partialorder %v3035_v59, 8.507059e+37  ;;  %v3038_v18 = vor.u32 1.1754944e-38, %v3037_v9  ;;  %v1533_v48 = vmul.f32 0.125, %v1489_v13  ;;  %v3532_v3 = vmul.f32 %v3442_v40, %v930_v42  ;;  %v6581_v42 = vpop.f32.mrf.mxu1 }
 0x2a8   :  { %v2160_v25 = vrot.slane %v2159_v20, 1  ;;  %v3034_v41 = vsel %vm3033_vm15, %v6509_v10, %v3030_v27  ;;  %v3042_v11 = vmul.f32 %v6521_v55, %v6467_v50  ;;  %v2543_v17 = vadd.f32 %v2542_v0, %v2541_v12  ;;  %v6579_v10 = vpop.f32.mrf.mxu3 }
 0x2a9   :  { %v3656_v57 = vrot.slane %v3655_v16, 4  ;;  %v3039_v54 = vsel %vm3036_vm14, %v3038_v18, %v3034_v41  ;;  %v6573_v47 = vsel %vm1853_vm11, %v1533_v48, -3.4028235e+38  ;;  %v3662_v33 = vsel %vm169_vm0, %v3532_v3, 0.0 }
 0x2aa   :  { %v2161_v7 = vmax.f32 %v2159_v20, %v2160_v25  ;;  %v3206_v15 = vmul.f32 %v6317_v51, %v3039_v54  ;;  %v2162_v8 = vsel %vm1895_vm3, %v6573_v47, -inf  ;;  %vm1854_vm9 = vcmp.gt.f32.partialorder %v6566_v29, 0.0 }
 0x2ab   :  { %v6585_v40 = vadd.f32 %v2532_v1, %v6528_v45  ;;  %v6588_v34 = vadd.f32 %v3639_v46, %v6493_v30  ;;  %v6591_v62 = vadd.f32 %v3646_v53, %v6513_v23  ;;  %v2163_v51 = vrot.slane %v2162_v8, 4  ;;  %v6593_v24 = vpop.eup %4344  ;;  %v153_v53 = vld [vmem:[%s6920_s3 + $0x108] sm:$0xff] }
 0x2ac   :  { %v2213_v44 = vsub.f32 %v6532_v5, %v2161_v7  ;;  %v3246_v12 = vmul.f32 %v3206_v15, %v6173_v37  ;;  %v3663_v36 = vrot.slane %v3662_v33, 4  ;;  %v3043_v31 = vsub.f32 1.0, %v3042_v11  ;;  %4092 = vmatmul.msk.f32.gmra.mxu3 %vm747_vm7, %v153_v53 }
 0x2ad   :  { %v2538_v59 = vadd.f32 %v2537_v22, %v2536_v61  ;;  %v6597_v13 = vadd.f32 %v3651_v52, %v3650_v28  ;;  %v3657_v45 = vadd.f32 %v3656_v57, %v3655_v16  ;;  %v2164_v1 = vmax.f32 %v2162_v8, %v2163_v51  ;;  %v1492_v28 = vpop.f32.mrf.mxu0 }
 0x2ae   :  { %v2544_v0 = vrot.slane %v2543_v17, 2  ;;  %v2290_v30 = vmul.f32 1.442695, %v2213_v44  ;;  %4174 = vmatmul.msk.f32.gmra.mxu1 %vm1895_vm3, %v3246_v12  ;;  %v3044_v23 = vmul.f32 %v6521_v55, %v3043_v31  ;;  %vm3047_vm11 = vweird.f32 %v6521_v55 }
 0x2af   :  { %v2548_v5 = vsel %vm1895_vm3, %v6593_v24, 0.0  ;;  %v2165_v46 = vrot.slane %v2164_v1, 2  ;;  %vm3046_vm13 = vweird.f32 %v6467_v50  ;;  %v3050_v37 = vand.u32 2147483647, %v6467_v50  ;;  %v6620_v11 = vpop.f32.mrf.mxu1 }
 0x2b0   :  { %4346 = vpow2.f32 %v2290_v30  ;;  %v3664_v61 = vadd.f32 %v3663_v36, %v3662_v33  ;;  %v3045_v52 = vadd.f32 %v6521_v55, %v3044_v23  ;;  %v3052_v16 = vand.u32 2147483648, %v6467_v50  ;;  %vm3048_vm12 = vmor %vm3046_vm13, %vm3047_vm11  ;;  %v6618_v3 = vpop.f32.mrf.mxu3 }
 0x2b1   :  { %4348 = vrcp.f32 %v6585_v40  ;;  %v2539_v9 = vrot.slane %v2538_v59, 1  ;;  %v3658_v20 = vrot.slane %v3657_v45, 2  ;;  %v2166_v27 = vmax.f32 %v2164_v1, %v2165_v46 }
 0x2b2   :  { %v2549_v63 = vrot.slane %v2548_v5, 4  ;;  %v3049_v22 = vsel %vm3048_vm12, %v6521_v55, %v3045_v52  ;;  %v3053_v18 = vor.u32 1.1754944e-38, %v3052_v16  ;;  %v1534_v48 = vmul.f32 0.125, %v1492_v28 }
 0x2b3   :  { %v2545_v25 = vadd.f32 %v2544_v0, %v2543_v17  ;;  %v2167_v41 = vrot.slane %v2166_v27, 1  ;;  %vm3051_vm15 = vcmp.eq.f32.partialorder %v3050_v37, 8.507059e+37  ;;  %v3057_v50 = vmul.f32 %v6556_v14, %v6511_v32 }
 0x2b4   :  { %v3653_v57 = vrot.slane %v6597_v13, 1  ;;  %v3665_v54 = vrot.slane %v3664_v61, 2  ;;  %v3054_v7 = vsel %vm3051_vm15, %v3053_v18, %v3049_v22  ;;  %v6625_v15 = vsel %vm1854_vm9, %v1534_v48, -3.4028235e+38 }
 0x2b5   :  { %v6627_v55 = vadd.f32 %v2539_v9, %v2538_v59  ;;  %v2168_v17 = vmax.f32 %v2166_v27, %v2167_v41  ;;  %v3207_v8 = vmul.f32 %v6362_v60, %v3054_v7  ;;  %v2169_v33 = vsel %vm1895_vm3, %v6625_v15, -inf }
 0x2b6   :  { %v6632_v51 = vpop.eup %4346  ;;  %v2550_v44 = vadd.f32 %v2549_v63, %v2548_v5  ;;  %v3659_v12 = vadd.f32 %v3658_v20, %v3657_v45  ;;  %v2170_v36 = vrot.slane %v2169_v33, 4  ;;  %v3058_v31 = vsub.f32 1.0, %v3057_v50 }
 0x2b7   :  { %v6634_v1 = vpop.eup %4348  ;;  %v2546_v0 = vrot.slane %v2545_v25, 1  ;;  %v2555_v30 = vsel %vm1895_vm3, %v6632_v51, 0.0  ;;  %v2214_v59 = vsub.f32 %v6573_v47, %v2168_v17  ;;  %v3247_v23 = vmul.f32 %v3207_v8, %v6213_v35  ;;  %v154_v35 = vld [vmem:[%s6920_s3 + $0x110] sm:$0xff]  ;;  %v6656_v27 = vpop.f32.mrf.mxu1 }
 0x2b8   :  { %v2556_v60 = vrot.slane %v2555_v30, 4  ;;  %v3666_v46 = vadd.f32 %v3665_v54, %v3664_v61  ;;  %v2171_v37 = vmax.f32 %v2169_v33, %v2170_v36  ;;  %vm3062_vm14 = vweird.f32 %v6556_v14  ;;  %4093 = vmatmul.msk.f32.gmra.mxu3 %vm747_vm7, %v154_v35  ;;  %v6654_v20 = vpop.f32.mrf.mxu3 }
 0x2b9   :  { %v2292_v28 = vmul.f32 1.442695, %v2214_v59  ;;  %4175 = vmatmul.msk.f32.gmra.mxu1 %vm1895_vm3, %v3247_v23  ;;  %v3059_v45 = vmul.f32 %v6556_v14, %v3058_v31  ;;  %v3065_v5 = vand.u32 2147483647, %v6511_v32  ;;  %v3067_v53 = vand.u32 2147483648, %v6511_v32 }
 0x2ba   :  { %4350 = vrcp.f32 %v6627_v55  ;;  %v2551_v52 = vrot.slane %v2550_v44, 2  ;;  %v3660_v47 = vrot.slane %v3659_v12, 1  ;;  %v2172_v16 = vrot.slane %v2171_v37, 2 }
 0x2bb   :  { %v6649_v61 = vadd.f32 %v2546_v0, %v2545_v25  ;;  %4352 = vpow2.f32 %v2292_v28  ;;  %v3060_v9 = vadd.f32 %v6556_v14, %v3059_v45  ;;  %vm3061_vm9 = vweird.f32 %v6511_v32 }
 0x2bc   :  { %v3667_v63 = vrot.slane %v3666_v46, 1  ;;  %v2173_v22 = vmax.f32 %v2171_v37, %v2172_v16  ;;  %v3533_v18 = vmul.f32 %v6581_v42, %v6579_v10  ;;  %vm3063_vm11 = vmor %vm3061_vm9, %vm3062_vm14  ;;  %v3068_v48 = vor.u32 1.1754944e-38, %v3067_v53 }
 0x2bd   :  { %v2557_v25 = vadd.f32 %v2556_v60, %v2555_v30  ;;  %v3064_v41 = vsel %vm3063_vm11, %v6556_v14, %v3060_v9  ;;  %vm3066_vm13 = vcmp.eq.f32.partialorder %v3065_v5, 8.507059e+37  ;;  %v3072_v32 = vmul.f32 %v6634_v1, %v6585_v40 }
 0x2be   :  { %v2552_v50 = vadd.f32 %v2551_v52, %v2550_v44  ;;  %v3654_v54 = vadd.f32 %v3653_v57, %v6597_v13  ;;  %v2174_v7 = vrot.slane %v2173_v22, 1  ;;  %v3069_v17 = vsel %vm3066_vm13, %v3068_v48, %v3064_v41  ;;  %v155_v13 = vld [vmem:[%s6920_s3 + $0x118] sm:$0xff] }
 0x2bf   :  { %4354 = vrcp.f32 %v6649_v61  ;;  %v3661_v8 = vadd.f32 %v3660_v47, %v3659_v12  ;;  %v3208_v10 = vmul.f32 %v6402_v26, %v3069_v17  ;;  %v3073_v42 = vsub.f32 1.0, %v3072_v32  ;;  %v3454_v37 = vpop.f32.mrf.mxu1 }
 0x2c0   :  { %v6668_v33 = vpop.eup %4350  ;;  %v2175_v36 = vmax.f32 %v2173_v22, %v2174_v7  ;;  %v3669_v14 = vsel %vm169_vm0, %v3533_v18, 0.0  ;;  %v3668_v31 = vadd.f32 %v3667_v63, %v3666_v46  ;;  %v3897_v44 = vsel %vm3885_vm1, %v6588_v34, %v6487_v49  ;;  %4094 = vmatmul.msk.f32.gmra.mxu3 %vm747_vm7, %v155_v13 }
 0x2c1   :  { %v6677_v57 = vpop.eup %4352  ;;  %v2558_v12 = vrot.slane %v2557_v25, 2  ;;  %v3248_v26 = vmul.f32 %v3208_v10, %v6266_v58  ;;  %v3898_v0 = vsel %vm3887_vm4, %v6591_v62, %v3897_v44  ;;  %v3074_v30 = vmul.f32 %v6634_v1, %v3073_v42  ;;  %v942_v62 = vpop.f32.mrf.mxu3 }
 0x2c2   :  { %v2553_v59 = vrot.slane %v2552_v50, 1  ;;  %v2562_v23 = vsel %vm1895_vm3, %v6677_v57, 0.0  ;;  %v2215_v49 = vsub.f32 %v6625_v15, %v2175_v36  ;;  %v3899_v34 = vsel %vm3889_vm5, %v3654_v54, %v3898_v0 }
 0x2c3   :  { %v2563_v60 = vrot.slane %v2562_v23, 4  ;;  %4176 = vmatmul.msk.f32.gmra.mxu1 %vm1895_vm3, %v3248_v26  ;;  %v3900_v46 = vsel %vm3891_vm6, %v3661_v8, %v3899_v34  ;;  %v3075_v58 = vadd.f32 %v6634_v1, %v3074_v30  ;;  %vm3077_vm12 = vweird.f32 %v6634_v1 }
 0x2c4   :  { %v2294_v28 = vmul.f32 1.442695, %v2215_v49  ;;  %v3534_v45 = vmul.f32 %v6620_v11, %v6618_v3  ;;  %v3901_v15 = vsel %vm3893_vm8, %v3668_v31, %v3900_v46  ;;  %vm3076_vm15 = vweird.f32 %v6585_v40 }
 0x2c5   :  { %v6696_v5 = vpop.eup %4354  ;;  %v2559_v53 = vadd.f32 %v2558_v12, %v2557_v25  ;;  %v2564_v52 = vadd.f32 %v2563_v60, %v2562_v23  ;;  %4185 = vmatmul.msk.f32.gmra.mxu2 %vm169_vm0, %v3901_v15  ;;  %vm6699_vm14 = vmor %vm3076_vm15, %vm3077_vm12  ;;  %v3080_v16 = vand.u32 2147483647, %v6585_v40  ;;  %v3082_v35 = vand.u32 2147483648, %v6585_v40  ;;  %v156_v40 = vld [vmem:[%s6920_s3 + $0x120] sm:$0xff] }
 0x2c6   :  { %4356 = vpow2.f32 %v2294_v28  ;;  %v3079_v3 = vsel %vm6699_vm14, %v6634_v1, %v3075_v58  ;;  %v3087_v11 = vmul.f32 %v6668_v33, %v6627_v55  ;;  %v6710_v9 = vadd.f32 %v2553_v59, %v2552_v50 }
 0x2c7   :  { %v2565_v63 = vrot.slane %v2564_v52, 2  ;;  %v3670_v22 = vrot.slane %v3669_v14, 4  ;;  %v3083_v18 = vor.u32 1.1754944e-38, %v3082_v35  ;;  %v3676_v48 = vsel %vm169_vm0, %v3534_v45, 0.0  ;;  %v3457_v31 = vpop.f32.mrf.mxu1 }
 0x2c8   :  { %vm3081_vm9 = vcmp.eq.f32.partialorder %v3080_v16, 8.507059e+37  ;;  %v3088_v25 = vsub.f32 1.0, %v3087_v11  ;;  %v2560_v41 = vrot.slane %v2559_v53, 1  ;;  %v3535_v1 = vmul.f32 %v6656_v27, %v6654_v20  ;;  %4095 = vmatmul.msk.f32.gmra.mxu3 %vm747_vm7, %v156_v40 }
 0x2c9   :  { %v3084_v32 = vsel %vm3081_vm9, %v3083_v18, %v3079_v3  ;;  %vm3092_vm11 = vweird.f32 %v6668_v33  ;;  %v3095_v7 = vand.u32 2147483647, %v6627_v55  ;;  %v3097_v17 = vand.u32 2147483648, %v6627_v55  ;;  %v945_v36 = vpop.f32.mrf.mxu3 }
 0x2ca   :  { %v3209_v50 = vmul.f32 %v6444_v56, %v3084_v32  ;;  %v3089_v54 = vmul.f32 %v6668_v33, %v3088_v25  ;;  %4358 = vrcp.f32 %v6710_v9  ;;  %v2566_v8 = vadd.f32 %v2565_v63, %v2564_v52 }
 0x2cb   :  { %v3671_v10 = vadd.f32 %v3670_v22, %v3669_v14  ;;  %v3677_v42 = vrot.slane %v3676_v48, 4  ;;  %vm3091_vm13 = vweird.f32 %v6627_v55  ;;  %v3536_v44 = vmul.f32 %v3454_v37, %v942_v62  ;;  %v157_v62 = vld [vmem:[%s6920_s3 + $0x128] sm:$0xff] }
 0x2cc   :  { %v6725_v20 = vpop.eup %4356  ;;  %v3249_v27 = vmul.f32 %v3209_v50, %v6331_v43  ;;  %v3090_v56 = vadd.f32 %v6668_v33, %v3089_v54  ;;  %v6730_v13 = vadd.f32 %v2560_v41, %v2559_v53  ;;  %v3683_v14 = vsel %vm169_vm0, %v3535_v1, 0.0  ;;  %vm3093_vm12 = vmor %vm3091_vm13, %vm3092_vm11 }
 0x2cd   :  { %v2569_v12 = vsel %vm1895_vm3, %v6725_v20, 0.0  ;;  %v3098_v26 = vor.u32 1.1754944e-38, %v3097_v17  ;;  %vm3096_vm15 = vcmp.eq.f32.partialorder %v3095_v7, 8.507059e+37  ;;  %v3102_v55 = vmul.f32 %v6696_v5, %v6649_v61 }
 0x2ce   :  { %v2570_v0 = vrot.slane %v2569_v12, 4  ;;  %4177 = vmatmul.msk.f32.gmra.mxu1 %vm1895_vm3, %v3249_v27  ;;  %v3094_v43 = vsel %vm3093_vm12, %v6668_v33, %v3090_v56  ;;  %v2567_v30 = vrot.slane %v2566_v8, 1  ;;  %v3672_v59 = vrot.slane %v3671_v10, 2 }
 0x2cf   :  { %v3678_v23 = vadd.f32 %v3677_v42, %v3676_v48  ;;  %v3099_v49 = vsel %vm3096_vm15, %v3098_v26, %v3094_v43  ;;  %v3690_v46 = vsel %vm169_vm0, %v3536_v44, 0.0  ;;  %v3103_v58 = vsub.f32 1.0, %v3102_v55  ;;  %v3460_v11 = vpop.f32.mrf.mxu1 }
 0x2d0   :  { %v2571_v34 = vadd.f32 %v2570_v0, %v2569_v12  ;;  %v3210_v60 = vmul.f32 %v6490_v38, %v3099_v49  ;;  %v6746_v37 = vpop.eup %4358  ;;  %4360 = vrcp.f32 %v6730_v13  ;;  %v3684_v33 = vrot.slane %v3683_v14, 4  ;;  %4096 = vmatmul.msk.f32.gmra.mxu3 %vm747_vm7, %v157_v62 }
 0x2d1   :  { %vm3107_vm14 = vweird.f32 %v6696_v5  ;;  %v3112_v28 = vand.u32 2147483648, %v6649_v61  ;;  %v3104_v38 = vmul.f32 %v6696_v5, %v3103_v58  ;;  %v3110_v53 = vand.u32 2147483647, %v6649_v61  ;;  %v948_v3 = vpop.f32.mrf.mxu3 }
 0x2d2   :  { %v2572_v45 = vrot.slane %v2571_v34, 2  ;;  %v3250_v15 = vmul.f32 %v3210_v60, %v6356_v19  ;;  %v6754_v52 = vadd.f32 %v2567_v30, %v2566_v8  ;;  %v6756_v47 = vadd.f32 %v3672_v59, %v3671_v10 }
 0x2d3   :  { %v3691_v16 = vrot.slane %v3690_v46, 4  ;;  %v3537_v35 = vmul.f32 %v3457_v31, %v945_v36  ;;  %v3105_v22 = vadd.f32 %v6696_v5, %v3104_v38  ;;  %vm3106_vm9 = vweird.f32 %v6649_v61 }
 0x2d4   :  { %v2573_v63 = vadd.f32 %v2572_v45, %v2571_v34  ;;  %v3117_v19 = vmul.f32 %v6746_v37, %v6710_v9  ;;  %v3679_v18 = vrot.slane %v3678_v23, 2  ;;  %v3685_v48 = vadd.f32 %v3684_v33, %v3683_v14  ;;  %vm3108_vm11 = vmor %vm3106_vm9, %vm3107_vm14 }
 0x2d5   :  { %v3113_v25 = vor.u32 1.1754944e-38, %v3112_v28  ;;  %v3697_v40 = vsel %vm169_vm0, %v3537_v35, 0.0  ;;  %v3109_v32 = vsel %vm3108_vm11, %v6696_v5, %v3105_v22  ;;  %vm3111_vm13 = vcmp.eq.f32.partialorder %v3110_v53, 8.507059e+37  ;;  %v158_v5 = vld [vmem:[%s6920_s3 + $0x130] sm:$0xff]  ;;  %v159_v35 = vld [vmem:[%s6920_s3 + $0x138] sm:$0xff] }
 0x2d6   :  { %v2574_v41 = vrot.slane %v2573_v63, 1  ;;  %4178 = vmatmul.msk.f32.gmra.mxu1 %vm1895_vm3, %v3250_v15  ;;  %v3698_v1 = vrot.slane %v3697_v40, 4  ;;  %v6768_v50 = vpop.eup %4360  ;;  %4362 = vrcp.f32 %v6754_v52  ;;  %v3692_v61 = vadd.f32 %v3691_v16, %v3690_v46 }
 0x2d7   :  { %v3114_v54 = vsel %vm3111_vm13, %v3113_v25, %v3109_v32  ;;  %v3118_v7 = vsub.f32 1.0, %v3117_v19  ;;  %v3125_v10 = vand.u32 2147483647, %v6710_v9  ;;  %v3127_v42 = vand.u32 2147483648, %v6710_v9  ;;  %v3463_v43 = vpop.f32.mrf.mxu1 }
 0x2d8   :  { %v6771_v17 = vadd.f32 %v2574_v41, %v2573_v63  ;;  %v3211_v8 = vmul.f32 %v6545_v6, %v3114_v54  ;;  %v3699_v36 = vadd.f32 %v3698_v1, %v3697_v40  ;;  %vm3122_vm12 = vweird.f32 %v6746_v37  ;;  %4097 = vmatmul.msk.f32.gmra.mxu3 %vm747_vm7, %v158_v5 }
 0x2d9   :  { %v3119_v31 = vmul.f32 %v6746_v37, %v3118_v7  ;;  %v3538_v27 = vmul.f32 %v3460_v11, %v948_v3  ;;  %v6782_v56 = vadd.f32 %v3679_v18, %v3678_v23  ;;  %v3686_v44 = vrot.slane %v3685_v48, 2  ;;  %v951_v0 = vpop.f32.mrf.mxu3 }
 0x2da   :  { %4364 = vrcp.f32 %v6771_v17  ;;  %v3251_v6 = vmul.f32 %v3211_v8, %v6398_v2  ;;  %vm3121_vm15 = vweird.f32 %v6710_v9  ;;  %v3132_v26 = vmul.f32 %v6768_v50, %v6730_v13 }
 0x2db   :  { %v3120_v12 = vadd.f32 %v6746_v37, %v3119_v31  ;;  %v3704_v14 = vsel %vm169_vm0, %v3538_v27, 0.0  ;;  %v3693_v55 = vrot.slane %v3692_v61, 2  ;;  %vm3123_vm14 = vmor %vm3121_vm15, %vm3122_vm12  ;;  %vm3126_vm9 = vcmp.eq.f32.partialorder %v3125_v10, 8.507059e+37 }
 0x2dc   :  { %v3128_v30 = vor.u32 1.1754944e-38, %v3127_v42  ;;  %v3705_v59 = vrot.slane %v3704_v14, 4  ;;  %v6791_v23 = vpop.eup %4362  ;;  %v3700_v2 = vrot.slane %v3699_v36, 2  ;;  %v3133_v9 = vsub.f32 1.0, %v3132_v26 }
 0x2dd   :  { %v3124_v49 = vsel %vm3123_vm14, %v6746_v37, %v3120_v12  ;;  %v3539_v34 = vmul.f32 %v3463_v43, %v951_v0  ;;  %vm3137_vm11 = vweird.f32 %v6768_v50  ;;  %v3142_v58 = vand.u32 2147483648, %v6730_v13 }
 0x2de   :  { %4179 = vmatmul.msk.f32.gmra.mxu1 %vm1895_vm3, %v3251_v6  ;;  %v3129_v60 = vsel %vm3126_vm9, %v3128_v30, %v3124_v49  ;;  %v3706_v46 = vadd.f32 %v3705_v59, %v3704_v14  ;;  %v3134_v33 = vmul.f32 %v6768_v50, %v3133_v9  ;;  %v3140_v28 = vand.u32 2147483647, %v6730_v13 }
 0x2df   :  { %v3212_v62 = vmul.f32 %v6593_v24, %v3129_v60  ;;  %v3711_v45 = vsel %vm169_vm0, %v3539_v34, 0.0  ;;  %v3681_v37 = vrot.slane %v6782_v56, 1  ;;  %v3687_v38 = vadd.f32 %v3686_v44, %v3685_v48  ;;  %v3466_v41 = vpop.f32.mrf.mxu1 }
 0x2e0   :  { %v6801_v15 = vpop.eup %4364  ;;  %v3712_v53 = vrot.slane %v3711_v45, 4  ;;  %v3147_v16 = vmul.f32 %v6791_v23, %v6754_v52  ;;  %v3694_v24 = vadd.f32 %v3693_v55, %v3692_v61  ;;  %v3707_v3 = vrot.slane %v3706_v46, 2  ;;  %4098 = vmatmul.msk.f32.gmra.mxu3 %vm747_vm7, %v159_v35 }
 0x2e1   :  { %v3135_v11 = vadd.f32 %v6768_v50, %v3134_v33  ;;  %vm3136_vm13 = vweird.f32 %v6730_v13  ;;  %v3252_v63 = vmul.f32 %v3212_v62, %v6434_v39  ;;  %v3143_v22 = vor.u32 1.1754944e-38, %v3142_v58  ;;  %v954_v40 = vpop.f32.mrf.mxu3 }
 0x2e2   :  { %vm3138_vm12 = vmor %vm3136_vm13, %vm3137_vm11  ;;  %v3713_v19 = vadd.f32 %v3712_v53, %v3711_v45  ;;  %v3148_v18 = vsub.f32 1.0, %v3147_v16  ;;  %v3701_v48 = vadd.f32 %v3700_v2, %v3699_v36  ;;  %vm3141_vm15 = vcmp.eq.f32.partialorder %v3140_v28, 8.507059e+37 }
 0x2e3   :  { %v3139_v25 = vsel %vm3138_vm12, %v6768_v50, %v3135_v11  ;;  %v3162_v32 = vmul.f32 %v6801_v15, %v6771_v17  ;;  %vm3152_vm14 = vweird.f32 %v6791_v23  ;;  %v3708_v61 = vadd.f32 %v3707_v3, %v3706_v46 }
 0x2e4   :  { %v3144_v13 = vsel %vm3141_vm15, %v3143_v22, %v3139_v25  ;;  %v3714_v1 = vrot.slane %v3713_v19, 2  ;;  %v3149_v39 = vmul.f32 %v6791_v23, %v3148_v18  ;;  %vm3151_vm9 = vweird.f32 %v6754_v52 }
 0x2e5   :  { %v3157_v54 = vand.u32 2147483648, %v6754_v52  ;;  %v3540_v50 = vmul.f32 %v3466_v41, %v954_v40  ;;  %v3213_v7 = vmul.f32 %v6632_v51, %v3144_v13  ;;  %v3155_v10 = vand.u32 2147483647, %v6754_v52  ;;  %vm6827_vm7 = vmor %vm3151_vm9, %vm3152_vm14 }
 0x2e6   :  { %4180 = vmatmul.msk.f32.gmra.mxu1 %vm1895_vm3, %v3252_v63  ;;  %v3150_v8 = vadd.f32 %v6791_v23, %v3149_v39  ;;  %v3163_v42 = vsub.f32 1.0, %v3162_v32  ;;  %v3674_v5 = vrot.slane %v6756_v47, 1  ;;  %v3688_v36 = vrot.slane %v3687_v38, 1 }
 0x2e7   :  { %v3715_v31 = vadd.f32 %v3714_v1, %v3713_v19  ;;  %v3718_v44 = vsel %vm169_vm0, %v3540_v50, 0.0  ;;  %v3695_v6 = vrot.slane %v3694_v24, 1  ;;  %v3682_v52 = vadd.f32 %v3681_v37, %v6782_v56 }
 0x2e8   :  { %v3154_v51 = vsel %vm6827_vm7, %v6791_v23, %v3150_v8  ;;  %v3719_v12 = vrot.slane %v3718_v44, 4  ;;  %v3164_v14 = vmul.f32 %v6801_v15, %v3163_v42  ;;  %v3702_v26 = vrot.slane %v3701_v48, 1 }
 0x2e9   :  { %v3158_v0 = vor.u32 1.1754944e-38, %v3157_v54  ;;  %v3709_v43 = vrot.slane %v3708_v61, 1  ;;  %v3253_v55 = vmul.f32 %v3213_v7, %v6465_v21  ;;  %vm3156_vm11 = vcmp.eq.f32.partialorder %v3155_v10, 8.507059e+37  ;;  %v957_v34 = vpop.f32.mrf.mxu3 }
 0x2ea   :  { %v3720_v30 = vadd.f32 %v3719_v12, %v3718_v44  ;;  %v3675_v59 = vadd.f32 %v3674_v5, %v6756_v47  ;;  %v3689_v2 = vadd.f32 %v3688_v36, %v3687_v38  ;;  %v3716_v49 = vrot.slane %v3715_v31, 1  ;;  %v3469_v35 = vpop.f32.mrf.mxu1 }
 0x2eb   :  { %v3159_v9 = vsel %vm3156_vm11, %v3158_v0, %v3154_v51  ;;  %v3696_v60 = vadd.f32 %v3695_v6, %v3694_v24  ;;  %v3165_v46 = vadd.f32 %v6801_v15, %v3164_v14  ;;  %vm3167_vm13 = vweird.f32 %v6801_v15 }
 0x2ec   :  { %v3721_v23 = vrot.slane %v3720_v30, 2  ;;  %v3902_v56 = vsel %vm3881_vm2, %v3682_v52, %v3675_v59  ;;  %v3703_v58 = vadd.f32 %v3702_v26, %v3701_v48  ;;  %vm3166_vm12 = vweird.f32 %v6771_v17 }
 0x2ed   :  { %v3172_v21 = vand.u32 2147483648, %v6771_v17  ;;  %v3710_v62 = vadd.f32 %v3709_v43, %v3708_v61  ;;  %v3214_v47 = vmul.f32 %v6677_v57, %v3159_v9  ;;  %v3170_v28 = vand.u32 2147483647, %v6771_v17  ;;  %vm3168_vm15 = vmor %vm3166_vm12, %vm3167_vm13 }
 0x2ee   :  { %4181 = vmatmul.msk.f32.gmra.mxu1 %vm1895_vm3, %v3253_v55  ;;  %v3722_v33 = vadd.f32 %v3721_v23, %v3720_v30  ;;  %v3903_v45 = vsel %vm3883_vm10, %v3689_v2, %v3902_v56  ;;  %v3717_v37 = vadd.f32 %v3716_v49, %v3715_v31  ;;  %v3169_v16 = vsel %vm3168_vm15, %v6801_v15, %v3165_v46 }
 0x2ef   :  { %v3904_v38 = vsel %vm3885_vm1, %v3696_v60, %v3903_v45  ;;  %v3173_v24 = vor.u32 1.1754944e-38, %v3172_v21  ;;  %v3254_v11 = vmul.f32 %v3214_v47, %v6523_v4  ;;  %vm3171_vm14 = vcmp.eq.f32.partialorder %v3170_v28, 8.507059e+37 }
 0x2f0   :  { %v3723_v53 = vrot.slane %v3722_v33, 1  ;;  %v3905_v3 = vsel %vm3887_vm4, %v3703_v58, %v3904_v38  ;;  %v3541_v10 = vmul.f32 %v3469_v35, %v957_v34 }
 0x2f1   :  { %v3906_v57 = vsel %vm3889_vm5, %v3710_v62, %v3905_v3  ;;  %v3950_v17 = vpop.f32.mrf.mxu2  ;;  %v3174_v22 = vsel %vm3171_vm14, %v3173_v24, %v3169_v16  ;;  %v960_v19 = vpop.f32.mrf.mxu3 }
 0x2f2   :  { %v3724_v63 = vadd.f32 %v3723_v53, %v3722_v33  ;;  %v3907_v18 = vsel %vm3891_vm6, %v3717_v37, %v3906_v57  ;;  %3965 = vst.msk [vmem:[%s6922_s10] sm:$0xff] %vm169_vm0, %v3950_v17  ;;  %v3215_v4 = vmul.f32 %v6725_v20, %v3174_v22  ;;  %v3725_v31 = vsel %vm169_vm0, %v3541_v10, 0.0 }
 0x2f3   :  { %v3726_v52 = vrot.slane %v3725_v31, 4 }
 0x2f4   :  { %v3908_v15 = vsel %vm3893_vm8, %v3724_v63, %v3907_v18  ;;  %v3255_v48 = vmul.f32 %v3215_v4, %v6566_v29 }
 0x2f5   :  { %4186 = vmatmul.msk.f32.gmra.mxu2 %vm169_vm0, %v3908_v15  ;;  %v3727_v49 = vadd.f32 %v3726_v52, %v3725_v31 }
 0x2f6   :  { %4182 = vmatmul.msk.f32.gmra.mxu1 %vm1895_vm3, %v3254_v11 }
 0x2f7   :  { %v3728_v62 = vrot.slane %v3727_v49, 2 }
 0x2f9   :  { %v3472_v25 = vpop.f32.mrf.mxu1  ;;  %v963_v40 = vpop.f32.mrf.mxu3  ;;  %v3729_v16 = vadd.f32 %v3728_v62, %v3727_v49 }
 0x2fa   :  { %v3542_v50 = vmul.f32 %v3472_v25, %v960_v19 }
 0x2fb   :  { %v3730_v18 = vrot.slane %v3729_v16, 1 }
 0x2fc   :  { %v3732_v20 = vsel %vm169_vm0, %v3542_v50, 0.0 }
 0x2fd   :  { %v3733_v44 = vrot.slane %v3732_v20, 4 }
 0x2fe   :  { %4183 = vmatmul.msk.f32.gmra.mxu1 %vm1895_vm3, %v3255_v48 }
 0x2ff   :  { %v3734_v55 = vadd.f32 %v3733_v44, %v3732_v20 }
 0x301   :  { %v966_v41 = vpop.f32.mrf.mxu3  ;;  %v3735_v46 = vrot.slane %v3734_v55, 2 }
 0x303   :  { %v3475_v32 = vpop.f32.mrf.mxu1  ;;  %v3736_v45 = vadd.f32 %v3735_v46, %v3734_v55 }
 0x304   :  { %v3543_v7 = vmul.f32 %v3475_v32, %v963_v40 }
 0x305   :  { %v3737_v63 = vrot.slane %v3736_v45, 1 }
 0x306   :  { %v3739_v36 = vsel %vm169_vm0, %v3543_v7, 0.0 }
 0x307   :  { %v3740_v51 = vrot.slane %v3739_v36, 4  ;;  %v3738_v25 = vadd.f32 %v3737_v63, %v3736_v45 }
 0x309   :  { %v969_v13 = vpop.f32.mrf.mxu3  ;;  %v3741_v2 = vadd.f32 %v3740_v51, %v3739_v36 }
 0x30b   :  { %v3742_v58 = vrot.slane %v3741_v2, 2 }
 0x30d   :  { %v3478_v1 = vpop.f32.mrf.mxu1  ;;  %v3743_v38 = vadd.f32 %v3742_v58, %v3741_v2 }
 0x30e   :  { %v3544_v42 = vmul.f32 %v3478_v1, %v966_v41 }
 0x30f   :  { %v3744_v17 = vrot.slane %v3743_v38, 1 }
 0x310   :  { %v3746_v27 = vsel %vm169_vm0, %v3544_v42, 0.0 }
 0x311   :  { %v972_v39 = vpop.f32.mrf.mxu3  ;;  %v3747_v26 = vrot.slane %v3746_v27, 4  ;;  %v3745_v32 = vadd.f32 %v3744_v17, %v3743_v38 }
 0x313   :  { %v3748_v9 = vadd.f32 %v3747_v26, %v3746_v27 }
 0x315   :  { %v3749_v47 = vrot.slane %v3748_v9, 2 }
 0x317   :  { %v3481_v61 = vpop.f32.mrf.mxu1  ;;  %v3750_v35 = vadd.f32 %v3749_v47, %v3748_v9 }
 0x318   :  { %v3545_v5 = vmul.f32 %v3481_v61, %v969_v13 }
 0x319   :  { %v975_v54 = vpop.f32.mrf.mxu3  ;;  %v3751_v15 = vrot.slane %v3750_v35, 1 }
 0x31a   :  { %v3753_v6 = vsel %vm169_vm0, %v3545_v5, 0.0 }
 0x31b   :  { %v3754_v0 = vrot.slane %v3753_v6, 4  ;;  %v3752_v61 = vadd.f32 %v3751_v15, %v3750_v35 }
 0x31d   :  { %v3755_v60 = vadd.f32 %v3754_v0, %v3753_v6 }
 0x31f   :  { %v3756_v33 = vrot.slane %v3755_v60, 2 }
 0x321   :  { %v978_v14 = vpop.f32.mrf.mxu3  ;;  %v3757_v3 = vadd.f32 %v3756_v33, %v3755_v60 }
 0x322   :  { %v3484_v8 = vpop.f32.mrf.mxu1 }
 0x323   :  { %v3546_v29 = vmul.f32 %v3484_v8, %v972_v39  ;;  %v3758_v48 = vrot.slane %v3757_v3, 1  ;;  %v3731_v39 = vadd.f32 %v3730_v18, %v3729_v16 }
 0x325   :  { %v3760_v12 = vsel %vm169_vm0, %v3546_v29, 0.0  ;;  %v3759_v50 = vadd.f32 %v3758_v48, %v3757_v3  ;;  %v3909_v7 = vsel %vm3881_vm2, %v3738_v25, %v3731_v39 }
 0x326   :  { %v3761_v30 = vrot.slane %v3760_v12, 4  ;;  %v3910_v42 = vsel %vm3883_vm10, %v3745_v32, %v3909_v7 }
 0x327   :  { %v3911_v29 = vsel %vm3885_vm1, %v3752_v61, %v3910_v42 }
 0x328   :  { %v3762_v56 = vadd.f32 %v3761_v30, %v3760_v12  ;;  %v3912_v31 = vsel %vm3887_vm4, %v3759_v50, %v3911_v29 }
 0x329   :  { %v981_v28 = vpop.f32.mrf.mxu3 }
 0x32a   :  { %v3763_v37 = vrot.slane %v3762_v56, 2 }
 0x32b   :  { %v3487_v43 = vpop.f32.mrf.mxu1 }
 0x32c   :  { %v3547_v59 = vmul.f32 %v3487_v43, %v975_v54  ;;  %v3764_v57 = vadd.f32 %v3763_v37, %v3762_v56 }
 0x32e   :  { %v3767_v34 = vsel %vm169_vm0, %v3547_v59, 0.0  ;;  %v3765_v40 = vrot.slane %v3764_v57, 1 }
 0x32f   :  { %v3768_v23 = vrot.slane %v3767_v34, 4 }
 0x330   :  { %v3766_v8 = vadd.f32 %v3765_v40, %v3764_v57 }
 0x331   :  { %v3769_v21 = vadd.f32 %v3768_v23, %v3767_v34  ;;  %v984_v1 = vpop.f32.mrf.mxu3 }
 0x332   :  { %v3913_v44 = vsel %vm3889_vm5, %v3766_v8, %v3912_v31 }
 0x333   :  { %v3770_v53 = vrot.slane %v3769_v21, 2 }
 0x335   :  { %v3771_v22 = vadd.f32 %v3770_v53, %v3769_v21 }
 0x336   :  { %v3490_v24 = vpop.f32.mrf.mxu1 }
 0x337   :  { %v3548_v11 = vmul.f32 %v3490_v24, %v978_v14  ;;  %v3772_v13 = vrot.slane %v3771_v22, 1 }
 0x339   :  { %v3774_v19 = vsel %vm169_vm0, %v3548_v11, 0.0  ;;  %v3773_v5 = vadd.f32 %v3772_v13, %v3771_v22 }
 0x33a   :  { %v3775_v4 = vrot.slane %v3774_v19, 4 }
 0x33b   :  { %v3914_v6 = vsel %vm3891_vm6, %v3773_v5, %v3913_v44  ;;  %v987_v12 = vpop.f32.mrf.mxu3 }
 0x33c   :  { %v3776_v41 = vadd.f32 %v3775_v4, %v3774_v19 }
 0x33e   :  { %v3777_v54 = vrot.slane %v3776_v41, 2 }
 0x340   :  { %v3778_v10 = vadd.f32 %v3777_v54, %v3776_v41  ;;  %v3493_v20 = vpop.f32.mrf.mxu1 }
 0x341   :  { %v3549_v9 = vmul.f32 %v3493_v20, %v981_v28 }
 0x342   :  { %v3779_v36 = vrot.slane %v3778_v10, 1 }
 0x343   :  { %v990_v26 = vpop.f32.mrf.mxu3  ;;  %v3781_v58 = vsel %vm169_vm0, %v3549_v9, 0.0 }
 0x344   :  { %v3780_v27 = vadd.f32 %v3779_v36, %v3778_v10  ;;  %v3782_v38 = vrot.slane %v3781_v58, 4 }
 0x346   :  { %v3915_v51 = vsel %vm3893_vm8, %v3780_v27, %v3914_v6  ;;  %v3783_v11 = vadd.f32 %v3782_v38, %v3781_v58 }
 0x347   :  { %4187 = vmatmul.msk.f32.gmra.mxu2 %vm169_vm0, %v3915_v51 }
 0x348   :  { %v3953_v14 = vpop.f32.mrf.mxu2  ;;  %v3784_v48 = vrot.slane %v3783_v11, 2 }
 0x349   :  { %3966 = vst.msk [vmem:[%s6922_s10 + $0x8] sm:$0xff] %vm169_vm0, %v3953_v14 }
 0x34a   :  { %v3785_v50 = vadd.f32 %v3784_v48, %v3783_v11 }
 0x34b   :  { %v3496_v52 = vpop.f32.mrf.mxu1  ;;  %v993_v55 = vpop.f32.mrf.mxu3 }
 0x34c   :  { %v3550_v2 = vmul.f32 %v3496_v52, %v984_v1  ;;  %v3786_v44 = vrot.slane %v3785_v50, 1 }
 0x34e   :  { %v3788_v23 = vsel %vm169_vm0, %v3550_v2, 0.0 }
 0x34f   :  { %v3789_v47 = vrot.slane %v3788_v23, 4 }
 0x351   :  { %v3790_v35 = vadd.f32 %v3789_v47, %v3788_v23 }
 0x353   :  { %v3499_v0 = vpop.f32.mrf.mxu1  ;;  %v996_v59 = vpop.f32.mrf.mxu3  ;;  %v3791_v19 = vrot.slane %v3790_v35, 2 }
 0x354   :  { %v3551_v49 = vmul.f32 %v3499_v0, %v987_v12 }
 0x355   :  { %v3792_v13 = vadd.f32 %v3791_v19, %v3790_v35 }
 0x356   :  { %v3795_v46 = vsel %vm169_vm0, %v3551_v49, 0.0 }
 0x357   :  { %v3796_v45 = vrot.slane %v3795_v46, 4  ;;  %v3793_v20 = vrot.slane %v3792_v13, 1 }
 0x359   :  { %v3797_v3 = vadd.f32 %v3796_v45, %v3795_v46  ;;  %v3794_v14 = vadd.f32 %v3793_v20, %v3792_v13 }
 0x35b   :  { %v3502_v43 = vpop.f32.mrf.mxu1  ;;  %v999_v53 = vpop.f32.mrf.mxu3  ;;  %v3798_v15 = vrot.slane %v3797_v3, 2 }
 0x35c   :  { %v3552_v34 = vmul.f32 %v3502_v43, %v990_v26 }
 0x35d   :  { %v3799_v54 = vadd.f32 %v3798_v15, %v3797_v3 }
 0x35e   :  { %v3802_v21 = vsel %vm169_vm0, %v3552_v34, 0.0 }
 0x35f   :  { %v3803_v28 = vrot.slane %v3802_v21, 4  ;;  %v3800_v36 = vrot.slane %v3799_v54, 1 }
 0x361   :  { %v3804_v63 = vadd.f32 %v3803_v28, %v3802_v21  ;;  %v3801_v0 = vadd.f32 %v3800_v36, %v3799_v54 }
 0x363   :  { %v3505_v30 = vpop.f32.mrf.mxu1  ;;  %v3805_v25 = vrot.slane %v3804_v63, 2  ;;  %v1002_v61 = vpop.f32.mrf.mxu3 }
 0x364   :  { %v3553_v60 = vmul.f32 %v3505_v30, %v993_v55  ;;  %v3787_v55 = vadd.f32 %v3786_v44, %v3785_v50 }
 0x365   :  { %v3806_v7 = vadd.f32 %v3805_v25, %v3804_v63 }
 0x366   :  { %v3809_v33 = vsel %vm169_vm0, %v3553_v60, 0.0  ;;  %v3916_v49 = vsel %vm3881_vm2, %v3794_v14, %v3787_v55 }
 0x367   :  { %v3810_v16 = vrot.slane %v3809_v33, 4  ;;  %v3807_v6 = vrot.slane %v3806_v7, 1  ;;  %v3917_v60 = vsel %vm3883_vm10, %v3801_v0, %v3916_v49 }
 0x369   :  { %v3811_v17 = vadd.f32 %v3810_v16, %v3809_v33  ;;  %v3808_v30 = vadd.f32 %v3807_v6, %v3806_v7 }
 0x36b   :  { %v3508_v56 = vpop.f32.mrf.mxu1  ;;  %v3812_v41 = vrot.slane %v3811_v17, 2  ;;  %v3918_v46 = vsel %vm3885_vm1, %v3808_v30, %v3917_v60 }
 0x36c   :  { %v3554_v62 = vmul.f32 %v3508_v56, %v996_v59 }
 0x36d   :  { %v3813_v42 = vadd.f32 %v3812_v41, %v3811_v17 }
 0x36e   :  { %v3816_v37 = vsel %vm169_vm0, %v3554_v62, 0.0 }
 0x36f   :  { %v3817_v24 = vrot.slane %v3816_v37, 4  ;;  %v3814_v12 = vrot.slane %v3813_v42, 1 }
 0x371   :  { %v3818_v18 = vadd.f32 %v3817_v24, %v3816_v37  ;;  %v3815_v2 = vadd.f32 %v3814_v12, %v3813_v42 }
 0x373   :  { %v3511_v57 = vpop.f32.mrf.mxu1  ;;  %v3819_v1 = vrot.slane %v3818_v18, 2  ;;  %v3919_v58 = vsel %vm3887_vm4, %v3815_v2, %v3918_v46 }
 0x374   :  { %v3555_v22 = vmul.f32 %v3511_v57, %v999_v53 }
 0x375   :  { %v3820_v29 = vadd.f32 %v3819_v1, %v3818_v18 }
 0x376   :  { %v3823_v4 = vsel %vm169_vm0, %v3555_v22, 0.0 }
 0x377   :  { %v3824_v40 = vrot.slane %v3823_v4, 4  ;;  %v3821_v52 = vrot.slane %v3820_v29, 1 }
 0x378   :  { %v3956_v32 = vpop.f32.mrf.mxu2 }
 0x379   :  { %v3825_v39 = vadd.f32 %v3824_v40, %v3823_v4  ;;  %3967 = vst.msk [vmem:[%s6922_s10 + $0x10] sm:$0xff] %vm169_vm0, %v3956_v32  ;;  %v3822_v9 = vadd.f32 %v3821_v52, %v3820_v29 }
 0x37b   :  { %v3826_v8 = vrot.slane %v3825_v39, 2  ;;  %v3514_v10 = vpop.f32.mrf.mxu1  ;;  %v3920_v62 = vsel %vm3889_vm5, %v3822_v9, %v3919_v58 }
 0x37c   :  { %v3556_v5 = vmul.f32 %v3514_v10, %v1002_v61 }
 0x37d   :  { %v3827_v31 = vadd.f32 %v3826_v8, %v3825_v39 }
 0x37e   :  { %v3830_v27 = vsel %vm169_vm0, %v3556_v5, 0.0 }
 0x37f   :  { %v3831_v51 = vrot.slane %v3830_v27, 4  ;;  %v3828_v43 = vrot.slane %v3827_v31, 1 }
 0x381   :  { %v3832_v26 = vadd.f32 %v3831_v51, %v3830_v27  ;;  %v3829_v23 = vadd.f32 %v3828_v43, %v3827_v31 }
 0x383   :  { %v3833_v59 = vrot.slane %v3832_v26, 2  ;;  %v3921_v47 = vsel %vm3891_vm6, %v3829_v23, %v3920_v62 }
 0x385   :  { %v3834_v34 = vadd.f32 %v3833_v59, %v3832_v26 }
 0x387   :  { %v3835_v56 = vrot.slane %v3834_v34, 1 }
 0x389   :  { %v3836_v21 = vadd.f32 %v3835_v56, %v3834_v34 }
 0x38b   :  { %v3922_v33 = vsel %vm3893_vm8, %v3836_v21, %v3921_v47 }
 0x38c   :  { %4188 = vmatmul.msk.f32.gmra.mxu2 %vm169_vm0, %v3922_v33 }
 0x3ca   :  { %v3959_v45 = vpop.f32.mrf.mxu2 }
 0x3cb   :  { %3968 = vst.msk [vmem:[%s6922_s10 + $0x18] sm:$0xff] %vm169_vm0, %v3959_v45 }
 0x40f   :  { %v3962_v37 = vpop.f32.mrf.mxu2 }
 0x410   :  { %3969 = vst.msk [vmem:[%s6922_s10 + $0x20] sm:$0xff] %vm169_vm0, %v3962_v37 }

</bundles_post_ra>
